<compile_context>
chip_gen: v7x
topology: tpu7x:2x2x1
jax: 0.10.0
libtpu: 0.0.40
codegen_flags: <defaults>
</compile_context>

<pallas_src>
import math
import jax
import jax.numpy as jnp
from jax import lax
from jax.experimental import pallas as pl
from jax.experimental.pallas import tpu as pltpu


def _lstm_kernel(x_ref, wih_ref, whh_ref, b_ref, wfc_ref, bfc_ref,
                 out_ref, h_sc, c_sc):
    t_blk = pl.program_id(1)
    BB, TB, I = x_ref.shape
    Hp = h_sc.shape[1]

    @pl.when(t_blk == 0)
    def _init():
        h_sc[...] = jnp.zeros_like(h_sc)
        c_sc[...] = jnp.zeros_like(c_sc)

    # ---- hoisted input projection for the whole time block: one big MXU matmul ----
    xb = x_ref[...].reshape(BB * TB, I).astype(jnp.bfloat16)
    gx = jnp.dot(xb, wih_ref[...], preferred_element_type=jnp.float32) + b_ref[...]
    gx = gx.reshape(BB, TB, 4 * Hp)                      # (batch, time, gates), f32

    # ---- recurrence: only h @ W_hh per step, unrolled over the resident TB steps ----
    h = h_sc[...]
    c = c_sc[...]
    whh = whh_ref[...]
    for t in range(TB):                                  # TB is a static Python int
        gates = gx[:, t, :] + jnp.dot(h.astype(jnp.bfloat16), whh,
                                      preferred_element_type=jnp.float32)
        # Gate slices are lane-aligned since Hp is a multiple of 128.  Order: [i, f, g, o].
        i_g = jax.nn.sigmoid(gates[:, 0 * Hp:1 * Hp])
        f_g = jax.nn.sigmoid(gates[:, 1 * Hp:2 * Hp])
        g_g = jnp.tanh(gates[:, 2 * Hp:3 * Hp])
        o_g = jax.nn.sigmoid(gates[:, 3 * Hp:4 * Hp])
        c = f_g * c + i_g * g_g
        h = o_g * jnp.tanh(c)
    h_sc[...] = h
    c_sc[...] = c

    # ---- fc on the hidden state of the last timestep ----
    @pl.when(t_blk == pl.num_programs(1) - 1)
    def _final():
        out = jnp.dot(h.astype(jnp.bfloat16), wfc_ref[...],
                      preferred_element_type=jnp.float32) + bfc_ref[...]
        out_ref[...] = out.astype(out_ref.dtype)


def _time_block(seq_len, bb, hp, budget_bytes=4 * 1024 * 1024):
    """Largest multiple-of-8 time block dividing seq_len whose f32 gate slab fits budget."""
    per_step = bb * 4 * hp * 4
    max_tb = max(8, min(seq_len, budget_bytes // max(per_step, 1)))
    if seq_len <= max_tb:
        return seq_len
    for tb in range(max_tb - max_tb % 8, 7, -8):
        if seq_len % tb == 0:
            return tb
    return seq_len            # irregular length: keep the whole sequence resident


def _batch_block(batch):
    # Two batch blocks are enough to occupy both v7x TensorCores; no-op on v5e/v6e.
    if batch >= 16 and batch % 16 == 0:
        return batch // 2
    return batch


def lstm_model_forward(x, params):
    """x: (batch, seq, input_size) f32.  params from prepare_params().  -> (batch, output)."""
    B, S, I = x.shape
    wih, whh, b, wfc, bfc = params
    Hp = whh.shape[0]
    O = wfc.shape[1]

    BB = _batch_block(B)
    TB = _time_block(S, BB, Hp)
    n_b = B // BB
    n_t = S // TB

    grid_spec = pltpu.PrefetchScalarGridSpec(
        num_scalar_prefetch=0,
        grid=(n_b, n_t),
        in_specs=[
            pl.BlockSpec((BB, TB, I), lambda bb, t: (bb, t, 0)),   # x in native (B,S,I) layout
            pl.BlockSpec((I, 4 * Hp), lambda bb, t: (0, 0)),       # resident weights
            pl.BlockSpec((Hp, 4 * Hp), lambda bb, t: (0, 0)),
            pl.BlockSpec((1, 4 * Hp), lambda bb, t: (0, 0)),
            pl.BlockSpec((Hp, O), lambda bb, t: (0, 0)),
            pl.BlockSpec((1, O), lambda bb, t: (0, 0)),
        ],
        out_specs=pl.BlockSpec((BB, O), lambda bb, t: (bb, 0)),    # resident across time
        scratch_shapes=[
            pltpu.VMEM((BB, Hp), jnp.float32),   # h state (per batch block)
            pltpu.VMEM((BB, Hp), jnp.float32),   # c state
        ],
    )

    return pl.pallas_call(
        _lstm_kernel,
        out_shape=jax.ShapeDtypeStruct((B, O), jnp.float32),
        grid_spec=grid_spec,
        compiler_params=pltpu.CompilerParams(
            dimension_semantics=("parallel", "arbitrary"),  # batch parallel, time sequential
            vmem_limit_bytes=32 * 1024 * 1024,              # explicit budget, fits v7x/v6e/v5e
        ),
    )(x, wih, whh, b, wfc, bfc)


# ----------------------------- parameters ------------------------------------------


def init_params(key, input_size, hidden_size, output_size):
    """Raw PyTorch-layout parameters (nn.LSTM / nn.Linear init: U(-1/sqrt(H), 1/sqrt(H)))."""
    k = 1.0 / math.sqrt(hidden_size)
    keys = jax.random.split(key, 6)
    w_ih = jax.random.uniform(keys[0], (4 * hidden_size, input_size), jnp.float32, -k, k)
    w_hh = jax.random.uniform(keys[1], (4 * hidden_size, hidden_size), jnp.float32, -k, k)
    b_ih = jax.random.uniform(keys[2], (4 * hidden_size,), jnp.float32, -k, k)
    b_hh = jax.random.uniform(keys[3], (4 * hidden_size,), jnp.float32, -k, k)
    w_fc = jax.random.uniform(keys[4], (output_size, hidden_size), jnp.float32, -k, k)
    b_fc = jax.random.uniform(keys[5], (output_size,), jnp.float32, -k, k)
    return (w_ih, w_hh, b_ih, b_hh, w_fc, b_fc)


def _pad_gate_cols(w_t, H, Hp):
    """(X, 4H) in PyTorch gate order [i,f,g,o] -> (X, 4Hp), each gate zero-padded to Hp."""
    X = w_t.shape[0]
    out = jnp.zeros((X, 4 * Hp), w_t.dtype)
    for g in range(4):
        out = out.at[:, g * Hp:g * Hp + H].set(w_t[:, g * H:(g + 1) * H])
    return out


def prepare_params(raw, hidden_size):
    """Pad hidden dim to a multiple of 128 lanes, pre-transpose, fuse biases, cast to bf16."""
    w_ih, w_hh, b_ih, b_hh, w_fc, b_fc = raw
    H = hidden_size
    Hp = ((H + 127) // 128) * 128

    wih = _pad_gate_cols(w_ih.T, H, Hp)                                   # (I, 4Hp)
    whh = _pad_gate_cols(w_hh.T, H, Hp)                                   # (H, 4Hp)
    whh = jnp.zeros((Hp, 4 * Hp), whh.dtype).at[:H, :].set(whh)           # (Hp, 4Hp)
    b = _pad_gate_cols((b_ih + b_hh)[None, :], H, Hp)                     # (1, 4Hp) f32
    wfc = jnp.zeros((Hp, w_fc.shape[0]), w_fc.dtype).at[:H, :].set(w_fc.T)  # (Hp, O)
    bfc = b_fc[None, :]                                                   # (1, O) f32

    return (wih.astype(jnp.bfloat16), whh.astype(jnp.bfloat16), b,
            wfc.astype(jnp.bfloat16), bfc)


# ----------------------------- reference & test -------------------------------------


def _reference_forward(x, raw):
    """Pure-JAX reference of the PyTorch module (mirrors the kernel's bf16 weight cast)."""
    w_ih, w_hh, b_ih, b_hh, w_fc, b_fc = raw
    H = w_hh.shape[1]
    wih_t = w_ih.T.astype(jnp.bfloat16)
    whh_t = w_hh.T.astype(jnp.bfloat16)
    wfc_t = w_fc.T.astype(jnp.bfloat16)
    bias = (b_ih + b_hh)[None, :]

    def step(carry, x_t):
        h, c = carry
        gates = (jnp.dot(x_t.astype(jnp.bfloat16), wih_t, preferred_element_type=jnp.float32)
                 + jnp.dot(h.astype(jnp.bfloat16), whh_t, preferred_element_type=jnp.float32)
                 + bias)
        i = jax.nn.sigmoid(gates[:, 0 * H:1 * H])
        f = jax.nn.sigmoid(gates[:, 1 * H:2 * H])
        g = jnp.tanh(gates[:, 2 * H:3 * H])
        o = jax.nn.sigmoid(gates[:, 3 * H:4 * H])
        c = f * c + i * g
        h = o * jnp.tanh(c)
        return (h, c), None

    B = x.shape[0]
    h0 = jnp.zeros((B, H), jnp.float32)
    (h, _), _ = lax.scan(step, (h0, h0), jnp.transpose(x, (1, 0, 2)))
    return (jnp.dot(h.astype(jnp.bfloat16), wfc_t, preferred_element_type=jnp.float32)
            + b_fc[None, :])


if __name__ == "__main__":
    batch, seq, input_size, hidden_size, output_size = 8, 8, 16, 32, 8

    key = jax.random.PRNGKey(0)
    kx, kp = jax.random.split(key)
    x = jax.random.normal(kx, (batch, seq, input_size), jnp.float32)
    raw = init_params(kp, input_size, hidden_size, output_size)
    params = prepare_params(raw, hidden_size)

    out = jax.block_until_ready(lstm_model_forward(x, params))
    ref = jax.block_until_ready(_reference_forward(x, raw))

    assert out.shape == (batch, output_size)
    assert jnp.allclose(out, ref, atol=1e-3, rtol=1e-3), (
        "Pallas output mismatch vs reference, max abs err = "
        f"{float(jnp.max(jnp.abs(out - ref)))}")

    print("KERNEL_OK")
</pallas_src>

<mosaic_0001>
module attributes {stable_mosaic.version = 11 : i64} {
  func.func @_lstm_kernel(%arg0: i32, %arg1: i32, %arg2: memref<8x8x16xf32, #tpu.memory_space<vmem>>, %arg3: memref<16x512xbf16, #tpu.memory_space<vmem>>, %arg4: memref<128x512xbf16, #tpu.memory_space<vmem>>, %arg5: memref<1x512xf32, #tpu.memory_space<vmem>>, %arg6: memref<128x8xbf16, #tpu.memory_space<vmem>>, %arg7: memref<1x8xf32, #tpu.memory_space<vmem>>, %arg8: memref<8x8xf32, #tpu.memory_space<vmem>>, %arg9: memref<8x128xf32, #tpu.memory_space<vmem>>, %arg10: memref<8x128xf32, #tpu.memory_space<vmem>>) attributes {dimension_semantics = [#tpu.dimension_semantics<parallel>, #tpu.dimension_semantics<arbitrary>], iteration_bounds = array<i64: 1, 1>, scalar_prefetch = 0 : i64, scratch_operands = 2 : i64, tpu.core_type = #tpu.core_type<tc>, window_params = [{transform_indices = @transform_0, window_bounds = array<i64: 8, 8, 16>}, {pipeline_mode = #tpu.pipeline_mode<synchronous>, transform_indices = @transform_1, window_bounds = array<i64: 16, 512>}, {pipeline_mode = #tpu.pipeline_mode<synchronous>, transform_indices = @transform_2, window_bounds = array<i64: 128, 512>}, {pipeline_mode = #tpu.pipeline_mode<synchronous>, transform_indices = @transform_3, window_bounds = array<i64: 1, 512>}, {pipeline_mode = #tpu.pipeline_mode<synchronous>, transform_indices = @transform_4, window_bounds = array<i64: 128, 8>}, {pipeline_mode = #tpu.pipeline_mode<synchronous>, transform_indices = @transform_5, window_bounds = array<i64: 1, 8>}, {transform_indices = @transform_6, window_bounds = array<i64: 8, 8>}]} {
    %c0_i32 = arith.constant 0 : i32
    %0 = arith.cmpi eq, %arg1, %c0_i32 : i32
    %1 = arith.extui %0 : i1 to i32
    %c0_i32_0 = arith.constant 0 : i32
    %2 = arith.cmpi ne, %1, %c0_i32_0 : i32
    scf.if %2 {
      %cst_51 = arith.constant 0.000000e+00 : f32
      %260 = vector.broadcast %cst_51 : f32 to vector<8x128xf32>
      %c0_52 = arith.constant 0 : index
      %c0_53 = arith.constant 0 : index
      %261 = vector.load %arg9[%c0_52, %c0_53] : memref<8x128xf32, #tpu.memory_space<vmem>>, vector<8x128xf32>
      tpu.vector_store %arg9[%c0_52, %c0_53], %260 {strides = array<i32>} : memref<8x128xf32, #tpu.memory_space<vmem>>, vector<8x128xf32>,
      %cst_54 = arith.constant 0.000000e+00 : f32
      %262 = vector.broadcast %cst_54 : f32 to vector<8x128xf32>
      %c0_55 = arith.constant 0 : index
      %c0_56 = arith.constant 0 : index
      %263 = vector.load %arg10[%c0_55, %c0_56] : memref<8x128xf32, #tpu.memory_space<vmem>>, vector<8x128xf32>
      tpu.vector_store %arg10[%c0_55, %c0_56], %262 {strides = array<i32>} : memref<8x128xf32, #tpu.memory_space<vmem>>, vector<8x128xf32>,
    } else {
    }
    %c0 = arith.constant 0 : index
    %c0_1 = arith.constant 0 : index
    %c0_2 = arith.constant 0 : index
    %3 = vector.load %arg2[%c0, %c0_1, %c0_2] : memref<8x8x16xf32, #tpu.memory_space<vmem>>, vector<8x8x16xf32>
    %4 = vector.shape_cast %3 : vector<8x8x16xf32> to vector<64x16xf32>
    %5 = arith.truncf %4 : vector<64x16xf32> to vector<64x16xbf16>
    %c0_3 = arith.constant 0 : index
    %c0_4 = arith.constant 0 : index
    %6 = vector.load %arg3[%c0_3, %c0_4] : memref<16x512xbf16, #tpu.memory_space<vmem>>, vector<16x512xbf16>
    %cst = arith.constant dense<0.000000e+00> : vector<64x512xf32>
    %7 = tpu.matmul %5, %6, %cst {dimension_numbers = #tpu.dot_dimension_numbers<[1], [0], [0], [1], [0, 0, 1, 1], [], []>} : vector<64x16xbf16>, vector<16x512xbf16>, vector<64x512xf32> -> vector<64x512xf32>
    %c0_5 = arith.constant 0 : index
    %c0_6 = arith.constant 0 : index
    %8 = vector.load %arg5[%c0_5, %c0_6] : memref<1x512xf32, #tpu.memory_space<vmem>>, vector<1x512xf32>
    %9 = vector.broadcast %8 : vector<1x512xf32> to vector<64x512xf32>
    %10 = arith.addf %7, %9 : vector<64x512xf32>
    %11 = vector.shape_cast %10 : vector<64x512xf32> to vector<8x8x512xf32>
    %c0_7 = arith.constant 0 : index
    %c0_8 = arith.constant 0 : index
    %12 = vector.load %arg9[%c0_7, %c0_8] : memref<8x128xf32, #tpu.memory_space<vmem>>, vector<8x128xf32>
    %c0_9 = arith.constant 0 : index
    %c0_10 = arith.constant 0 : index
    %13 = vector.load %arg10[%c0_9, %c0_10] : memref<8x128xf32, #tpu.memory_space<vmem>>, vector<8x128xf32>
    %c0_11 = arith.constant 0 : index
    %c0_12 = arith.constant 0 : index
    %14 = vector.load %arg4[%c0_11, %c0_12] : memref<128x512xbf16, #tpu.memory_space<vmem>>, vector<128x512xbf16>
    %15 = vector.extract_strided_slice %11 {offsets = [0, 0, 0], sizes = [8, 1, 512], strides = [1, 1, 1]} : vector<8x8x512xf32> to vector<8x1x512xf32>
    %16 = vector.shape_cast %15 : vector<8x1x512xf32> to vector<8x512xf32>
    %17 = arith.truncf %12 : vector<8x128xf32> to vector<8x128xbf16>
    %cst_13 = arith.constant dense<0.000000e+00> : vector<8x512xf32>
    %18 = tpu.matmul %17, %14, %cst_13 {dimension_numbers = #tpu.dot_dimension_numbers<[1], [0], [0], [1], [0, 0, 1, 1], [], []>} : vector<8x128xbf16>, vector<128x512xbf16>, vector<8x512xf32> -> vector<8x512xf32>
    %19 = arith.addf %16, %18 : vector<8x512xf32>
    %20 = vector.extract_strided_slice %19 {offsets = [0, 0], sizes = [8, 128], strides = [1, 1]} : vector<8x512xf32> to vector<8x128xf32>
    %21 = arith.negf %20 : vector<8x128xf32>
    %22 = math.exp %21 : vector<8x128xf32>
    %cst_14 = arith.constant 1.000000e+00 : f32
    %23 = vector.broadcast %cst_14 : f32 to vector<8x128xf32>
    %24 = arith.addf %23, %22 : vector<8x128xf32>
    %25 = arith.divf %23, %24 : vector<8x128xf32>
    %26 = vector.extract_strided_slice %19 {offsets = [0, 128], sizes = [8, 128], strides = [1, 1]} : vector<8x512xf32> to vector<8x128xf32>
    %27 = arith.negf %26 : vector<8x128xf32>
    %28 = math.exp %27 : vector<8x128xf32>
    %cst_15 = arith.constant 1.000000e+00 : f32
    %29 = vector.broadcast %cst_15 : f32 to vector<8x128xf32>
    %30 = arith.addf %29, %28 : vector<8x128xf32>
    %31 = arith.divf %29, %30 : vector<8x128xf32>
    %32 = vector.extract_strided_slice %19 {offsets = [0, 256], sizes = [8, 128], strides = [1, 1]} : vector<8x512xf32> to vector<8x128xf32>
    %33 = math.tanh %32 : vector<8x128xf32>
    %34 = vector.extract_strided_slice %19 {offsets = [0, 384], sizes = [8, 128], strides = [1, 1]} : vector<8x512xf32> to vector<8x128xf32>
    %35 = arith.negf %34 : vector<8x128xf32>
    %36 = math.exp %35 : vector<8x128xf32>
    %cst_16 = arith.constant 1.000000e+00 : f32
    %37 = vector.broadcast %cst_16 : f32 to vector<8x128xf32>
    %38 = arith.addf %37, %36 : vector<8x128xf32>
    %39 = arith.divf %37, %38 : vector<8x128xf32>
    %40 = arith.mulf %31, %13 : vector<8x128xf32>
    %41 = arith.mulf %25, %33 : vector<8x128xf32>
    %42 = arith.addf %40, %41 : vector<8x128xf32>
    %43 = math.tanh %42 : vector<8x128xf32>
    %44 = arith.mulf %39, %43 : vector<8x128xf32>
    %45 = vector.extract_strided_slice %11 {offsets = [0, 1, 0], sizes = [8, 1, 512], strides = [1, 1, 1]} : vector<8x8x512xf32> to vector<8x1x512xf32>
    %46 = vector.shape_cast %45 : vector<8x1x512xf32> to vector<8x512xf32>
    %47 = arith.truncf %44 : vector<8x128xf32> to vector<8x128xbf16>
    %cst_17 = arith.constant dense<0.000000e+00> : vector<8x512xf32>
    %48 = tpu.matmul %47, %14, %cst_17 {dimension_numbers = #tpu.dot_dimension_numbers<[1], [0], [0], [1], [0, 0, 1, 1], [], []>} : vector<8x128xbf16>, vector<128x512xbf16>, vector<8x512xf32> -> vector<8x512xf32>
    %49 = arith.addf %46, %48 : vector<8x512xf32>
    %50 = vector.extract_strided_slice %49 {offsets = [0, 0], sizes = [8, 128], strides = [1, 1]} : vector<8x512xf32> to vector<8x128xf32>
    %51 = arith.negf %50 : vector<8x128xf32>
    %52 = math.exp %51 : vector<8x128xf32>
    %cst_18 = arith.constant 1.000000e+00 : f32
    %53 = vector.broadcast %cst_18 : f32 to vector<8x128xf32>
    %54 = arith.addf %53, %52 : vector<8x128xf32>
    %55 = arith.divf %53, %54 : vector<8x128xf32>
    %56 = vector.extract_strided_slice %49 {offsets = [0, 128], sizes = [8, 128], strides = [1, 1]} : vector<8x512xf32> to vector<8x128xf32>
    %57 = arith.negf %56 : vector<8x128xf32>
    %58 = math.exp %57 : vector<8x128xf32>
    %cst_19 = arith.constant 1.000000e+00 : f32
    %59 = vector.broadcast %cst_19 : f32 to vector<8x128xf32>
    %60 = arith.addf %59, %58 : vector<8x128xf32>
    %61 = arith.divf %59, %60 : vector<8x128xf32>
    %62 = vector.extract_strided_slice %49 {offsets = [0, 256], sizes = [8, 128], strides = [1, 1]} : vector<8x512xf32> to vector<8x128xf32>
    %63 = math.tanh %62 : vector<8x128xf32>
    %64 = vector.extract_strided_slice %49 {offsets = [0, 384], sizes = [8, 128], strides = [1, 1]} : vector<8x512xf32> to vector<8x128xf32>
    %65 = arith.negf %64 : vector<8x128xf32>
    %66 = math.exp %65 : vector<8x128xf32>
    %cst_20 = arith.constant 1.000000e+00 : f32
    %67 = vector.broadcast %cst_20 : f32 to vector<8x128xf32>
    %68 = arith.addf %67, %66 : vector<8x128xf32>
    %69 = arith.divf %67, %68 : vector<8x128xf32>
    %70 = arith.mulf %61, %42 : vector<8x128xf32>
    %71 = arith.mulf %55, %63 : vector<8x128xf32>
    %72 = arith.addf %70, %71 : vector<8x128xf32>
    %73 = math.tanh %72 : vector<8x128xf32>
    %74 = arith.mulf %69, %73 : vector<8x128xf32>
    %75 = vector.extract_strided_slice %11 {offsets = [0, 2, 0], sizes = [8, 1, 512], strides = [1, 1, 1]} : vector<8x8x512xf32> to vector<8x1x512xf32>
    %76 = vector.shape_cast %75 : vector<8x1x512xf32> to vector<8x512xf32>
    %77 = arith.truncf %74 : vector<8x128xf32> to vector<8x128xbf16>
    %cst_21 = arith.constant dense<0.000000e+00> : vector<8x512xf32>
    %78 = tpu.matmul %77, %14, %cst_21 {dimension_numbers = #tpu.dot_dimension_numbers<[1], [0], [0], [1], [0, 0, 1, 1], [], []>} : vector<8x128xbf16>, vector<128x512xbf16>, vector<8x512xf32> -> vector<8x512xf32>
    %79 = arith.addf %76, %78 : vector<8x512xf32>
    %80 = vector.extract_strided_slice %79 {offsets = [0, 0], sizes = [8, 128], strides = [1, 1]} : vector<8x512xf32> to vector<8x128xf32>
    %81 = arith.negf %80 : vector<8x128xf32>
    %82 = math.exp %81 : vector<8x128xf32>
    %cst_22 = arith.constant 1.000000e+00 : f32
    %83 = vector.broadcast %cst_22 : f32 to vector<8x128xf32>
    %84 = arith.addf %83, %82 : vector<8x128xf32>
    %85 = arith.divf %83, %84 : vector<8x128xf32>
    %86 = vector.extract_strided_slice %79 {offsets = [0, 128], sizes = [8, 128], strides = [1, 1]} : vector<8x512xf32> to vector<8x128xf32>
    %87 = arith.negf %86 : vector<8x128xf32>
    %88 = math.exp %87 : vector<8x128xf32>
    %cst_23 = arith.constant 1.000000e+00 : f32
    %89 = vector.broadcast %cst_23 : f32 to vector<8x128xf32>
    %90 = arith.addf %89, %88 : vector<8x128xf32>
    %91 = arith.divf %89, %90 : vector<8x128xf32>
    %92 = vector.extract_strided_slice %79 {offsets = [0, 256], sizes = [8, 128], strides = [1, 1]} : vector<8x512xf32> to vector<8x128xf32>
    %93 = math.tanh %92 : vector<8x128xf32>
    %94 = vector.extract_strided_slice %79 {offsets = [0, 384], sizes = [8, 128], strides = [1, 1]} : vector<8x512xf32> to vector<8x128xf32>
    %95 = arith.negf %94 : vector<8x128xf32>
    %96 = math.exp %95 : vector<8x128xf32>
    %cst_24 = arith.constant 1.000000e+00 : f32
    %97 = vector.broadcast %cst_24 : f32 to vector<8x128xf32>
    %98 = arith.addf %97, %96 : vector<8x128xf32>
    %99 = arith.divf %97, %98 : vector<8x128xf32>
    %100 = arith.mulf %91, %72 : vector<8x128xf32>
    %101 = arith.mulf %85, %93 : vector<8x128xf32>
    %102 = arith.addf %100, %101 : vector<8x128xf32>
    %103 = math.tanh %102 : vector<8x128xf32>
    %104 = arith.mulf %99, %103 : vector<8x128xf32>
    %105 = vector.extract_strided_slice %11 {offsets = [0, 3, 0], sizes = [8, 1, 512], strides = [1, 1, 1]} : vector<8x8x512xf32> to vector<8x1x512xf32>
    %106 = vector.shape_cast %105 : vector<8x1x512xf32> to vector<8x512xf32>
    %107 = arith.truncf %104 : vector<8x128xf32> to vector<8x128xbf16>
    %cst_25 = arith.constant dense<0.000000e+00> : vector<8x512xf32>
    %108 = tpu.matmul %107, %14, %cst_25 {dimension_numbers = #tpu.dot_dimension_numbers<[1], [0], [0], [1], [0, 0, 1, 1], [], []>} : vector<8x128xbf16>, vector<128x512xbf16>, vector<8x512xf32> -> vector<8x512xf32>
    %109 = arith.addf %106, %108 : vector<8x512xf32>
    %110 = vector.extract_strided_slice %109 {offsets = [0, 0], sizes = [8, 128], strides = [1, 1]} : vector<8x512xf32> to vector<8x128xf32>
    %111 = arith.negf %110 : vector<8x128xf32>
    %112 = math.exp %111 : vector<8x128xf32>
    %cst_26 = arith.constant 1.000000e+00 : f32
    %113 = vector.broadcast %cst_26 : f32 to vector<8x128xf32>
    %114 = arith.addf %113, %112 : vector<8x128xf32>
    %115 = arith.divf %113, %114 : vector<8x128xf32>
    %116 = vector.extract_strided_slice %109 {offsets = [0, 128], sizes = [8, 128], strides = [1, 1]} : vector<8x512xf32> to vector<8x128xf32>
    %117 = arith.negf %116 : vector<8x128xf32>
    %118 = math.exp %117 : vector<8x128xf32>
    %cst_27 = arith.constant 1.000000e+00 : f32
    %119 = vector.broadcast %cst_27 : f32 to vector<8x128xf32>
    %120 = arith.addf %119, %118 : vector<8x128xf32>
    %121 = arith.divf %119, %120 : vector<8x128xf32>
    %122 = vector.extract_strided_slice %109 {offsets = [0, 256], sizes = [8, 128], strides = [1, 1]} : vector<8x512xf32> to vector<8x128xf32>
    %123 = math.tanh %122 : vector<8x128xf32>
    %124 = vector.extract_strided_slice %109 {offsets = [0, 384], sizes = [8, 128], strides = [1, 1]} : vector<8x512xf32> to vector<8x128xf32>
    %125 = arith.negf %124 : vector<8x128xf32>
    %126 = math.exp %125 : vector<8x128xf32>
    %cst_28 = arith.constant 1.000000e+00 : f32
    %127 = vector.broadcast %cst_28 : f32 to vector<8x128xf32>
    %128 = arith.addf %127, %126 : vector<8x128xf32>
    %129 = arith.divf %127, %128 : vector<8x128xf32>
    %130 = arith.mulf %121, %102 : vector<8x128xf32>
    %131 = arith.mulf %115, %123 : vector<8x128xf32>
    %132 = arith.addf %130, %131 : vector<8x128xf32>
    %133 = math.tanh %132 : vector<8x128xf32>
    %134 = arith.mulf %129, %133 : vector<8x128xf32>
    %135 = vector.extract_strided_slice %11 {offsets = [0, 4, 0], sizes = [8, 1, 512], strides = [1, 1, 1]} : vector<8x8x512xf32> to vector<8x1x512xf32>
    %136 = vector.shape_cast %135 : vector<8x1x512xf32> to vector<8x512xf32>
    %137 = arith.truncf %134 : vector<8x128xf32> to vector<8x128xbf16>
    %cst_29 = arith.constant dense<0.000000e+00> : vector<8x512xf32>
    %138 = tpu.matmul %137, %14, %cst_29 {dimension_numbers = #tpu.dot_dimension_numbers<[1], [0], [0], [1], [0, 0, 1, 1], [], []>} : vector<8x128xbf16>, vector<128x512xbf16>, vector<8x512xf32> -> vector<8x512xf32>
    %139 = arith.addf %136, %138 : vector<8x512xf32>
    %140 = vector.extract_strided_slice %139 {offsets = [0, 0], sizes = [8, 128], strides = [1, 1]} : vector<8x512xf32> to vector<8x128xf32>
    %141 = arith.negf %140 : vector<8x128xf32>
    %142 = math.exp %141 : vector<8x128xf32>
    %cst_30 = arith.constant 1.000000e+00 : f32
    %143 = vector.broadcast %cst_30 : f32 to vector<8x128xf32>
    %144 = arith.addf %143, %142 : vector<8x128xf32>
    %145 = arith.divf %143, %144 : vector<8x128xf32>
    %146 = vector.extract_strided_slice %139 {offsets = [0, 128], sizes = [8, 128], strides = [1, 1]} : vector<8x512xf32> to vector<8x128xf32>
    %147 = arith.negf %146 : vector<8x128xf32>
    %148 = math.exp %147 : vector<8x128xf32>
    %cst_31 = arith.constant 1.000000e+00 : f32
    %149 = vector.broadcast %cst_31 : f32 to vector<8x128xf32>
    %150 = arith.addf %149, %148 : vector<8x128xf32>
    %151 = arith.divf %149, %150 : vector<8x128xf32>
    %152 = vector.extract_strided_slice %139 {offsets = [0, 256], sizes = [8, 128], strides = [1, 1]} : vector<8x512xf32> to vector<8x128xf32>
    %153 = math.tanh %152 : vector<8x128xf32>
    %154 = vector.extract_strided_slice %139 {offsets = [0, 384], sizes = [8, 128], strides = [1, 1]} : vector<8x512xf32> to vector<8x128xf32>
    %155 = arith.negf %154 : vector<8x128xf32>
    %156 = math.exp %155 : vector<8x128xf32>
    %cst_32 = arith.constant 1.000000e+00 : f32
    %157 = vector.broadcast %cst_32 : f32 to vector<8x128xf32>
    %158 = arith.addf %157, %156 : vector<8x128xf32>
    %159 = arith.divf %157, %158 : vector<8x128xf32>
    %160 = arith.mulf %151, %132 : vector<8x128xf32>
    %161 = arith.mulf %145, %153 : vector<8x128xf32>
    %162 = arith.addf %160, %161 : vector<8x128xf32>
    %163 = math.tanh %162 : vector<8x128xf32>
    %164 = arith.mulf %159, %163 : vector<8x128xf32>
    %165 = vector.extract_strided_slice %11 {offsets = [0, 5, 0], sizes = [8, 1, 512], strides = [1, 1, 1]} : vector<8x8x512xf32> to vector<8x1x512xf32>
    %166 = vector.shape_cast %165 : vector<8x1x512xf32> to vector<8x512xf32>
    %167 = arith.truncf %164 : vector<8x128xf32> to vector<8x128xbf16>
    %cst_33 = arith.constant dense<0.000000e+00> : vector<8x512xf32>
    %168 = tpu.matmul %167, %14, %cst_33 {dimension_numbers = #tpu.dot_dimension_numbers<[1], [0], [0], [1], [0, 0, 1, 1], [], []>} : vector<8x128xbf16>, vector<128x512xbf16>, vector<8x512xf32> -> vector<8x512xf32>
    %169 = arith.addf %166, %168 : vector<8x512xf32>
    %170 = vector.extract_strided_slice %169 {offsets = [0, 0], sizes = [8, 128], strides = [1, 1]} : vector<8x512xf32> to vector<8x128xf32>
    %171 = arith.negf %170 : vector<8x128xf32>
    %172 = math.exp %171 : vector<8x128xf32>
    %cst_34 = arith.constant 1.000000e+00 : f32
    %173 = vector.broadcast %cst_34 : f32 to vector<8x128xf32>
    %174 = arith.addf %173, %172 : vector<8x128xf32>
    %175 = arith.divf %173, %174 : vector<8x128xf32>
    %176 = vector.extract_strided_slice %169 {offsets = [0, 128], sizes = [8, 128], strides = [1, 1]} : vector<8x512xf32> to vector<8x128xf32>
    %177 = arith.negf %176 : vector<8x128xf32>
    %178 = math.exp %177 : vector<8x128xf32>
    %cst_35 = arith.constant 1.000000e+00 : f32
    %179 = vector.broadcast %cst_35 : f32 to vector<8x128xf32>
    %180 = arith.addf %179, %178 : vector<8x128xf32>
    %181 = arith.divf %179, %180 : vector<8x128xf32>
    %182 = vector.extract_strided_slice %169 {offsets = [0, 256], sizes = [8, 128], strides = [1, 1]} : vector<8x512xf32> to vector<8x128xf32>
    %183 = math.tanh %182 : vector<8x128xf32>
    %184 = vector.extract_strided_slice %169 {offsets = [0, 384], sizes = [8, 128], strides = [1, 1]} : vector<8x512xf32> to vector<8x128xf32>
    %185 = arith.negf %184 : vector<8x128xf32>
    %186 = math.exp %185 : vector<8x128xf32>
    %cst_36 = arith.constant 1.000000e+00 : f32
    %187 = vector.broadcast %cst_36 : f32 to vector<8x128xf32>
    %188 = arith.addf %187, %186 : vector<8x128xf32>
    %189 = arith.divf %187, %188 : vector<8x128xf32>
    %190 = arith.mulf %181, %162 : vector<8x128xf32>
    %191 = arith.mulf %175, %183 : vector<8x128xf32>
    %192 = arith.addf %190, %191 : vector<8x128xf32>
    %193 = math.tanh %192 : vector<8x128xf32>
    %194 = arith.mulf %189, %193 : vector<8x128xf32>
    %195 = vector.extract_strided_slice %11 {offsets = [0, 6, 0], sizes = [8, 1, 512], strides = [1, 1, 1]} : vector<8x8x512xf32> to vector<8x1x512xf32>
    %196 = vector.shape_cast %195 : vector<8x1x512xf32> to vector<8x512xf32>
    %197 = arith.truncf %194 : vector<8x128xf32> to vector<8x128xbf16>
    %cst_37 = arith.constant dense<0.000000e+00> : vector<8x512xf32>
    %198 = tpu.matmul %197, %14, %cst_37 {dimension_numbers = #tpu.dot_dimension_numbers<[1], [0], [0], [1], [0, 0, 1, 1], [], []>} : vector<8x128xbf16>, vector<128x512xbf16>, vector<8x512xf32> -> vector<8x512xf32>
    %199 = arith.addf %196, %198 : vector<8x512xf32>
    %200 = vector.extract_strided_slice %199 {offsets = [0, 0], sizes = [8, 128], strides = [1, 1]} : vector<8x512xf32> to vector<8x128xf32>
    %201 = arith.negf %200 : vector<8x128xf32>
    %202 = math.exp %201 : vector<8x128xf32>
    %cst_38 = arith.constant 1.000000e+00 : f32
    %203 = vector.broadcast %cst_38 : f32 to vector<8x128xf32>
    %204 = arith.addf %203, %202 : vector<8x128xf32>
    %205 = arith.divf %203, %204 : vector<8x128xf32>
    %206 = vector.extract_strided_slice %199 {offsets = [0, 128], sizes = [8, 128], strides = [1, 1]} : vector<8x512xf32> to vector<8x128xf32>
    %207 = arith.negf %206 : vector<8x128xf32>
    %208 = math.exp %207 : vector<8x128xf32>
    %cst_39 = arith.constant 1.000000e+00 : f32
    %209 = vector.broadcast %cst_39 : f32 to vector<8x128xf32>
    %210 = arith.addf %209, %208 : vector<8x128xf32>
    %211 = arith.divf %209, %210 : vector<8x128xf32>
    %212 = vector.extract_strided_slice %199 {offsets = [0, 256], sizes = [8, 128], strides = [1, 1]} : vector<8x512xf32> to vector<8x128xf32>
    %213 = math.tanh %212 : vector<8x128xf32>
    %214 = vector.extract_strided_slice %199 {offsets = [0, 384], sizes = [8, 128], strides = [1, 1]} : vector<8x512xf32> to vector<8x128xf32>
    %215 = arith.negf %214 : vector<8x128xf32>
    %216 = math.exp %215 : vector<8x128xf32>
    %cst_40 = arith.constant 1.000000e+00 : f32
    %217 = vector.broadcast %cst_40 : f32 to vector<8x128xf32>
    %218 = arith.addf %217, %216 : vector<8x128xf32>
    %219 = arith.divf %217, %218 : vector<8x128xf32>
    %220 = arith.mulf %211, %192 : vector<8x128xf32>
    %221 = arith.mulf %205, %213 : vector<8x128xf32>
    %222 = arith.addf %220, %221 : vector<8x128xf32>
    %223 = math.tanh %222 : vector<8x128xf32>
    %224 = arith.mulf %219, %223 : vector<8x128xf32>
    %225 = vector.extract_strided_slice %11 {offsets = [0, 7, 0], sizes = [8, 1, 512], strides = [1, 1, 1]} : vector<8x8x512xf32> to vector<8x1x512xf32>
    %226 = vector.shape_cast %225 : vector<8x1x512xf32> to vector<8x512xf32>
    %227 = arith.truncf %224 : vector<8x128xf32> to vector<8x128xbf16>
    %cst_41 = arith.constant dense<0.000000e+00> : vector<8x512xf32>
    %228 = tpu.matmul %227, %14, %cst_41 {dimension_numbers = #tpu.dot_dimension_numbers<[1], [0], [0], [1], [0, 0, 1, 1], [], []>} : vector<8x128xbf16>, vector<128x512xbf16>, vector<8x512xf32> -> vector<8x512xf32>
    %229 = arith.addf %226, %228 : vector<8x512xf32>
    %230 = vector.extract_strided_slice %229 {offsets = [0, 0], sizes = [8, 128], strides = [1, 1]} : vector<8x512xf32> to vector<8x128xf32>
    %231 = arith.negf %230 : vector<8x128xf32>
    %232 = math.exp %231 : vector<8x128xf32>
    %cst_42 = arith.constant 1.000000e+00 : f32
    %233 = vector.broadcast %cst_42 : f32 to vector<8x128xf32>
    %234 = arith.addf %233, %232 : vector<8x128xf32>
    %235 = arith.divf %233, %234 : vector<8x128xf32>
    %236 = vector.extract_strided_slice %229 {offsets = [0, 128], sizes = [8, 128], strides = [1, 1]} : vector<8x512xf32> to vector<8x128xf32>
    %237 = arith.negf %236 : vector<8x128xf32>
    %238 = math.exp %237 : vector<8x128xf32>
    %cst_43 = arith.constant 1.000000e+00 : f32
    %239 = vector.broadcast %cst_43 : f32 to vector<8x128xf32>
    %240 = arith.addf %239, %238 : vector<8x128xf32>
    %241 = arith.divf %239, %240 : vector<8x128xf32>
    %242 = vector.extract_strided_slice %229 {offsets = [0, 256], sizes = [8, 128], strides = [1, 1]} : vector<8x512xf32> to vector<8x128xf32>
    %243 = math.tanh %242 : vector<8x128xf32>
    %244 = vector.extract_strided_slice %229 {offsets = [0, 384], sizes = [8, 128], strides = [1, 1]} : vector<8x512xf32> to vector<8x128xf32>
    %245 = arith.negf %244 : vector<8x128xf32>
    %246 = math.exp %245 : vector<8x128xf32>
    %cst_44 = arith.constant 1.000000e+00 : f32
    %247 = vector.broadcast %cst_44 : f32 to vector<8x128xf32>
    %248 = arith.addf %247, %246 : vector<8x128xf32>
    %249 = arith.divf %247, %248 : vector<8x128xf32>
    %250 = arith.mulf %241, %222 : vector<8x128xf32>
    %251 = arith.mulf %235, %243 : vector<8x128xf32>
    %252 = arith.addf %250, %251 : vector<8x128xf32>
    %253 = math.tanh %252 : vector<8x128xf32>
    %254 = arith.mulf %249, %253 : vector<8x128xf32>
    %c0_45 = arith.constant 0 : index
    %c0_46 = arith.constant 0 : index
    %255 = vector.load %arg9[%c0_45, %c0_46] : memref<8x128xf32, #tpu.memory_space<vmem>>, vector<8x128xf32>
    tpu.vector_store %arg9[%c0_45, %c0_46], %254 {strides = array<i32>} : memref<8x128xf32, #tpu.memory_space<vmem>>, vector<8x128xf32>,
    %c0_47 = arith.constant 0 : index
    %c0_48 = arith.constant 0 : index
    %256 = vector.load %arg10[%c0_47, %c0_48] : memref<8x128xf32, #tpu.memory_space<vmem>>, vector<8x128xf32>
    tpu.vector_store %arg10[%c0_47, %c0_48], %252 {strides = array<i32>} : memref<8x128xf32, #tpu.memory_space<vmem>>, vector<8x128xf32>,
    %c0_i32_49 = arith.constant 0 : i32
    %257 = arith.cmpi eq, %arg1, %c0_i32_49 : i32
    %258 = arith.extui %257 : i1 to i32
    %c0_i32_50 = arith.constant 0 : i32
    %259 = arith.cmpi ne, %258, %c0_i32_50 : i32
    scf.if %259 {
      %260 = arith.truncf %254 : vector<8x128xf32> to vector<8x128xbf16>
      %c0_51 = arith.constant 0 : index
      %c0_52 = arith.constant 0 : index
      %261 = vector.load %arg6[%c0_51, %c0_52] : memref<128x8xbf16, #tpu.memory_space<vmem>>, vector<128x8xbf16>
      %cst_53 = arith.constant dense<0.000000e+00> : vector<8x8xf32>
      %262 = tpu.matmul %260, %261, %cst_53 {dimension_numbers = #tpu.dot_dimension_numbers<[1], [0], [0], [1], [0, 0, 1, 1], [], []>} : vector<8x128xbf16>, vector<128x8xbf16>, vector<8x8xf32> -> vector<8x8xf32>
      %c0_54 = arith.constant 0 : index
      %c0_55 = arith.constant 0 : index
      %263 = vector.load %arg7[%c0_54, %c0_55] : memref<1x8xf32, #tpu.memory_space<vmem>>, vector<1x8xf32>
      %264 = vector.broadcast %263 : vector<1x8xf32> to vector<8x8xf32>
      %265 = arith.addf %262, %264 : vector<8x8xf32>
      %c0_56 = arith.constant 0 : index
      %c0_57 = arith.constant 0 : index
      %266 = vector.load %arg8[%c0_56, %c0_57] : memref<8x8xf32, #tpu.memory_space<vmem>>, vector<8x8xf32>
      tpu.vector_store %arg8[%c0_56, %c0_57], %265 {strides = array<i32>} : memref<8x8xf32, #tpu.memory_space<vmem>>, vector<8x8xf32>,
    } else {
    }
    return
  }
  func.func @transform_0(%arg0: i32, %arg1: i32) -> (i32, i32, i32) {
    %c0_i32 = arith.constant 0 : i32
    %c0_i32_0 = arith.constant 0 : i32
    return %arg0, %arg1, %c0_i32 : i32, i32, i32
  }
  func.func @transform_1(%arg0: i32, %arg1: i32) -> (i32, i32) {
    %c0_i32 = arith.constant 0 : i32
    %c0_i32_0 = arith.constant 0 : i32
    %c0_i32_1 = arith.constant 0 : i32
    return %c0_i32, %c0_i32_0 : i32, i32
  }
  func.func @transform_2(%arg0: i32, %arg1: i32) -> (i32, i32) {
    %c0_i32 = arith.constant 0 : i32
    %c0_i32_0 = arith.constant 0 : i32
    %c0_i32_1 = arith.constant 0 : i32
    return %c0_i32, %c0_i32_0 : i32, i32
  }
  func.func @transform_3(%arg0: i32, %arg1: i32) -> (i32, i32) {
    %c0_i32 = arith.constant 0 : i32
    %c0_i32_0 = arith.constant 0 : i32
    %c0_i32_1 = arith.constant 0 : i32
    return %c0_i32, %c0_i32_0 : i32, i32
  }
  func.func @transform_4(%arg0: i32, %arg1: i32) -> (i32, i32) {
    %c0_i32 = arith.constant 0 : i32
    %c0_i32_0 = arith.constant 0 : i32
    %c0_i32_1 = arith.constant 0 : i32
    return %c0_i32, %c0_i32_0 : i32, i32
  }
  func.func @transform_5(%arg0: i32, %arg1: i32) -> (i32, i32) {
    %c0_i32 = arith.constant 0 : i32
    %c0_i32_0 = arith.constant 0 : i32
    %c0_i32_1 = arith.constant 0 : i32
    return %c0_i32, %c0_i32_0 : i32, i32
  }
  func.func @transform_6(%arg0: i32, %arg1: i32) -> (i32, i32) {
    %c0_i32 = arith.constant 0 : i32
    %c0_i32_0 = arith.constant 0 : i32
    return %arg0, %c0_i32 : i32, i32
  }
}

</mosaic_0001>

<bundles_post_ra>
// kernel: tpu_custom_call.1
= control target key start
LH: loop header
LB: loop body
LE: loop exit
PB: predicated region body
PF: predicated region fallthrough
CT: control target
= control target key end

     0   :  { %11 = vsyncpa [#allocation5], 0  ;;  %s7452_s0 = inlined_call_operand.vmem [shape: f32[8,8,16], index: 0, kind: input, shape index: {}]   ;;  %s7453_s1 = inlined_call_operand.hbm [shape: bf16[16,512], index: 1, kind: input, shape index: {}]   ;;  %s7454_s2 = inlined_call_operand.hbm [shape: bf16[128,512], index: 2, kind: input, shape index: {}]   ;;  %s7455_s3 = inlined_call_operand.vmem [shape: f32[1,512], index: 3, kind: input, shape index: {}]   ;;  %s7456_s4 = inlined_call_operand.vmem [shape: bf16[128,8], index: 4, kind: input, shape index: {}]   ;;  %s7457_s5 = inlined_call_operand.vmem [shape: f32[1,8], index: 5, kind: input, shape index: {}]   ;;  %s7458_s6 = inlined_call_operand.hbm [shape: f32[8,8], index: 6, kind: output, shape index: {}]  }
   0x1   :  { %12 = vsyncpa [#allocation8], 0 }
   0x2   :  { %13 = vsyncpa [#allocation6], 0  ;;  %s5661_s21 = smov [#allocation4]   ;;  %s5589_s25 = scalar_lea.hbm %s7453_s1, 512 }
   0x3   :  { %s21_s22 = sshll.u32 %s5661_s21, 4  ;;  %p5590_p0 = scmp.ne.s32.totalorder %s7453_s1, %s5589_s25  ;;  %s22_s22 = int_to_ptr.vmem [resolvable:$true] %s21_s22 }
   0x4   :  { %p5593_p1 = scmp.lt.u32.totalorder %s5589_s25, %s7453_s1 }
   0x6   :  { %p5595_p2 = pnand %p5593_p1, %p5590_p0 }
   0x8   :  { %5598 = shalt.err (!%p5595_p2)
}
   0x9   :  { %s5599_s30 = scalar_lea.vmem %s22_s22, 512  ;;  %p5604_p4 = scmp.lt.s32.totalorder %s22_s22, %s22_s22 }
   0xa   :  { %p5600_p3 = scmp.ne.s32.totalorder %s22_s22, %s5599_s30  ;;  %p5605_p5 = scmp.lt.s32.totalorder %s5599_s30, %s5599_s30 }
   0xc   :  { %p5606_p6 = por %p5605_p5, %p5604_p4 }
   0xe   :  { %p5607_p7 = pnand %p5606_p6, %p5600_p3 }
  0x10   :  { %5610 = shalt.err (!%p5607_p7)
}
  0x11   :  { %s5662_s7 = smov 256   ;;  %s5663_s8 = smov 16  }
  0x12   :  { %27 = dma.hbm_to_vmem [thread:$0]  %s7453_s1, 512, %s22_s22, [#allocation5], %s5662_s7, %s5662_s7, %s5663_s8  }
  0x13   :  { %s5664_s11 = smov [#allocation7]   ;;  %s5611_s15 = scalar_lea.hbm %s7454_s2, 4096 }
  0x14   :  { %s33_s12 = sshll.u32 %s5664_s11, 4  ;;  %p5612_p8 = scmp.ne.s32.totalorder %s7454_s2, %s5611_s15  ;;  %s34_s12 = int_to_ptr.vmem [resolvable:$true] %s33_s12 }
  0x15   :  { %p5615_p9 = scmp.lt.u32.totalorder %s5611_s15, %s7454_s2 }
  0x17   :  { %p5617_p10 = pnand %p5615_p9, %p5612_p8 }
  0x19   :  { %5620 = shalt.err (!%p5617_p10)
}
  0x1a   :  { %s5621_s20 = scalar_lea.vmem %s34_s12, 4096  ;;  %p5626_p12 = scmp.lt.s32.totalorder %s34_s12, %s34_s12 }
  0x1b   :  { %p5622_p11 = scmp.ne.s32.totalorder %s34_s12, %s5621_s20  ;;  %p5627_p13 = scmp.lt.s32.totalorder %s5621_s20, %s5621_s20 }
  0x1d   :  { %p5628_p0 = por %p5627_p13, %p5626_p12 }
  0x1f   :  { %p5629_p1 = pnand %p5628_p0, %p5622_p11 }
  0x21   :  { %5632 = shalt.err (!%p5629_p1)
}
  0x22   :  { %39 = dma.hbm_to_vmem [thread:$0]  %s7454_s2, 4096, %s34_s12, [#allocation8], %s5662_s7, %s5662_s7, %s5663_s8  }
  0x23   :  { %5655 = dma.done.wait [#allocation5], 512  }
  0x24   :  { %5656 = vsyncadd [#allocation5], 4294966784 }
  0x25   :  { %5657 = dma.done.wait [#allocation8], 4096  }
  0x26   :  { %5658 = vsyncadd [#allocation8], 4294963200  ;;  %v7459_v0 = vmov 0   ;;  %v7461_v1 = vmov 0.0   ;;  %v4406_v2 = vld [vmem:[#allocation4 + $0x4] ss:$16 sps:$4 sm:$0xff]  }
  0x27   :  { %162 = vmatprep.mubr.bf16.mxu0 %v7459_v0  ;;  %235 = vmatprep.mubr.bf16.mxu1 %v7459_v0  ;;  %57 = vst [vmem:[#allocation2] sm:$0xff] %v7461_v1  ;;  %v4408_v3 = vld [vmem:[#allocation4 + $0xc] ss:$16 sps:$4 sm:$0xff]   ;;  %v4410_v4 = vld [vmem:[#allocation4] ss:$16 sps:$4 sm:$0xff]   ;;  %vm117_vm0 = vcmask 130048  }
  0x28   :  { %130 = vmatprep.subr.bf16.mxu0 %v4406_v2  ;;  %v4411_v5 = vld [vmem:[#allocation4 + $0x8] ss:$16 sps:$4 sm:$0xff]   ;;  %203 = vmatprep.subr.bf16.mxu1 %v4408_v3  ;;  %v60_v7 = vld [vmem:[%s7452_s0 + $0x8] sm:$0xff]  ;;  %v5740_v10 = vld [vmem:[#allocation7 + $0xc] ss:$16 sps:$4 sm:$0xff]   ;;  %v5667_v50 = vmov 0.0|0.0  }
  0x29   :  { %v59_v6 = vld [vmem:[%s7452_s0] sm:$0xff]  ;;  %131 = vmatpush1.bf16.msra.mxu0 %v4410_v4  ;;  %204 = vmatpush1.bf16.msra.mxu1 %v4411_v5  ;;  %v5738_v9 = vld [vmem:[#allocation7 + $0x4] ss:$16 sps:$4 sm:$0xff]   ;;  %v5742_v11 = vld [vmem:[#allocation7] ss:$16 sps:$4 sm:$0xff]   ;;  %v77_v5 = vlaneseq  ;;  %vm882_vm1 = vcmask 1041409  }
  0x2a   :  { %v67_v8 = vpack.c.bf16 %v60_v7, %v59_v6  ;;  %v5744_v12 = vld [vmem:[#allocation7 + $0x8] ss:$16 sps:$4 sm:$0xff]   ;;  %471 = vmatprep.subr.bf16.mxu0 %v5738_v9  ;;  %v5747_v13 = vld [vmem:[#allocation7 + $0x24] ss:$16 sps:$4 sm:$0xff]   ;;  %v5751_v14 = vld [vmem:[#allocation7 + $0x2c] ss:$16 sps:$4 sm:$0xff]   ;;  %512 = vmatprep.subr.bf16.mxu1 %v5740_v10 }
  0x2b   :  { %v5755_v15 = vld [vmem:[#allocation7 + $0x20] ss:$16 sps:$4 sm:$0xff]   ;;  %v5757_v16 = vld [vmem:[#allocation7 + $0x28] ss:$16 sps:$4 sm:$0xff]   ;;  %v5769_v19 = vld [vmem:[#allocation7 + $0x44] ss:$16 sps:$4 sm:$0xff]  }
  0x2c   :  { %4128 = vmatmul.mubr.msk.bf16.vlgmr.msra.gmra.mrb[0].mxu0 %vm117_vm0, %v67_v8  ;;  %4132 = vmatmul.mubr.msk.bf16.vlgmr.msra.gmra.mrb[0].mxu1 %vm117_vm0, %v67_v8  ;;  %v61_v17 = vld [vmem:[%s7452_s0 + $0x10] sm:$0xff]  ;;  %v62_v18 = vld [vmem:[%s7452_s0 + $0x18] sm:$0xff]  ;;  %v63_v27 = vld [vmem:[%s7452_s0 + $0x20] sm:$0xff]  ;;  %vm885_vm2 = vcmask 1042434   ;;  %vm888_vm3 = vcmask 1043459   ;;  %vm891_vm4 = vcmask 1044484  }
  0x2d   :  { %472 = vmatpush1.bf16.msra.mxu0 %v5742_v11  ;;  %513 = vmatpush1.bf16.msra.mxu1 %v5744_v12  ;;  %v68_v20 = vpack.c.bf16 %v62_v18, %v61_v17  ;;  %v5772_v21 = vld [vmem:[#allocation7 + $0x4c] ss:$16 sps:$4 sm:$0xff]   ;;  %v5774_v22 = vld [vmem:[#allocation7 + $0x40] ss:$16 sps:$4 sm:$0xff]   ;;  %v5777_v23 = vld [vmem:[#allocation7 + $0x48] ss:$16 sps:$4 sm:$0xff]  }
  0x2e   :  { %473 = vmatprep.subr.bf16.mxu0 %v5747_v13  ;;  %514 = vmatprep.subr.bf16.mxu1 %v5751_v14  ;;  %v5781_v24 = vld [vmem:[#allocation7 + $0x64] ss:$16 sps:$4 sm:$0xff]   ;;  %v5784_v25 = vld [vmem:[#allocation7 + $0x6c] ss:$16 sps:$4 sm:$0xff]   ;;  %v5786_v26 = vld [vmem:[#allocation7 + $0x60] ss:$16 sps:$4 sm:$0xff]  }
  0x2f   :  { %172 = vmatprep.mubr.bf16.mxu0 %v7459_v0  ;;  %245 = vmatprep.mubr.bf16.mxu1 %v7459_v0  ;;  %v64_v28 = vld [vmem:[%s7452_s0 + $0x28] sm:$0xff]  ;;  %v5800_v29 = vld [vmem:[#allocation7 + $0x68] ss:$16 sps:$4 sm:$0xff]   ;;  %v5806_v31 = vld [vmem:[#allocation7 + $0x8c] ss:$16 sps:$4 sm:$0xff]   ;;  %vm894_vm5 = vcmask 1045509  }
  0x30   :  { %v5802_v30 = vld [vmem:[#allocation7 + $0x84] ss:$16 sps:$4 sm:$0xff]   ;;  %v69_v32 = vpack.c.bf16 %v64_v28, %v63_v27  ;;  %v5809_v33 = vld [vmem:[#allocation7 + $0x80] ss:$16 sps:$4 sm:$0xff]   ;;  %v5811_v34 = vld [vmem:[#allocation7 + $0x88] ss:$16 sps:$4 sm:$0xff]  }
  0x31   :  { %474 = vmatpush1.bf16.msra.mxu0 %v5755_v15  ;;  %515 = vmatpush1.bf16.msra.mxu1 %v5757_v16  ;;  %v4442_v35 = vld [vmem:[#allocation7 + $0xa4] ss:$16 sps:$4 sm:$0xff]   ;;  %v4444_v36 = vld [vmem:[#allocation7 + $0xac] ss:$16 sps:$4 sm:$0xff]   ;;  %v4446_v37 = vld [vmem:[#allocation7 + $0xa0] ss:$16 sps:$4 sm:$0xff]  }
  0x32   :  { %475 = vmatprep.subr.bf16.mxu0 %v5769_v19  ;;  %516 = vmatprep.subr.bf16.mxu1 %v5772_v21  ;;  %v4447_v38 = vld [vmem:[#allocation7 + $0xa8] ss:$16 sps:$4 sm:$0xff]   ;;  %v66_v40 = vld [vmem:[%s7452_s0 + $0x38] sm:$0xff]  ;;  %v5830_v42 = vld [vmem:[#allocation7 + $0xcc] ss:$16 sps:$4 sm:$0xff]   ;;  %vm897_vm6 = vcmask 1046534  }
  0x33   :  { %v65_v39 = vld [vmem:[%s7452_s0 + $0x30] sm:$0xff]  ;;  %v5827_v41 = vld [vmem:[#allocation7 + $0xc4] ss:$16 sps:$4 sm:$0xff]   ;;  %v5832_v43 = vld [vmem:[#allocation7 + $0xc0] ss:$16 sps:$4 sm:$0xff]   ;;  %vm900_vm7 = vcmask 1047559  }
  0x34   :  { %4129 = vmatmul.mubr.msk.bf16.gmra.mrb[4].mxu0 %vm117_vm0, %v68_v20  ;;  %4133 = vmatmul.mubr.msk.bf16.gmra.mrb[4].mxu1 %vm117_vm0, %v68_v20  ;;  %v70_v44 = vpack.c.bf16 %v66_v40, %v65_v39  ;;  %v5834_v45 = vld [vmem:[#allocation7 + $0xc8] ss:$16 sps:$4 sm:$0xff]   ;;  %v5836_v46 = vld [vmem:[#allocation7 + $0xe4] ss:$16 sps:$4 sm:$0xff]   ;;  %v5838_v47 = vld [vmem:[#allocation7 + $0xec] ss:$16 sps:$4 sm:$0xff]  }
  0x35   :  { %476 = vmatpush1.bf16.msra.mxu0 %v5774_v22  ;;  %182 = vmatprep.mubr.bf16.mxu0 %v7459_v0  ;;  %7568 = vst [vmem:[#allocation13_spill] sm:$0xff] %v5836_v46  ;;  %7569 = vst [vmem:[#allocation14_spill] sm:$0xff] %v5838_v47  ;;  %v5845_v48 = vld [vmem:[#allocation7 + $0xe0] ss:$16 sps:$4 sm:$0xff]   ;;  %v5850_v49 = vld [vmem:[#allocation7 + $0xe8] ss:$16 sps:$4 sm:$0xff]  }
  0x36   :  { %517 = vmatpush1.bf16.msra.mxu1 %v5777_v23  ;;  %477 = vmatprep.subr.bf16.mxu0 %v5781_v24  ;;  %7570 = vst [vmem:[#allocation15_spill] sm:$0xff] %v5845_v48  ;;  %7571 = vst [vmem:[#allocation16_spill] sm:$0xff] %v5850_v49  ;;  %vm5668_vm8 = vmmov 0   ;;  %s5669_s28 = smov [#allocation9]   ;;  %vm4106_vm9 = vcmask 64512  }
  0x37   :  { %518 = vmatprep.subr.bf16.mxu1 %v5784_v25  ;;  %255 = vmatprep.mubr.bf16.mxu1 %v7459_v0  ;;  %s4114_s29 = sshll.u32 %s5669_s28, 4  ;;  %s4115_s29 = int_to_ptr.vmem [resolvable:$true] %s4114_s29 }
  0x38   :  { %s5633_s30 = scalar_lea.vmem %s4115_s29, 128  ;;  %p5638_p3 = scmp.lt.s32.totalorder %s4115_s29, %s4115_s29 }
  0x39   :  { %478 = vmatpush1.bf16.msra.mxu0 %v5786_v26  ;;  %p5634_p2 = scmp.ne.s32.totalorder %s4115_s29, %s5633_s30  ;;  %p5639_p4 = scmp.lt.s32.totalorder %s5633_s30, %s5633_s30 }
  0x3a   :  { %519 = vmatpush1.bf16.msra.mxu1 %v5800_v29  ;;  %479 = vmatprep.subr.bf16.mxu0 %v5802_v30 }
  0x3b   :  { %520 = vmatprep.subr.bf16.mxu1 %v5806_v31  ;;  %p5640_p5 = por %p5639_p4, %p5638_p3 }
  0x3c   :  { %4130 = vmatmul.mubr.msk.bf16.gmra.mrb[8].mxu0 %vm117_vm0, %v69_v32  ;;  %4134 = vmatmul.mubr.msk.bf16.gmra.mrb[8].mxu1 %vm117_vm0, %v69_v32 }
  0x3d   :  { %480 = vmatpush1.bf16.msra.mxu0 %v5809_v33  ;;  %192 = vmatprep.mubr.bf16.mxu0 %v7459_v0  ;;  %p5641_p6 = pnand %p5640_p5, %p5634_p2 }
  0x3e   :  { %521 = vmatpush1.bf16.msra.mxu1 %v5811_v34  ;;  %481 = vmatprep.subr.bf16.mxu0 %v4442_v35 }
  0x3f   :  { %522 = vmatprep.subr.bf16.mxu1 %v4444_v36  ;;  %265 = vmatprep.mubr.bf16.mxu1 %v7459_v0 }
  0x41   :  { %482 = vmatpush1.bf16.msra.mxu0 %v4446_v37 }
  0x42   :  { %523 = vmatpush1.bf16.msra.mxu1 %v4447_v38  ;;  %483 = vmatprep.subr.bf16.mxu0 %v5827_v41 }
  0x43   :  { %524 = vmatprep.subr.bf16.mxu1 %v5830_v42 }
  0x44   :  { %4131 = vmatmul.mubr.msk.bf16.gmra.mrb[12].mxu0 %vm117_vm0, %v70_v44  ;;  %4135 = vmatmul.mubr.msk.bf16.gmra.mrb[12].mxu1 %vm117_vm0, %v70_v44 }
  0x45   :  { %484 = vmatpush1.bf16.msra.mxu0 %v5832_v43  ;;  %503 = vmatprep.mubr.bf16.mxu0 %v7459_v0 }
  0x46   :  { %525 = vmatpush1.bf16.msra.mxu1 %v5834_v45  ;;  %485 = vmatprep.subr.bf16.mxu0 %v5836_v46 }
  0x47   :  { %526 = vmatprep.subr.bf16.mxu1 %v5838_v47  ;;  %544 = vmatprep.mubr.bf16.mxu1 %v7459_v0 }
  0x49   :  { %486 = vmatpush1.bf16.msra.mxu0 %v5845_v48 }
  0x4a   :  { %527 = vmatpush1.bf16.msra.mxu1 %v5850_v49  ;;  %904 = vmatprep.subr.bf16.mxu0 %v5738_v9 }
  0x4b   :  { %945 = vmatprep.subr.bf16.mxu1 %v5740_v10 }
  0x4c   :  { %504 = vmatmul.mubr.bf16.vlgmr.msra.gmra.mrb[16].mxu0 %v5667_v50 }
  0x4d   :  { %545 = vmatmul.mubr.bf16.vlgmr.msra.gmra.mrb[16].mxu1 %v5667_v50  ;;  %905 = vmatpush1.bf16.msra.mxu0 %v5742_v11 }
  0x4e   :  { %946 = vmatpush1.bf16.msra.mxu1 %v5744_v12  ;;  %906 = vmatprep.subr.bf16.mxu0 %v5747_v13  ;;  %v78_v12 = vshrl.u32 %v77_v5, 7 }
  0x4f   :  { %947 = vmatprep.subr.bf16.mxu1 %v5751_v14  ;;  %936 = vmatprep.mubr.bf16.mxu0 %v7459_v0 }
  0x50   :  { %977 = vmatprep.mubr.bf16.mxu1 %v7459_v0 }
  0x51   :  { %907 = vmatpush1.bf16.msra.mxu0 %v5755_v15  ;;  %v79_v15 = vsub.s32 0, %v78_v12 }
  0x52   :  { %948 = vmatpush1.bf16.msra.mxu1 %v5757_v16  ;;  %908 = vmatprep.subr.bf16.mxu0 %v5769_v19  ;;  %v75_v16 = vld [vmem:[%s7455_s3] sm:$0xf] }
  0x53   :  { %949 = vmatprep.subr.bf16.mxu1 %v5772_v21  ;;  %v83_v21 = vsub.s32 1, %v78_v12 }
  0x55   :  { %909 = vmatpush1.bf16.msra.mxu0 %v5774_v22  ;;  %v87_v22 = vsub.s32 2, %v78_v12  ;;  %v5939_v28 = vrot.slane %v75_v16, %v83_v21 }
  0x56   :  { %950 = vmatpush1.bf16.msra.mxu1 %v5777_v23  ;;  %910 = vmatprep.subr.bf16.mxu0 %v5781_v24 }
  0x57   :  { %951 = vmatprep.subr.bf16.mxu1 %v5784_v25  ;;  %v80_v25 = vrot.slane %v75_v16, %v79_v15 }
  0x59   :  { %911 = vmatpush1.bf16.msra.mxu0 %v5786_v26 }
  0x5a   :  { %952 = vmatpush1.bf16.msra.mxu1 %v5800_v29  ;;  %912 = vmatprep.subr.bf16.mxu0 %v5802_v30  ;;  %v5941_v29 = vrot.slane %v75_v16, %v87_v22  ;;  %v91_v30 = vsub.s32 3, %v78_v12 }
  0x5b   :  { %953 = vmatprep.subr.bf16.mxu1 %v5806_v31 }
  0x5d   :  { %913 = vmatpush1.bf16.msra.mxu0 %v5809_v33 }
  0x5e   :  { %954 = vmatpush1.bf16.msra.mxu1 %v5811_v34  ;;  %914 = vmatprep.subr.bf16.mxu0 %v4442_v35 }
  0x5f   :  { %955 = vmatprep.subr.bf16.mxu1 %v4444_v36 }
  0x61   :  { %915 = vmatpush1.bf16.msra.mxu0 %v4446_v37 }
  0x62   :  { %956 = vmatpush1.bf16.msra.mxu1 %v4447_v38  ;;  %916 = vmatprep.subr.bf16.mxu0 %v5827_v41 }
  0x63   :  { %957 = vmatprep.subr.bf16.mxu1 %v5830_v42 }
  0x65   :  { %917 = vmatpush1.bf16.msra.mxu0 %v5832_v43 }
  0x66   :  { %958 = vmatpush1.bf16.msra.mxu1 %v5834_v45  ;;  %918 = vmatprep.subr.bf16.mxu0 %v5836_v46 }
  0x67   :  { %959 = vmatprep.subr.bf16.mxu1 %v5838_v47 }
  0x69   :  { %919 = vmatpush1.bf16.msra.mxu0 %v5845_v48 }
  0x6a   :  { %960 = vmatpush1.bf16.msra.mxu1 %v5850_v49  ;;  %1338 = vmatprep.subr.bf16.mxu0 %v5738_v9 }
  0x6b   :  { %1379 = vmatprep.subr.bf16.mxu1 %v5740_v10 }
  0xff   :  { %v164_v51 = vpop.f32.mrb[0].mxu0  ;;  %v5888_v52 = vpop.f32.mrb[0].mxu1 }
 0x100   :  { %v5890_v53 = vpop.f32.mrb[1].mxu0  ;;  %v5892_v54 = vpop.f32.mrb[1].mxu1  ;;  %v5943_v31 = vadd.f32 %v164_v51, %v80_v25 }
 0x101   :  { %v168_v55 = vpop.f32.mrb[2].mxu0  ;;  %v5894_v56 = vpop.f32.mrb[2].mxu1 }
 0x102   :  { %v5896_v57 = vpop.f32.mrb[3].mxu0  ;;  %v5898_v58 = vpop.f32.mrb[3].mxu1  ;;  %7572 = vst [vmem:[#allocation17_spill] sm:$0xff] %v5943_v31  ;;  %v5945_v32 = vadd.f32 %v168_v55, %v80_v25 }
 0x104   :  { %7573 = vst [vmem:[#allocation18_spill] sm:$0xff] %v5945_v32 }
 0x107   :  { %v174_v59 = vpop.f32.mrb[4].mxu0  ;;  %v5900_v60 = vpop.f32.mrb[4].mxu1 }
 0x108   :  { %v5902_v61 = vpop.f32.mrb[5].mxu0  ;;  %v5904_v62 = vpop.f32.mrb[5].mxu1  ;;  %v5947_v33 = vadd.f32 %v174_v59, %v80_v25 }
 0x109   :  { %v178_v63 = vpop.f32.mrb[6].mxu0  ;;  %v5906_v2 = vpop.f32.mrb[6].mxu1 }
 0x10a   :  { %v5908_v3 = vpop.f32.mrb[7].mxu0  ;;  %v5910_v4 = vpop.f32.mrb[7].mxu1  ;;  %7574 = vst [vmem:[#allocation19_spill] sm:$0xff] %v5947_v33  ;;  %v5949_v34 = vadd.f32 %v178_v63, %v80_v25 }
 0x10c   :  { %7575 = vst [vmem:[#allocation20_spill] sm:$0xff] %v5949_v34 }
 0x10f   :  { %v184_v6 = vpop.f32.mrb[8].mxu0  ;;  %v5912_v7 = vpop.f32.mrb[8].mxu1 }
 0x110   :  { %v5914_v8 = vpop.f32.mrb[9].mxu0  ;;  %v5916_v9 = vpop.f32.mrb[9].mxu1  ;;  %v5951_v35 = vadd.f32 %v184_v6, %v80_v25 }
 0x111   :  { %v188_v10 = vpop.f32.mrb[10].mxu0  ;;  %v5918_v11 = vpop.f32.mrb[10].mxu1 }
 0x112   :  { %v5920_v13 = vpop.f32.mrb[11].mxu0  ;;  %v5922_v14 = vpop.f32.mrb[11].mxu1  ;;  %7576 = vst [vmem:[#allocation21_spill] sm:$0xff] %v5951_v35  ;;  %v5953_v36 = vadd.f32 %v188_v10, %v80_v25 }
 0x114   :  { %7577 = vst [vmem:[#allocation22_spill] sm:$0xff] %v5953_v36 }
 0x117   :  { %v194_v17 = vpop.f32.mrb[12].mxu0  ;;  %v5927_v18 = vpop.f32.mrb[12].mxu1 }
 0x118   :  { %v5929_v19 = vpop.f32.mrb[13].mxu0  ;;  %v5931_v20 = vpop.f32.mrb[13].mxu1  ;;  %v5955_v37 = vadd.f32 %v194_v17, %v80_v25 }
 0x119   :  { %v198_v23 = vpop.f32.mrb[14].mxu0  ;;  %v5933_v24 = vpop.f32.mrb[14].mxu1 }
 0x11a   :  { %v5935_v26 = vpop.f32.mrb[15].mxu0  ;;  %v5937_v27 = vpop.f32.mrb[15].mxu1  ;;  %7578 = vst [vmem:[#allocation23_spill] sm:$0xff] %v5955_v37  ;;  %v5957_v38 = vadd.f32 %v198_v23, %v80_v25 }
 0x11c   :  { %7579 = vst [vmem:[#allocation24_spill] sm:$0xff] %v5957_v38 }
 0x11f   :  { %v505_v39 = vpop.f32.mrb[16].mxu0 }
 0x120   :  { %v557_v40 = vrot.slane %v505_v39, 1  ;;  %v561_v44 = vrot.slane %v505_v39, 2  ;;  %v565_v50 = vrot.slane %v505_v39, 3  ;;  %v569_v51 = vrot.slane %v505_v39, 4  ;;  %v5959_v5 = vpop.f32.mrb[16].mxu1  ;;  %v5961_v55 = vpop.f32.mrb[17].mxu0 }
 0x121   :  { %v573_v59 = vrot.slane %v505_v39, 5  ;;  %v577_v63 = vrot.slane %v505_v39, 6  ;;  %v581_v12 = vrot.slane %v505_v39, 7  ;;  %v617_v6 = vadd.f32 %v505_v39, %v5943_v31  ;;  %v5964_v10 = vpop.f32.mrb[17].mxu1  ;;  %v509_v15 = vpop.f32.mrb[18].mxu0 }
 0x122   :  { %v621_v17 = vadd.f32 %v557_v40, %v5945_v32  ;;  %v625_v21 = vadd.f32 %v561_v44, %v5947_v33  ;;  %v629_v22 = vadd.f32 %v565_v50, %v5949_v34  ;;  %v633_v23 = vadd.f32 %v569_v51, %v5951_v35  ;;  %v510_v25 = vpop.f32.mrb[19].mxu0  ;;  %v550_v0 = vpop.f32.mrb[18].mxu1 }
 0x123   :  { %v637_v1 = vadd.f32 %v573_v59, %v5953_v36  ;;  %v641_v49 = vadd.f32 %v577_v63, %v5955_v37  ;;  %v4168_v48 = vmul.f32 -1.442695, %v617_v6  ;;  %v551_v47 = vpop.f32.mrb[19].mxu1  ;;  %v645_v39 = vadd.f32 %v581_v12, %v5957_v38 }
 0x124   :  { %v4169_v31 = vmul.f32 -1.442695, %v621_v17  ;;  %v4170_v15 = vmul.f32 -1.442695, %v625_v21  ;;  %v4171_v46 = vmul.f32 -1.442695, %v629_v22  ;;  %v5975_v40 = vadd.f32 %v5888_v52, %v5941_v29 }
 0x125   :  { %v5977_v44 = vrot.slane %v75_v16, %v91_v30  ;;  %4468 = vpow2.f32 %v4168_v48  ;;  %v4172_v50 = vmul.f32 -1.442695, %v633_v23  ;;  %v5981_v0 = vadd.f32 %v5890_v53, %v5939_v28 }
 0x126   :  { %7580 = vst [vmem:[#allocation25_spill] sm:$0xff] %v5975_v40  ;;  %4470 = vpow2.f32 %v4169_v31  ;;  %v4173_v51 = vmul.f32 -1.442695, %v637_v1  ;;  %v559_v47 = vrot.slane %v5959_v5, 1  ;;  %v5986_v59 = vadd.f32 %v5894_v56, %v5941_v29 }
 0x127   :  { %7581 = vst [vmem:[#allocation26_spill] sm:$0xff] %v5981_v0  ;;  %4472 = vpow2.f32 %v4170_v15  ;;  %v4174_v63 = vmul.f32 -1.442695, %v641_v49  ;;  %v563_v52 = vrot.slane %v5959_v5, 2  ;;  %v5991_v48 = vadd.f32 %v5900_v60, %v5941_v29 }
 0x128   :  { %7582 = vst [vmem:[#allocation27_spill] sm:$0xff] %v5986_v59  ;;  %4474 = vpow2.f32 %v4171_v46  ;;  %v4175_v16 = vmul.f32 -1.442695, %v645_v39  ;;  %v567_v53 = vrot.slane %v5959_v5, 3  ;;  %v5996_v1 = vadd.f32 %v5912_v7, %v5941_v29 }
 0x129   :  { %7583 = vst [vmem:[#allocation28_spill] sm:$0xff] %v5991_v48  ;;  %4476 = vpow2.f32 %v4172_v50  ;;  %v571_v56 = vrot.slane %v5959_v5, 4  ;;  %v619_v49 = vadd.f32 %v5959_v5, %v5975_v40  ;;  %v6003_v30 = vadd.f32 %v5892_v54, %v5977_v44 }
 0x12a   :  { %7584 = vst [vmem:[#allocation29_spill] sm:$0xff] %v5996_v1  ;;  %v6007_v46 = vadd.f32 %v5906_v2, %v5941_v29  ;;  %4478 = vpow2.f32 %v4173_v51  ;;  %v623_v60 = vadd.f32 %v559_v47, %v5986_v59  ;;  %v6012_v7 = vadd.f32 %v5896_v57, %v5939_v28 }
 0x12b   :  { %7585 = vst [vmem:[#allocation30_spill] sm:$0xff] %v6003_v30  ;;  %v6016_v31 = vadd.f32 %v5898_v58, %v5977_v44  ;;  %4480 = vpow2.f32 %v4174_v63  ;;  %v627_v12 = vadd.f32 %v563_v52, %v5991_v48  ;;  %v6021_v54 = vadd.f32 %v5902_v61, %v5939_v28 }
 0x12c   :  { %7586 = vst [vmem:[#allocation31_spill] sm:$0xff] %v6007_v46  ;;  %7587 = vst [vmem:[#allocation32_spill] sm:$0xff] %v6012_v7  ;;  %v6025_v2 = vadd.f32 %v5904_v62, %v5977_v44  ;;  %4482 = vpow2.f32 %v4175_v16  ;;  %v631_v6 = vadd.f32 %v567_v53, %v6007_v46  ;;  %v6030_v57 = vadd.f32 %v5908_v3, %v5939_v28 }
 0x12d   :  { %7588 = vst [vmem:[#allocation33_spill] sm:$0xff] %v6016_v31  ;;  %7589 = vst [vmem:[#allocation34_spill] sm:$0xff] %v6021_v54  ;;  %v6034_v58 = vadd.f32 %v5910_v4, %v5977_v44  ;;  %v635_v17 = vadd.f32 %v571_v56, %v5996_v1  ;;  %4484 = vtanh.f32 %v619_v49  ;;  %v6039_v61 = vadd.f32 %v5914_v8, %v5939_v28 }
 0x12e   :  { %7590 = vst [vmem:[#allocation35_spill] sm:$0xff] %v6025_v2  ;;  %7591 = vst [vmem:[#allocation36_spill] sm:$0xff] %v6030_v57  ;;  %v6043_v62 = vadd.f32 %v5918_v11, %v5941_v29  ;;  %v575_v21 = vrot.slane %v5959_v5, 5  ;;  %4486 = vtanh.f32 %v623_v60  ;;  %v6048_v22 = vadd.f32 %v5916_v9, %v5977_v44 }
 0x12f   :  { %7592 = vst [vmem:[#allocation37_spill] sm:$0xff] %v6039_v61  ;;  %v4469_v3 = vpop.eup %4468  ;;  %v6052_v4 = vadd.f32 %v5927_v18, %v5941_v29  ;;  %v579_v23 = vrot.slane %v5959_v5, 6  ;;  %4488 = vtanh.f32 %v627_v12  ;;  %v6057_v11 = vadd.f32 %v5920_v13, %v5939_v28 }
 0x130   :  { %7593 = vst [vmem:[#allocation38_spill] sm:$0xff] %v6043_v62  ;;  %v4471_v8 = vpop.eup %4470  ;;  %v6061_v25 = vadd.f32 %v5929_v19, %v5939_v28  ;;  %v673_v39 = vadd.f32 1.0, %v4469_v3  ;;  %4490 = vtanh.f32 %v631_v6  ;;  %v6065_v15 = vadd.f32 %v5933_v24, %v5941_v29 }
 0x131   :  { %7594 = vst [vmem:[#allocation39_spill] sm:$0xff] %v6052_v4  ;;  %7595 = vst [vmem:[#allocation40_spill] sm:$0xff] %v6057_v11  ;;  %v4473_v9 = vpop.eup %4472  ;;  %v674_v18 = vadd.f32 1.0, %v4471_v8  ;;  %v583_v50 = vrot.slane %v5959_v5, 7  ;;  %4492 = vtanh.f32 %v635_v17  ;;  %v639_v13 = vadd.f32 %v575_v21, %v6043_v62 }
 0x132   :  { %7596 = vst [vmem:[#allocation41_spill] sm:$0xff] %v6061_v25  ;;  %7597 = vst [vmem:[#allocation42_spill] sm:$0xff] %v6065_v15  ;;  %v4475_v51 = vpop.eup %4474  ;;  %v675_v47 = vadd.f32 1.0, %v4473_v9  ;;  %4494 = vrcp.f32 %v673_v39  ;;  %v558_v63 = vrot.slane %v5961_v55, 1  ;;  %v643_v16 = vadd.f32 %v579_v23, %v6052_v4 }
 0x133   :  { %v4477_v19 = vpop.eup %4476  ;;  %v676_v52 = vadd.f32 1.0, %v4475_v51  ;;  %4496 = vrcp.f32 %v674_v18  ;;  %v562_v53 = vrot.slane %v5961_v55, 2  ;;  %v566_v5 = vrot.slane %v5961_v55, 3 }
 0x134   :  { %v4479_v24 = vpop.eup %4478  ;;  %v677_v29 = vadd.f32 1.0, %v4477_v19  ;;  %4498 = vrcp.f32 %v675_v47  ;;  %v570_v56 = vrot.slane %v5961_v55, 4  ;;  %v574_v12 = vrot.slane %v5961_v55, 5 }
 0x135   :  { %v4481_v49 = vpop.eup %4480  ;;  %v678_v60 = vadd.f32 1.0, %v4479_v24  ;;  %4500 = vrcp.f32 %v676_v52  ;;  %v618_v6 = vadd.f32 %v5961_v55, %v5981_v0  ;;  %v578_v3 = vrot.slane %v5961_v55, 6 }
 0x136   :  { %v4483_v17 = vpop.eup %4482  ;;  %v679_v21 = vadd.f32 1.0, %v4481_v49  ;;  %4502 = vrcp.f32 %v677_v29  ;;  %v622_v23 = vadd.f32 %v558_v63, %v6012_v7  ;;  %v582_v9 = vrot.slane %v5961_v55, 7 }
 0x137   :  { %v4485_v8 = vpop.eup %4484  ;;  %v680_v39 = vadd.f32 1.0, %v4483_v17  ;;  %4504 = vrcp.f32 %v678_v60  ;;  %v626_v18 = vadd.f32 %v562_v53, %v6021_v54  ;;  %v647_v47 = vadd.f32 %v583_v50, %v6065_v15 }
 0x138   :  { %v4487_v51 = vpop.eup %4486  ;;  %4506 = vrcp.f32 %v679_v21  ;;  %v630_v19 = vadd.f32 %v566_v5, %v6030_v57  ;;  %v634_v52 = vadd.f32 %v570_v56, %v6039_v61  ;;  %v6086_v29 = vadd.f32 %v5935_v26, %v5939_v28 }
 0x139   :  { %v4489_v24 = vpop.eup %4488  ;;  %4508 = vrcp.f32 %v680_v39  ;;  %v638_v63 = vadd.f32 %v574_v12, %v6057_v11  ;;  %v4176_v49 = vmul.f32 -1.442695, %v618_v6  ;;  %v642_v53 = vadd.f32 %v578_v3, %v6061_v25 }
 0x13a   :  { %7598 = vst [vmem:[#allocation43_spill] sm:$0xff] %v6086_v29  ;;  %v4491_v55 = vpop.eup %4490  ;;  %4510 = vtanh.f32 %v639_v13  ;;  %v4177_v60 = vmul.f32 -1.442695, %v622_v23  ;;  %v560_v50 = vrot.slane %v5964_v10, 1  ;;  %v646_v5 = vadd.f32 %v582_v9, %v6086_v29 }
 0x13b   :  { %v4493_v17 = vpop.eup %4492  ;;  %4512 = vtanh.f32 %v643_v16  ;;  %v4178_v56 = vmul.f32 -1.442695, %v626_v18  ;;  %v564_v21 = vrot.slane %v5964_v10, 2  ;;  %v4179_v28 = vmul.f32 -1.442695, %v630_v19 }
 0x13c   :  { %v4495_v26 = vpop.eup %4494  ;;  %4514 = vtanh.f32 %v647_v47  ;;  %v4180_v39 = vmul.f32 -1.442695, %v634_v52  ;;  %v568_v12 = vrot.slane %v5964_v10, 3  ;;  %v572_v3 = vrot.slane %v5964_v10, 4 }
 0x13d   :  { %v4497_v6 = vpop.eup %4496  ;;  %v6094_v13 = vmul.f32 %v4495_v26, %v4485_v8  ;;  %4516 = vpow2.f32 %v4176_v49  ;;  %v620_v16 = vadd.f32 %v5964_v10, %v6003_v30  ;;  %v4181_v18 = vmul.f32 -1.442695, %v638_v63 }
 0x13e   :  { %v4499_v23 = vpop.eup %4498  ;;  %v6099_v9 = vmul.f32 %v4497_v6, %v4487_v51  ;;  %4518 = vpow2.f32 %v4177_v60  ;;  %v624_v47 = vadd.f32 %v560_v50, %v6016_v31  ;;  %v4182_v29 = vmul.f32 -1.442695, %v642_v53 }
 0x13f   :  { %v4501_v19 = vpop.eup %4500  ;;  %v6102_v52 = vmul.f32 %v4499_v23, %v4489_v24  ;;  %4520 = vpow2.f32 %v4178_v56  ;;  %v628_v8 = vadd.f32 %v564_v21, %v6025_v2  ;;  %v4183_v25 = vmul.f32 -1.442695, %v646_v5 }
 0x140   :  { %v4503_v49 = vpop.eup %4502  ;;  %v6105_v26 = vmul.f32 %v4501_v19, %v4491_v55  ;;  %4522 = vpow2.f32 %v4179_v28  ;;  %v632_v30 = vadd.f32 %v568_v12, %v6034_v58  ;;  %v636_v63 = vadd.f32 %v572_v3, %v6048_v22 }
 0x141   :  { %v4505_v51 = vpop.eup %4504  ;;  %v6108_v6 = vmul.f32 %v4503_v49, %v4493_v17  ;;  %4524 = vpow2.f32 %v4180_v39  ;;  %v4184_v60 = vmul.f32 -1.442695, %v620_v16  ;;  %v4185_v50 = vmul.f32 -1.442695, %v624_v47 }
 0x142   :  { %v4507_v24 = vpop.eup %4506  ;;  %4526 = vpow2.f32 %v4181_v18  ;;  %v4186_v56 = vmul.f32 -1.442695, %v628_v8  ;;  %v4187_v55 = vmul.f32 -1.442695, %v632_v30  ;;  %v4188_v5 = vmul.f32 -1.442695, %v636_v63 }
 0x143   :  { %v4509_v53 = vpop.eup %4508  ;;  %4528 = vpow2.f32 %v4182_v29  ;;  %v6115_v39 = vadd.f32 %v5922_v14, %v5977_v44  ;;  %v576_v3 = vrot.slane %v5964_v10, 5  ;;  %v580_v30 = vrot.slane %v5964_v10, 6 }
 0x144   :  { %v4511_v21 = vpop.eup %4510  ;;  %4530 = vpow2.f32 %v4183_v25  ;;  %v6122_v25 = vadd.f32 %v5931_v20, %v5977_v44  ;;  %v6129_v14 = vadd.f32 %v5937_v27, %v5977_v44  ;;  %v584_v19 = vrot.slane %v5964_v10, 7 }
 0x145   :  { %v4513_v28 = vpop.eup %4512  ;;  %4532 = vpow2.f32 %v4184_v60  ;;  %v6111_v12 = vmul.f32 %v4511_v21, %v4505_v51  ;;  %v640_v63 = vadd.f32 %v576_v3, %v6115_v39 }
 0x146   :  { %v4515_v17 = vpop.eup %4514  ;;  %4534 = vpow2.f32 %v4185_v50  ;;  %v6118_v16 = vmul.f32 %v4513_v28, %v4507_v24  ;;  %v644_v50 = vadd.f32 %v580_v30, %v6122_v25  ;;  %v648_v44 = vadd.f32 %v584_v19, %v6129_v14 }
 0x147   :  { %v4517_v29 = vpop.eup %4516  ;;  %4536 = vpow2.f32 %v4186_v56  ;;  %v6125_v23 = vmul.f32 %v4515_v17, %v4509_v53  ;;  %v4189_v28 = vmul.f32 -1.442695, %v640_v63 }
 0x148   :  { %v4519_v18 = vpop.eup %4518  ;;  %v721_v47 = vadd.f32 1.0, %v4517_v29  ;;  %4538 = vpow2.f32 %v4187_v55  ;;  %v4190_v3 = vmul.f32 -1.442695, %v644_v50 }
 0x149   :  { %v4521_v8 = vpop.eup %4520  ;;  %v722_v49 = vadd.f32 1.0, %v4519_v18  ;;  %4540 = vpow2.f32 %v4188_v5  ;;  %v4191_v18 = vmul.f32 -1.442695, %v648_v44 }
 0x14a   :  { %v4523_v51 = vpop.eup %4522  ;;  %v723_v20 = vadd.f32 1.0, %v4521_v8  ;;  %4542 = vrcp.f32 %v721_v47 }
 0x14b   :  { %v4525_v60 = vpop.eup %4524  ;;  %v724_v24 = vadd.f32 1.0, %v4523_v51  ;;  %4544 = vrcp.f32 %v722_v49  ;;  %v7599_v49 = vmov 0.0  }
 0x14c   :  { %v4527_v53 = vpop.eup %4526  ;;  %v725_v27 = vadd.f32 1.0, %v4525_v60  ;;  %4546 = vrcp.f32 %v723_v20  ;;  %v802_v19 = vrot.slane %v7599_v49, 1  ;;  %v803_v60 = vrot.slane %v7599_v49, 2 }
 0x14d   :  { %v4529_v10 = vpop.eup %4528  ;;  %v726_v56 = vadd.f32 1.0, %v4527_v53  ;;  %4548 = vrcp.f32 %v724_v24  ;;  %v804_v53 = vrot.slane %v7599_v49, 3 }
 0x14e   :  { %v4531_v21 = vpop.eup %4530  ;;  %v727_v55 = vadd.f32 1.0, %v4529_v10  ;;  %4550 = vrcp.f32 %v725_v27 }
 0x14f   :  { %v4533_v5 = vpop.eup %4532  ;;  %v728_v17 = vadd.f32 1.0, %v4531_v21  ;;  %4552 = vrcp.f32 %v726_v56  ;;  %v805_v56 = vrot.slane %v7599_v49, 4 }
 0x150   :  { %v4535_v29 = vpop.eup %4534  ;;  %4554 = vrcp.f32 %v727_v55  ;;  %v777_v47 = vadd.f32 1.0, %v4533_v5 }
 0x151   :  { %v4537_v30 = vpop.eup %4536  ;;  %4556 = vrcp.f32 %v728_v17  ;;  %v778_v51 = vadd.f32 1.0, %v4535_v29  ;;  %v807_v29 = vrot.slane %v7599_v49, 6 }
 0x152   :  { %v4539_v8 = vpop.eup %4538  ;;  %4558 = vpow2.f32 %v4189_v28  ;;  %v779_v63 = vadd.f32 1.0, %v4537_v30  ;;  %v806_v28 = vrot.slane %v7599_v49, 5 }
 0x153   :  { %v4541_v20 = vpop.eup %4540  ;;  %4560 = vpow2.f32 %v4190_v3  ;;  %v780_v50 = vadd.f32 1.0, %v4539_v8 }
 0x154   :  { %v4543_v24 = vpop.eup %4542  ;;  %4562 = vpow2.f32 %v4191_v18  ;;  %v781_v10 = vadd.f32 1.0, %v4541_v20 }
 0x155   :  { %v4545_v27 = vpop.eup %4544  ;;  %v817_v44 = vmul.f32 0.0, %v4543_v24  ;;  %4564 = vrcp.f32 %v777_v47  ;;  %v808_v47 = vrot.slane %v7599_v49, 7 }
 0x156   :  { %v4547_v21 = vpop.eup %4546  ;;  %v818_v55 = vmul.f32 %v4545_v27, %v802_v19  ;;  %4566 = vrcp.f32 %v778_v51 }
 0x157   :  { %v4549_v5 = vpop.eup %4548  ;;  %v819_v17 = vmul.f32 %v4547_v21, %v803_v60  ;;  %v6141_v3 = vadd.f32 %v6094_v13, %v817_v44  ;;  %4568 = vrcp.f32 %v779_v63 }
 0x158   :  { %v4551_v18 = vpop.eup %4550  ;;  %v820_v30 = vmul.f32 %v4549_v5, %v804_v53  ;;  %v6145_v8 = vadd.f32 %v6099_v9, %v818_v55  ;;  %4570 = vrcp.f32 %v780_v50 }
 0x159   :  { %v4553_v19 = vpop.eup %4552  ;;  %4572 = vrcp.f32 %v781_v10  ;;  %v821_v51 = vmul.f32 %v4551_v18, %v805_v56  ;;  %v6149_v20 = vadd.f32 %v6102_v52, %v819_v17 }
 0x15a   :  { %v4555_v60 = vpop.eup %4554  ;;  %v822_v13 = vmul.f32 %v4553_v19, %v806_v28  ;;  %v6152_v63 = vadd.f32 %v6105_v26, %v820_v30  ;;  %4574 = vtanh.f32 %v6141_v3 }
 0x15b   :  { %v4557_v24 = vpop.eup %4556  ;;  %v823_v53 = vmul.f32 %v4555_v60, %v807_v29  ;;  %v6156_v9 = vadd.f32 %v6108_v6, %v821_v51  ;;  %4576 = vtanh.f32 %v6145_v8 }
 0x15c   :  { %v4559_v49 = vpop.eup %4558  ;;  %v824_v50 = vmul.f32 %v4557_v24, %v808_v47  ;;  %v6160_v27 = vadd.f32 %v6111_v12, %v822_v13  ;;  %4578 = vtanh.f32 %v6149_v20 }
 0x15d   :  { %v4561_v52 = vpop.eup %4560  ;;  %v782_v44 = vadd.f32 1.0, %v4559_v49  ;;  %v6164_v26 = vadd.f32 %v6118_v16, %v823_v53  ;;  %4580 = vtanh.f32 %v6152_v63 }
 0x15e   :  { %v4563_v10 = vpop.eup %4562  ;;  %v783_v56 = vadd.f32 1.0, %v4561_v52  ;;  %v6168_v6 = vadd.f32 %v6125_v23, %v824_v50  ;;  %4582 = vtanh.f32 %v6156_v9 }
 0x15f   :  { %7600 = vst [vmem:[#allocation44_spill] sm:$0xff] %v6164_v26  ;;  %v4565_v21 = vpop.eup %4564  ;;  %4584 = vrcp.f32 %v782_v44  ;;  %v784_v12 = vadd.f32 1.0, %v4563_v10 }
 0x160   :  { %7601 = vst [vmem:[#allocation45_spill] sm:$0xff] %v6168_v6  ;;  %v4567_v55 = vpop.eup %4566  ;;  %4586 = vrcp.f32 %v783_v56 }
 0x161   :  { %v4569_v28 = vpop.eup %4568  ;;  %4588 = vrcp.f32 %v784_v12 }
 0x162   :  { %v4571_v5 = vpop.eup %4570  ;;  %4590 = vtanh.f32 %v6160_v27 }
 0x163   :  { %v4573_v16 = vpop.eup %4572  ;;  %4592 = vtanh.f32 %v6164_v26 }
 0x164   :  { %v4575_v17 = vpop.eup %4574  ;;  %4594 = vtanh.f32 %v6168_v6 }
 0x165   :  { %v4577_v23 = vpop.eup %4576  ;;  %v849_v29 = vmul.f32 %v4575_v17, %v4565_v21 }
 0x166   :  { %v4579_v18 = vpop.eup %4578  ;;  %v850_v30 = vmul.f32 %v4577_v23, %v4567_v55 }
 0x167   :  { %v4581_v47 = vpop.eup %4580  ;;  %v851_v19 = vmul.f32 %v4579_v18, %v4569_v28  ;;  %v857_v13 = vpack.c.bf16 %v849_v29, %v849_v29 }
 0x168   :  { %v4583_v51 = vpop.eup %4582  ;;  %v852_v60 = vmul.f32 %v4581_v47, %v4571_v5  ;;  %v858_v24 = vpack.c.bf16 %v850_v30, %v850_v30 }
 0x169   :  { %v4585_v53 = vpop.eup %4584  ;;  %v853_v49 = vmul.f32 %v4583_v51, %v4573_v16  ;;  %v859_v50 = vpack.c.bf16 %v851_v19, %v851_v19  ;;  %v873_v21 = vunpack.c.l.b16 %v857_v13 }
 0x16a   :  { %v4587_v52 = vpop.eup %4586  ;;  %v860_v44 = vpack.c.bf16 %v852_v60, %v852_v60  ;;  %v874_v10 = vunpack.c.l.b16 %v858_v24 }
 0x16b   :  { %v4589_v56 = vpop.eup %4588  ;;  %v861_v12 = vpack.c.bf16 %v853_v49, %v853_v49  ;;  %v875_v26 = vunpack.c.l.b16 %v859_v50 }
 0x16c   :  { %v4591_v6 = vpop.eup %4590  ;;  %v876_v17 = vunpack.c.l.b16 %v860_v44  ;;  %v881_v55 = vrot.slane %v874_v10, 7 }
 0x16d   :  { %v4593_v28 = vpop.eup %4592  ;;  %v854_v23 = vmul.f32 %v4591_v6, %v4585_v53  ;;  %v877_v5 = vunpack.c.l.b16 %v861_v12  ;;  %v884_v29 = vrot.slane %v875_v26, 6 }
 0x16e   :  { %v4595_v18 = vpop.eup %4594  ;;  %v855_v16 = vmul.f32 %v4593_v28, %v4587_v52  ;;  %v883_v30 = vsel %vm882_vm1, %v881_v55, %v873_v21  ;;  %v887_v47 = vrot.slane %v876_v17, 5  ;;  %v6181_v28 = vld [vmem:[#allocation7] ss:$16 sps:$4 sm:$0xff]  }
 0x16f   :  { %v856_v19 = vmul.f32 %v4595_v18, %v4589_v56  ;;  %v862_v51 = vpack.c.bf16 %v854_v23, %v854_v23  ;;  %v886_v60 = vsel %vm885_vm2, %v884_v29, %v883_v30  ;;  %v890_v24 = vrot.slane %v877_v5, 4  ;;  %v6184_v23 = vld [vmem:[#allocation7 + $0x8] ss:$16 sps:$4 sm:$0xff]   ;;  %v6187_v5 = vld [vmem:[#allocation7 + $0x24] ss:$16 sps:$4 sm:$0xff]  }
 0x170   :  { %v863_v13 = vpack.c.bf16 %v855_v16, %v855_v16  ;;  %v889_v49 = vsel %vm888_vm3, %v887_v47, %v886_v60  ;;  %v6190_v29 = vld [vmem:[#allocation7 + $0x2c] ss:$16 sps:$4 sm:$0xff]   ;;  %v7602_v18 = vmov 0   ;;  %v6195_v16 = vld [vmem:[#allocation7 + $0x20] ss:$16 sps:$4 sm:$0xff]  }
 0x171   :  { %v864_v50 = vpack.c.bf16 %v856_v19, %v856_v19  ;;  %v878_v44 = vunpack.c.l.b16 %v862_v51  ;;  %v892_v6 = vsel %vm891_vm4, %v890_v24, %v889_v49  ;;  %7603 = vst [vmem:[#allocation46_spill] sm:$0xff] %v6195_v16  ;;  %v6198_v30 = vld [vmem:[#allocation7 + $0x28] ss:$16 sps:$4 sm:$0xff]   ;;  %v6201_v47 = vld [vmem:[#allocation7 + $0x44] ss:$16 sps:$4 sm:$0xff]  }
 0x172   :  { %v879_v26 = vunpack.c.l.b16 %v863_v13  ;;  %7604 = vst [vmem:[#allocation47_spill] sm:$0xff] %v6198_v30  ;;  %7605 = vst [vmem:[#allocation48_spill] sm:$0xff] %v6201_v47  ;;  %v6204_v19 = vld [vmem:[#allocation7 + $0x4c] ss:$16 sps:$4 sm:$0xff]   ;;  %v6207_v51 = vld [vmem:[#allocation7 + $0x40] ss:$16 sps:$4 sm:$0xff]  }
 0x173   :  { %v880_v53 = vunpack.c.l.b16 %v864_v50  ;;  %v893_v52 = vrot.slane %v878_v44, 3  ;;  %7606 = vst [vmem:[#allocation49_spill] sm:$0xff] %v6204_v19  ;;  %7607 = vst [vmem:[#allocation50_spill] sm:$0xff] %v6207_v51  ;;  %v6210_v60 = vld [vmem:[#allocation7 + $0x48] ss:$16 sps:$4 sm:$0xff]  }
 0x174   :  { %v896_v10 = vrot.slane %v879_v26, 2  ;;  %7608 = vst [vmem:[#allocation51_spill] sm:$0xff] %v6210_v60  ;;  %v6213_v24 = vld [vmem:[#allocation7 + $0x64] ss:$16 sps:$4 sm:$0xff]   ;;  %v6216_v13 = vld [vmem:[#allocation7 + $0x6c] ss:$16 sps:$4 sm:$0xff]  }
 0x175   :  { %v895_v56 = vsel %vm894_vm5, %v893_v52, %v892_v6  ;;  %v899_v12 = vrot.slane %v880_v53, 1  ;;  %7609 = vst [vmem:[#allocation52_spill] sm:$0xff] %v6213_v24  ;;  %7610 = vst [vmem:[#allocation53_spill] sm:$0xff] %v6216_v13  ;;  %v6219_v49 = vld [vmem:[#allocation7 + $0x60] ss:$16 sps:$4 sm:$0xff]  }
 0x176   :  { %v898_v21 = vsel %vm897_vm6, %v896_v10, %v895_v56  ;;  %7611 = vst [vmem:[#allocation54_spill] sm:$0xff] %v6219_v49  ;;  %v6222_v50 = vld [vmem:[#allocation7 + $0x68] ss:$16 sps:$4 sm:$0xff]   ;;  %v6225_v44 = vld [vmem:[#allocation7 + $0x84] ss:$16 sps:$4 sm:$0xff]  }
 0x177   :  { %v901_v17 = vsel %vm900_vm7, %v899_v12, %v898_v21  ;;  %7612 = vst [vmem:[#allocation55_spill] sm:$0xff] %v6222_v50  ;;  %7613 = vst [vmem:[#allocation56_spill] sm:$0xff] %v6225_v44  ;;  %v6228_v6 = vld [vmem:[#allocation7 + $0x8c] ss:$16 sps:$4 sm:$0xff]   ;;  %v6231_v26 = vld [vmem:[#allocation7 + $0x80] ss:$16 sps:$4 sm:$0xff]  }
 0x178   :  { %v902_v55 = vpack.c.b16 %v901_v17, %v901_v17  ;;  %7614 = vst [vmem:[#allocation57_spill] sm:$0xff] %v6228_v6  ;;  %7615 = vst [vmem:[#allocation58_spill] sm:$0xff] %v6231_v26  ;;  %v6234_v53 = vld [vmem:[#allocation7 + $0x88] ss:$16 sps:$4 sm:$0xff]   ;;  %v6237_v52 = vld [vmem:[#allocation7 + $0xa4] ss:$16 sps:$4 sm:$0xff]  }
 0x179   :  { %7616 = vst [vmem:[#allocation59_spill] sm:$0xff] %v6234_v53  ;;  %7617 = vst [vmem:[#allocation60_spill] sm:$0xff] %v6237_v52  ;;  %v6240_v10 = vld [vmem:[#allocation7 + $0xac] ss:$16 sps:$4 sm:$0xff]   ;;  %v6243_v56 = vld [vmem:[#allocation7 + $0xa0] ss:$16 sps:$4 sm:$0xff]  }
 0x17a   :  { %937 = vmatmul.mubr.bf16.vlgmr.msra.gmra.mrb[20].mxu0 %v902_v55  ;;  %978 = vmatmul.mubr.bf16.vlgmr.msra.gmra.mrb[20].mxu1 %v902_v55  ;;  %7618 = vst [vmem:[#allocation61_spill] sm:$0xff] %v6240_v10  ;;  %7619 = vst [vmem:[#allocation62_spill] sm:$0xff] %v6243_v56  ;;  %v6246_v12 = vld [vmem:[#allocation7 + $0xa8] ss:$16 sps:$4 sm:$0xff]   ;;  %v7622_v17 = vld [vmem:[#allocation14_spill] sm:$0xff] }
 0x17b   :  { %1339 = vmatpush1.bf16.msra.mxu0 %v6181_v28  ;;  %1380 = vmatpush1.bf16.msra.mxu1 %v6184_v23  ;;  %7620 = vst [vmem:[#allocation63_spill] sm:$0xff] %v6246_v12  ;;  %v7621_v21 = vld [vmem:[#allocation13_spill] sm:$0xff]  ;;  %v7623_v55 = vld [vmem:[#allocation15_spill] sm:$0xff] }
 0x17c   :  { %1340 = vmatprep.subr.bf16.mxu0 %v6187_v5  ;;  %1381 = vmatprep.subr.bf16.mxu1 %v6190_v29 }
 0x17d   :  { %1370 = vmatprep.mubr.bf16.mxu0 %v7602_v18  ;;  %1411 = vmatprep.mubr.bf16.mxu1 %v7602_v18 }
 0x17f   :  { %1341 = vmatpush1.bf16.msra.mxu0 %v6195_v16  ;;  %1382 = vmatpush1.bf16.msra.mxu1 %v6198_v30 }
 0x180   :  { %1342 = vmatprep.subr.bf16.mxu0 %v6201_v47  ;;  %1383 = vmatprep.subr.bf16.mxu1 %v6204_v19 }
 0x183   :  { %1343 = vmatpush1.bf16.msra.mxu0 %v6207_v51  ;;  %1384 = vmatpush1.bf16.msra.mxu1 %v6210_v60 }
 0x184   :  { %1344 = vmatprep.subr.bf16.mxu0 %v6213_v24  ;;  %1385 = vmatprep.subr.bf16.mxu1 %v6216_v13 }
 0x187   :  { %1345 = vmatpush1.bf16.msra.mxu0 %v6219_v49  ;;  %1386 = vmatpush1.bf16.msra.mxu1 %v6222_v50  ;;  %v7627_v50 = vld [vmem:[#allocation17_spill] sm:$0xff] }
 0x188   :  { %1346 = vmatprep.subr.bf16.mxu0 %v6225_v44  ;;  %1387 = vmatprep.subr.bf16.mxu1 %v6228_v6 }
 0x18b   :  { %1347 = vmatpush1.bf16.msra.mxu0 %v6231_v26  ;;  %1388 = vmatpush1.bf16.msra.mxu1 %v6234_v53 }
 0x18c   :  { %1348 = vmatprep.subr.bf16.mxu0 %v6237_v52  ;;  %1389 = vmatprep.subr.bf16.mxu1 %v6240_v10  ;;  %v7624_v10 = vld [vmem:[#allocation16_spill] sm:$0xff] }
 0x18f   :  { %1349 = vmatpush1.bf16.msra.mxu0 %v6243_v56  ;;  %1390 = vmatpush1.bf16.msra.mxu1 %v6246_v12  ;;  %v6257_v56 = vld [vmem:[#allocation7 + $0x4] ss:$16 sps:$4 sm:$0xff]   ;;  %v6260_v12 = vld [vmem:[#allocation7 + $0xc] ss:$16 sps:$4 sm:$0xff]  }
 0x190   :  { %1350 = vmatprep.subr.bf16.mxu0 %v5827_v41  ;;  %1391 = vmatprep.subr.bf16.mxu1 %v5830_v42  ;;  %7625 = vst [vmem:[#allocation13_spill] sm:$0xff] %v6257_v56  ;;  %7626 = vst [vmem:[#allocation14_spill] sm:$0xff] %v6260_v12 }
 0x193   :  { %1351 = vmatpush1.bf16.msra.mxu0 %v5832_v43  ;;  %1392 = vmatpush1.bf16.msra.mxu1 %v5834_v45 }
 0x194   :  { %1352 = vmatprep.subr.bf16.mxu0 %v7621_v21  ;;  %1393 = vmatprep.subr.bf16.mxu1 %v7622_v17 }
 0x197   :  { %1353 = vmatpush1.bf16.msra.mxu0 %v7623_v55  ;;  %1394 = vmatpush1.bf16.msra.mxu1 %v7624_v10 }
 0x198   :  { %1772 = vmatprep.subr.bf16.mxu0 %v6257_v56  ;;  %1813 = vmatprep.subr.bf16.mxu1 %v6260_v12 }
 0x24d   :  { %v938_v41 = vpop.f32.mrb[20].mxu0  ;;  %v6263_v42 = vpop.f32.mrb[20].mxu1 }
 0x24e   :  { %v990_v43 = vrot.slane %v938_v41, 7  ;;  %v994_v45 = vrot.slane %v938_v41, 1  ;;  %v998_v21 = vrot.slane %v938_v41, 2  ;;  %v1002_v52 = vrot.slane %v938_v41, 3  ;;  %v6265_v17 = vpop.f32.mrb[21].mxu0  ;;  %v6267_v55 = vpop.f32.mrb[21].mxu1 }
 0x24f   :  { %v1006_v10 = vrot.slane %v938_v41, 4  ;;  %v1010_v53 = vrot.slane %v938_v41, 5  ;;  %v1014_v26 = vrot.slane %v938_v41, 6  ;;  %v1054_v56 = vadd.f32 %v938_v41, %v5945_v32  ;;  %v942_v6 = vpop.f32.mrb[22].mxu0  ;;  %v983_v44 = vpop.f32.mrb[22].mxu1 }
 0x250   :  { %v1050_v12 = vadd.f32 %v990_v43, %v7627_v50  ;;  %v1058_v49 = vadd.f32 %v994_v45, %v5947_v33  ;;  %v1062_v13 = vadd.f32 %v998_v21, %v5949_v34  ;;  %v1066_v24 = vadd.f32 %v1002_v52, %v5951_v35  ;;  %v943_v60 = vpop.f32.mrb[23].mxu0  ;;  %v984_v51 = vpop.f32.mrb[23].mxu1 }
 0x251   :  { %v1070_v19 = vadd.f32 %v1006_v10, %v5953_v36  ;;  %v1074_v47 = vadd.f32 %v1010_v53, %v5955_v37  ;;  %v4193_v30 = vmul.f32 -1.442695, %v1054_v56  ;;  %v1078_v16 = vadd.f32 %v1014_v26, %v5957_v38 }
 0x252   :  { %v4192_v41 = vmul.f32 -1.442695, %v1050_v12  ;;  %v4194_v6 = vmul.f32 -1.442695, %v1058_v49  ;;  %v4195_v44 = vmul.f32 -1.442695, %v1062_v13 }
 0x253   :  { %4596 = vpow2.f32 %v4193_v30  ;;  %v4196_v43 = vmul.f32 -1.442695, %v1066_v24  ;;  %v4197_v45 = vmul.f32 -1.442695, %v1070_v19  ;;  %v992_v21 = vrot.slane %v6263_v42, 7 }
 0x254   :  { %4598 = vpow2.f32 %v4192_v41  ;;  %v4198_v52 = vmul.f32 -1.442695, %v1074_v47  ;;  %v996_v51 = vrot.slane %v6263_v42, 1  ;;  %v4199_v60 = vmul.f32 -1.442695, %v1078_v16 }
 0x255   :  { %4600 = vpow2.f32 %v4194_v6  ;;  %v1000_v53 = vrot.slane %v6263_v42, 2  ;;  %v1004_v26 = vrot.slane %v6263_v42, 3  ;;  %v1052_v49 = vadd.f32 %v992_v21, %v5975_v40 }
 0x256   :  { %4602 = vpow2.f32 %v4195_v44  ;;  %v1056_v30 = vadd.f32 %v6263_v42, %v5986_v59  ;;  %v1060_v19 = vadd.f32 %v996_v51, %v5991_v48  ;;  %v1008_v16 = vrot.slane %v6263_v42, 4 }
 0x257   :  { %4604 = vpow2.f32 %v4196_v43  ;;  %v1064_v47 = vadd.f32 %v1000_v53, %v6007_v46  ;;  %v1068_v24 = vadd.f32 %v1004_v26, %v5996_v1  ;;  %v1012_v56 = vrot.slane %v6263_v42, 5 }
 0x258   :  { %4606 = vpow2.f32 %v4197_v45  ;;  %v991_v44 = vrot.slane %v6265_v17, 7  ;;  %v1016_v21 = vrot.slane %v6263_v42, 6  ;;  %v995_v26 = vrot.slane %v6265_v17, 1 }
 0x259   :  { %4608 = vpow2.f32 %v4198_v52  ;;  %v1072_v52 = vadd.f32 %v1008_v16, %v6043_v62  ;;  %v1076_v53 = vadd.f32 %v1012_v56, %v6052_v4  ;;  %v1007_v42 = vrot.slane %v6265_v17, 4 }
 0x25a   :  { %4610 = vpow2.f32 %v4199_v60  ;;  %v1051_v16 = vadd.f32 %v991_v44, %v5981_v0  ;;  %v1011_v56 = vrot.slane %v6265_v17, 5 }
 0x25b   :  { %4612 = vtanh.f32 %v1052_v49 }
 0x25c   :  { %4614 = vtanh.f32 %v1056_v30  ;;  %v4200_v0 = vmul.f32 -1.442695, %v1051_v16 }
 0x25d   :  { %v4597_v13 = vpop.eup %4596  ;;  %4616 = vtanh.f32 %v1060_v19  ;;  %v999_v19 = vrot.slane %v6265_v17, 2 }
 0x25e   :  { %v4599_v12 = vpop.eup %4598  ;;  %v1107_v10 = vadd.f32 1.0, %v4597_v13  ;;  %4618 = vtanh.f32 %v1064_v47  ;;  %v1003_v47 = vrot.slane %v6265_v17, 3 }
 0x25f   :  { %v4601_v41 = vpop.eup %4600  ;;  %v1106_v6 = vadd.f32 1.0, %v4599_v12  ;;  %4620 = vtanh.f32 %v1068_v24  ;;  %v1063_v44 = vadd.f32 %v999_v19, %v6030_v57  ;;  %v997_v19 = vrot.slane %v6267_v55, 1 }
 0x260   :  { %v4603_v43 = vpop.eup %4602  ;;  %v1108_v45 = vadd.f32 1.0, %v4601_v41  ;;  %4622 = vrcp.f32 %v1107_v10  ;;  %v1055_v41 = vadd.f32 %v6265_v17, %v6012_v7  ;;  %v993_v7 = vrot.slane %v6267_v55, 7 }
 0x261   :  { %v4605_v51 = vpop.eup %4604  ;;  %v1109_v60 = vadd.f32 1.0, %v4603_v43  ;;  %4624 = vrcp.f32 %v1106_v6 }
 0x262   :  { %v4607_v49 = vpop.eup %4606  ;;  %v1110_v30 = vadd.f32 1.0, %v4605_v51  ;;  %4626 = vrcp.f32 %v1108_v45  ;;  %v1015_v45 = vrot.slane %v6265_v17, 6  ;;  %v1059_v51 = vadd.f32 %v995_v26, %v6021_v54  ;;  %v7628_v17 = vld [vmem:[#allocation41_spill] sm:$0xff] }
 0x263   :  { %v4609_v24 = vpop.eup %4608  ;;  %v1111_v13 = vadd.f32 1.0, %v4607_v49  ;;  %4628 = vrcp.f32 %v1109_v60  ;;  %v1080_v49 = vadd.f32 %v1016_v21, %v6065_v15  ;;  %v4201_v26 = vmul.f32 -1.442695, %v1055_v41 }
 0x264   :  { %v4611_v12 = vpop.eup %4610  ;;  %v1112_v10 = vadd.f32 1.0, %v4609_v24  ;;  %4630 = vrcp.f32 %v1110_v30  ;;  %v1067_v30 = vadd.f32 %v1003_v47, %v6039_v61  ;;  %v4202_v15 = vmul.f32 -1.442695, %v1059_v51 }
 0x265   :  { %v4613_v6 = vpop.eup %4612  ;;  %v1113_v43 = vadd.f32 1.0, %v4611_v12  ;;  %4632 = vrcp.f32 %v1111_v13  ;;  %v1071_v13 = vadd.f32 %v1007_v42, %v6057_v11  ;;  %v1075_v12 = vadd.f32 %v1011_v56, %v7628_v17  ;;  %v7630_v56 = vld [vmem:[#allocation30_spill] sm:$0xff] }
 0x266   :  { %v4615_v60 = vpop.eup %4614  ;;  %4634 = vrcp.f32 %v1112_v10  ;;  %v7629_v10 = vld [vmem:[#allocation43_spill] sm:$0xff]  ;;  %v4204_v16 = vmul.f32 -1.442695, %v1067_v30  ;;  %v1001_v61 = vrot.slane %v6267_v55, 2  ;;  %v1005_v42 = vrot.slane %v6267_v55, 3 }
 0x267   :  { %v4617_v24 = vpop.eup %4616  ;;  %4636 = vrcp.f32 %v1113_v43  ;;  %v1079_v21 = vadd.f32 %v1015_v45, %v7629_v10  ;;  %v4203_v43 = vmul.f32 -1.442695, %v1063_v44  ;;  %v1053_v41 = vadd.f32 %v993_v7, %v7630_v56 }
 0x268   :  { %v4619_v4 = vpop.eup %4618  ;;  %4638 = vtanh.f32 %v1072_v52  ;;  %v4205_v45 = vmul.f32 -1.442695, %v1071_v13  ;;  %v1057_v51 = vadd.f32 %v6267_v55, %v6016_v31  ;;  %v4206_v30 = vmul.f32 -1.442695, %v1075_v12 }
 0x269   :  { %v4621_v54 = vpop.eup %4620  ;;  %4640 = vtanh.f32 %v1076_v53  ;;  %v4207_v7 = vmul.f32 -1.442695, %v1079_v21  ;;  %v1069_v13 = vadd.f32 %v1005_v42, %v6048_v22  ;;  %v4208_v31 = vmul.f32 -1.442695, %v1053_v41 }
 0x26a   :  { %v4623_v47 = vpop.eup %4622  ;;  %4642 = vtanh.f32 %v1080_v49 }
 0x26b   :  { %v4625_v57 = vpop.eup %4624  ;;  %v6312_v52 = vmul.f32 %v4623_v47, %v4615_v60  ;;  %4644 = vpow2.f32 %v4200_v0  ;;  %v1061_v60 = vadd.f32 %v997_v19, %v6025_v2  ;;  %v4212_v21 = vmul.f32 -1.442695, %v1069_v13 }
 0x26c   :  { %v4627_v53 = vpop.eup %4626  ;;  %v6316_v17 = vmul.f32 %v4625_v57, %v4613_v6  ;;  %4646 = vpow2.f32 %v4201_v26  ;;  %v1065_v57 = vadd.f32 %v1001_v61, %v6034_v58 }
 0x26d   :  { %v4629_v49 = vpop.eup %4628  ;;  %v6320_v44 = vmul.f32 %v4627_v53, %v4617_v24  ;;  %4648 = vpow2.f32 %v4202_v15  ;;  %v4209_v15 = vmul.f32 -1.442695, %v1057_v51  ;;  %v4210_v19 = vmul.f32 -1.442695, %v1061_v60 }
 0x26e   :  { %v4631_v0 = vpop.eup %4630  ;;  %v6323_v47 = vmul.f32 %v4629_v49, %v4619_v4  ;;  %4650 = vpow2.f32 %v4203_v43  ;;  %v4211_v4 = vmul.f32 -1.442695, %v1065_v57  ;;  %v1017_v60 = vrot.slane %v6267_v55, 6 }
 0x26f   :  { %v4633_v6 = vpop.eup %4632  ;;  %v6326_v26 = vmul.f32 %v4631_v0, %v4621_v54  ;;  %4652 = vpow2.f32 %v4204_v16  ;;  %v1009_v16 = vrot.slane %v6267_v55, 4 }
 0x270   :  { %v4635_v24 = vpop.eup %4634  ;;  %4654 = vpow2.f32 %v4205_v45  ;;  %v1013_v45 = vrot.slane %v6267_v55, 5 }
 0x271   :  { %v4637_v12 = vpop.eup %4636  ;;  %4656 = vpow2.f32 %v4206_v30 }
 0x272   :  { %v4639_v53 = vpop.eup %4638  ;;  %4658 = vpow2.f32 %v4207_v7 }
 0x273   :  { %v4641_v43 = vpop.eup %4640  ;;  %4660 = vpow2.f32 %v4208_v31  ;;  %v6329_v61 = vmul.f32 %v4639_v53, %v4633_v6  ;;  %v1073_v6 = vadd.f32 %v1009_v16, %v6115_v39  ;;  %v1081_v53 = vadd.f32 %v1017_v60, %v6129_v14 }
 0x274   :  { %v4643_v54 = vpop.eup %4642  ;;  %4662 = vpow2.f32 %v4209_v15  ;;  %v6332_v42 = vmul.f32 %v4641_v43, %v4635_v24  ;;  %v1077_v15 = vadd.f32 %v1013_v45, %v6122_v25 }
 0x275   :  { %v4645_v41 = vpop.eup %4644  ;;  %4664 = vpow2.f32 %v4210_v19  ;;  %v6335_v51 = vmul.f32 %v4643_v54, %v4637_v12  ;;  %v4213_v54 = vmul.f32 -1.442695, %v1073_v6  ;;  %v1243_v6 = vrot.slane %v6145_v8, 7 }
 0x276   :  { %v4647_v49 = vpop.eup %4646  ;;  %v1154_v30 = vadd.f32 1.0, %v4645_v41  ;;  %4666 = vpow2.f32 %v4211_v4  ;;  %v4214_v16 = vmul.f32 -1.442695, %v1077_v15 }
 0x277   :  { %v4649_v31 = vpop.eup %4648  ;;  %v1155_v0 = vadd.f32 1.0, %v4647_v49  ;;  %4668 = vpow2.f32 %v4212_v21 }
 0x278   :  { %v4651_v7 = vpop.eup %4650  ;;  %v1156_v57 = vadd.f32 1.0, %v4649_v31  ;;  %4670 = vrcp.f32 %v1154_v30  ;;  %v4215_v31 = vmul.f32 -1.442695, %v1081_v53 }
 0x279   :  { %v4653_v13 = vpop.eup %4652  ;;  %v1157_v24 = vadd.f32 1.0, %v4651_v7  ;;  %4672 = vrcp.f32 %v1155_v0 }
 0x27a   :  { %v4655_v12 = vpop.eup %4654  ;;  %v1158_v19 = vadd.f32 1.0, %v4653_v13  ;;  %4674 = vrcp.f32 %v1156_v57  ;;  %v1242_v13 = vrot.slane %v6141_v3, 7  ;;  %v1246_v3 = vrot.slane %v6156_v9, 7 }
 0x27b   :  { %v4657_v55 = vpop.eup %4656  ;;  %v1159_v4 = vadd.f32 1.0, %v4655_v12  ;;  %4676 = vrcp.f32 %v1157_v24 }
 0x27c   :  { %v4659_v43 = vpop.eup %4658  ;;  %v1160_v21 = vadd.f32 1.0, %v4657_v55  ;;  %4678 = vrcp.f32 %v1158_v19  ;;  %v1244_v55 = vrot.slane %v6149_v20, 7 }
 0x27d   :  { %v4661_v41 = vpop.eup %4660  ;;  %v1161_v49 = vadd.f32 1.0, %v4659_v43  ;;  %4680 = vrcp.f32 %v1159_v4 }
 0x27e   :  { %v4663_v30 = vpop.eup %4662  ;;  %4682 = vrcp.f32 %v1160_v21  ;;  %v1210_v0 = vadd.f32 1.0, %v4661_v41  ;;  %v1245_v21 = vrot.slane %v6152_v63, 7  ;;  %v7631_v63 = vld [vmem:[#allocation44_spill] sm:$0xff] }
 0x27f   :  { %v4665_v45 = vpop.eup %4664  ;;  %4684 = vrcp.f32 %v1161_v49  ;;  %v1211_v60 = vadd.f32 1.0, %v4663_v30  ;;  %v1247_v30 = vrot.slane %v6160_v27, 7 }
 0x280   :  { %v4667_v7 = vpop.eup %4666  ;;  %4686 = vpow2.f32 %v4213_v54  ;;  %v1212_v24 = vadd.f32 1.0, %v4665_v45 }
 0x281   :  { %v4669_v57 = vpop.eup %4668  ;;  %4688 = vpow2.f32 %v4214_v16  ;;  %v1213_v19 = vadd.f32 1.0, %v4667_v7 }
 0x282   :  { %v4671_v12 = vpop.eup %4670  ;;  %4690 = vpow2.f32 %v4215_v31  ;;  %v1214_v4 = vadd.f32 1.0, %v4669_v57 }
 0x283   :  { %v4673_v15 = vpop.eup %4672  ;;  %v1258_v53 = vmul.f32 %v4671_v12, %v1242_v13  ;;  %4692 = vrcp.f32 %v1210_v0  ;;  %v1248_v0 = vrot.slane %v7631_v63, 7 }
 0x284   :  { %v4675_v43 = vpop.eup %4674  ;;  %v1259_v54 = vmul.f32 %v4673_v15, %v1243_v6  ;;  %4694 = vrcp.f32 %v1211_v60 }
 0x285   :  { %v4677_v41 = vpop.eup %4676  ;;  %v1260_v49 = vmul.f32 %v4675_v43, %v1244_v55  ;;  %v6347_v16 = vadd.f32 %v6316_v17, %v1258_v53  ;;  %4696 = vrcp.f32 %v1212_v24  ;;  %v7632_v17 = vld [vmem:[#allocation45_spill] sm:$0xff] }
 0x286   :  { %v4679_v8 = vpop.eup %4678  ;;  %v1261_v20 = vmul.f32 %v4677_v41, %v1245_v21  ;;  %v6351_v31 = vadd.f32 %v6312_v52, %v1259_v54  ;;  %4698 = vrcp.f32 %v1213_v19  ;;  %v1249_v57 = vrot.slane %v7632_v17, 7 }
 0x287   :  { %v4681_v45 = vpop.eup %4680  ;;  %4700 = vrcp.f32 %v1214_v4  ;;  %v1262_v7 = vmul.f32 %v4679_v8, %v1246_v3  ;;  %v6355_v9 = vadd.f32 %v6320_v44, %v1260_v49 }
 0x288   :  { %v4683_v60 = vpop.eup %4682  ;;  %v1263_v13 = vmul.f32 %v4681_v45, %v1247_v30  ;;  %v6359_v24 = vadd.f32 %v6323_v47, %v1261_v20  ;;  %4702 = vtanh.f32 %v6347_v16 }
 0x289   :  { %v4685_v27 = vpop.eup %4684  ;;  %v1264_v52 = vmul.f32 %v4683_v60, %v1248_v0  ;;  %v6363_v12 = vadd.f32 %v6326_v26, %v1262_v7  ;;  %4704 = vtanh.f32 %v6351_v31 }
 0x28a   :  { %v4687_v6 = vpop.eup %4686  ;;  %v1265_v19 = vmul.f32 %v4685_v27, %v1249_v57  ;;  %v6367_v44 = vadd.f32 %v6329_v61, %v1263_v13  ;;  %4706 = vtanh.f32 %v6355_v9 }
 0x28b   :  { %v4689_v15 = vpop.eup %4688  ;;  %v1215_v55 = vadd.f32 1.0, %v4687_v6  ;;  %v6371_v47 = vadd.f32 %v6332_v42, %v1264_v52  ;;  %4708 = vtanh.f32 %v6359_v24 }
 0x28c   :  { %v4691_v53 = vpop.eup %4690  ;;  %v1216_v4 = vadd.f32 1.0, %v4689_v15  ;;  %v6375_v26 = vadd.f32 %v6335_v51, %v1265_v19  ;;  %4710 = vtanh.f32 %v6363_v12 }
 0x28d   :  { %v4693_v43 = vpop.eup %4692  ;;  %4712 = vrcp.f32 %v1215_v55  ;;  %v1217_v61 = vadd.f32 1.0, %v4691_v53 }
 0x28e   :  { %v4695_v21 = vpop.eup %4694  ;;  %4714 = vrcp.f32 %v1216_v4 }
 0x28f   :  { %v4697_v54 = vpop.eup %4696  ;;  %4716 = vrcp.f32 %v1217_v61 }
 0x290   :  { %v4699_v41 = vpop.eup %4698  ;;  %4718 = vtanh.f32 %v6367_v44 }
 0x291   :  { %v4701_v42 = vpop.eup %4700  ;;  %4720 = vtanh.f32 %v6371_v47 }
 0x292   :  { %v4703_v3 = vpop.eup %4702  ;;  %4722 = vtanh.f32 %v6375_v26 }
 0x293   :  { %v4705_v51 = vpop.eup %4704  ;;  %v1290_v49 = vmul.f32 %v4703_v3, %v4693_v43 }
 0x294   :  { %v4707_v8 = vpop.eup %4706  ;;  %v1291_v30 = vmul.f32 %v4705_v51, %v4695_v21 }
 0x295   :  { %v4709_v20 = vpop.eup %4708  ;;  %v1292_v45 = vmul.f32 %v4707_v8, %v4697_v54  ;;  %v1298_v63 = vpack.c.bf16 %v1290_v49, %v1290_v49 }
 0x296   :  { %v4711_v0 = vpop.eup %4710  ;;  %v1293_v7 = vmul.f32 %v4709_v20, %v4699_v41  ;;  %v1299_v60 = vpack.c.bf16 %v1291_v30, %v1291_v30 }
 0x297   :  { %v4713_v17 = vpop.eup %4712  ;;  %v1294_v57 = vmul.f32 %v4711_v0, %v4701_v42  ;;  %v1300_v13 = vpack.c.bf16 %v1292_v45, %v1292_v45  ;;  %v1314_v27 = vunpack.c.l.b16 %v1298_v63 }
 0x298   :  { %v4715_v52 = vpop.eup %4714  ;;  %v1301_v6 = vpack.c.bf16 %v1293_v7, %v1293_v7  ;;  %v1315_v55 = vunpack.c.l.b16 %v1299_v60 }
 0x299   :  { %v4717_v19 = vpop.eup %4716  ;;  %v1302_v15 = vpack.c.bf16 %v1294_v57, %v1294_v57  ;;  %v1316_v53 = vunpack.c.l.b16 %v1300_v13  ;;  %v1322_v4 = vrot.slane %v1314_v27, 1 }
 0x29a   :  { %v4719_v43 = vpop.eup %4718  ;;  %v1317_v61 = vunpack.c.l.b16 %v1301_v6 }
 0x29b   :  { %v4721_v21 = vpop.eup %4720  ;;  %v1295_v3 = vmul.f32 %v4719_v43, %v4713_v17  ;;  %v1318_v54 = vunpack.c.l.b16 %v1302_v15  ;;  %v1323_v51 = vsel %vm882_vm1, %v1315_v55, %v1322_v4  ;;  %v1324_v41 = vrot.slane %v1316_v53, 7  ;;  %v7633_v43 = vld [vmem:[#allocation46_spill] sm:$0xff] }
 0x29c   :  { %v4723_v49 = vpop.eup %4722  ;;  %v1296_v8 = vmul.f32 %v4721_v21, %v4715_v52  ;;  %v1326_v42 = vrot.slane %v1317_v61, 6  ;;  %v7634_v61 = vld [vmem:[#allocation47_spill] sm:$0xff]  ;;  %v7635_v21 = vld [vmem:[#allocation48_spill] sm:$0xff] }
 0x29d   :  { %v1297_v30 = vmul.f32 %v4723_v49, %v4717_v19  ;;  %v1303_v20 = vpack.c.bf16 %v1295_v3, %v1295_v3  ;;  %v1325_v45 = vsel %vm885_vm2, %v1324_v41, %v1323_v51  ;;  %v1328_v63 = vrot.slane %v1318_v54, 5  ;;  %v7636_v3 = vld [vmem:[#allocation49_spill] sm:$0xff]  ;;  %v7637_v54 = vld [vmem:[#allocation50_spill] sm:$0xff]  ;;  %v7642_v51 = vld [vmem:[#allocation55_spill] sm:$0xff] }
 0x29e   :  { %v1304_v0 = vpack.c.bf16 %v1296_v8, %v1296_v8  ;;  %v1327_v7 = vsel %vm888_vm3, %v1326_v42, %v1325_v45  ;;  %v7643_v41 = vld [vmem:[#allocation56_spill] sm:$0xff]  ;;  %v7644_v49 = vld [vmem:[#allocation57_spill] sm:$0xff]  ;;  %v7645_v8 = vld [vmem:[#allocation58_spill] sm:$0xff] }
 0x29f   :  { %v1305_v60 = vpack.c.bf16 %v1297_v30, %v1297_v30  ;;  %v1319_v57 = vunpack.c.l.b16 %v1303_v20  ;;  %v1329_v13 = vsel %vm891_vm4, %v1328_v63, %v1327_v7  ;;  %v7646_v42 = vld [vmem:[#allocation59_spill] sm:$0xff]  ;;  %v7647_v30 = vld [vmem:[#allocation60_spill] sm:$0xff]  ;;  %v7648_v20 = vld [vmem:[#allocation61_spill] sm:$0xff] }
 0x2a0   :  { %v1320_v17 = vunpack.c.l.b16 %v1304_v0  ;;  %v7649_v45 = vld [vmem:[#allocation62_spill] sm:$0xff]  ;;  %v7650_v63 = vld [vmem:[#allocation63_spill] sm:$0xff] }
 0x2a1   :  { %v1321_v27 = vunpack.c.l.b16 %v1305_v60  ;;  %v1330_v6 = vrot.slane %v1319_v57, 4  ;;  %v6412_v0 = vld [vmem:[#allocation7 + $0xc4] ss:$16 sps:$4 sm:$0xff]   ;;  %v6415_v7 = vld [vmem:[#allocation7 + $0xcc] ss:$16 sps:$4 sm:$0xff]  }
 0x2a2   :  { %v1332_v15 = vrot.slane %v1320_v17, 3  ;;  %v6418_v60 = vld [vmem:[#allocation7 + $0xc0] ss:$16 sps:$4 sm:$0xff]   ;;  %v6421_v57 = vld [vmem:[#allocation7 + $0xc8] ss:$16 sps:$4 sm:$0xff]  }
 0x2a3   :  { %v1331_v55 = vsel %vm894_vm5, %v1330_v6, %v1329_v13  ;;  %v1334_v52 = vrot.slane %v1321_v27, 2  ;;  %v6424_v13 = vld [vmem:[#allocation7 + $0xe4] ss:$16 sps:$4 sm:$0xff]   ;;  %v6427_v17 = vld [vmem:[#allocation7 + $0xec] ss:$16 sps:$4 sm:$0xff]  }
 0x2a4   :  { %v1333_v19 = vsel %vm897_vm6, %v1332_v15, %v1331_v55  ;;  %v6430_v27 = vld [vmem:[#allocation7 + $0xe0] ss:$16 sps:$4 sm:$0xff]   ;;  %v6433_v6 = vld [vmem:[#allocation7 + $0xe8] ss:$16 sps:$4 sm:$0xff]  }
 0x2a5   :  { %v1335_v53 = vsel %vm900_vm7, %v1334_v52, %v1333_v19  ;;  %v7651_v15 = vld [vmem:[#allocation13_spill] sm:$0xff]  ;;  %v7652_v55 = vld [vmem:[#allocation14_spill] sm:$0xff] }
 0x2a6   :  { %v1336_v4 = vpack.c.b16 %v1335_v53, %v1335_v53 }
 0x2a8   :  { %1371 = vmatmul.mubr.bf16.vlgmr.msra.gmra.mrb[24].mxu0 %v1336_v4  ;;  %1412 = vmatmul.mubr.bf16.vlgmr.msra.gmra.mrb[24].mxu1 %v1336_v4 }
 0x2a9   :  { %1773 = vmatpush1.bf16.msra.mxu0 %v6181_v28  ;;  %1814 = vmatpush1.bf16.msra.mxu1 %v6184_v23  ;;  %v7638_v28 = vld [vmem:[#allocation51_spill] sm:$0xff]  ;;  %v7639_v23 = vld [vmem:[#allocation52_spill] sm:$0xff] }
 0x2aa   :  { %1774 = vmatprep.subr.bf16.mxu0 %v6187_v5  ;;  %1815 = vmatprep.subr.bf16.mxu1 %v6190_v29  ;;  %v7640_v5 = vld [vmem:[#allocation53_spill] sm:$0xff]  ;;  %v7641_v29 = vld [vmem:[#allocation54_spill] sm:$0xff] }
 0x2ab   :  { %1804 = vmatprep.mubr.bf16.mxu0 %v7602_v18  ;;  %1845 = vmatprep.mubr.bf16.mxu1 %v7602_v18 }
 0x2ad   :  { %1775 = vmatpush1.bf16.msra.mxu0 %v7633_v43  ;;  %1816 = vmatpush1.bf16.msra.mxu1 %v7634_v61 }
 0x2ae   :  { %1776 = vmatprep.subr.bf16.mxu0 %v7635_v21  ;;  %1817 = vmatprep.subr.bf16.mxu1 %v7636_v3 }
 0x2b1   :  { %1777 = vmatpush1.bf16.msra.mxu0 %v7637_v54  ;;  %1818 = vmatpush1.bf16.msra.mxu1 %v7638_v28 }
 0x2b2   :  { %1778 = vmatprep.subr.bf16.mxu0 %v7639_v23  ;;  %1819 = vmatprep.subr.bf16.mxu1 %v7640_v5 }
 0x2b5   :  { %1779 = vmatpush1.bf16.msra.mxu0 %v7641_v29  ;;  %1820 = vmatpush1.bf16.msra.mxu1 %v7642_v51 }
 0x2b6   :  { %1780 = vmatprep.subr.bf16.mxu0 %v7643_v41  ;;  %1821 = vmatprep.subr.bf16.mxu1 %v7644_v49 }
 0x2b9   :  { %1781 = vmatpush1.bf16.msra.mxu0 %v7645_v8  ;;  %1822 = vmatpush1.bf16.msra.mxu1 %v7646_v42 }
 0x2ba   :  { %1782 = vmatprep.subr.bf16.mxu0 %v7647_v30  ;;  %1823 = vmatprep.subr.bf16.mxu1 %v7648_v20 }
 0x2bd   :  { %1783 = vmatpush1.bf16.msra.mxu0 %v7649_v45  ;;  %1824 = vmatpush1.bf16.msra.mxu1 %v7650_v63 }
 0x2be   :  { %1784 = vmatprep.subr.bf16.mxu0 %v6412_v0  ;;  %1825 = vmatprep.subr.bf16.mxu1 %v6415_v7 }
 0x2c1   :  { %1785 = vmatpush1.bf16.msra.mxu0 %v6418_v60  ;;  %1826 = vmatpush1.bf16.msra.mxu1 %v6421_v57 }
 0x2c2   :  { %1786 = vmatprep.subr.bf16.mxu0 %v6424_v13  ;;  %1827 = vmatprep.subr.bf16.mxu1 %v6427_v17 }
 0x2c5   :  { %1787 = vmatpush1.bf16.msra.mxu0 %v6430_v27  ;;  %1828 = vmatpush1.bf16.msra.mxu1 %v6433_v6 }
 0x2c6   :  { %2206 = vmatprep.subr.bf16.mxu0 %v7651_v15  ;;  %2247 = vmatprep.subr.bf16.mxu1 %v7652_v55 }
 0x37b   :  { %v1372_v52 = vpop.f32.mrb[24].mxu0  ;;  %v6438_v19 = vpop.f32.mrb[24].mxu1 }
 0x37c   :  { %v1424_v53 = vrot.slane %v1372_v52, 6  ;;  %v1428_v4 = vrot.slane %v1372_v52, 7  ;;  %v1432_v43 = vrot.slane %v1372_v52, 1  ;;  %v1436_v61 = vrot.slane %v1372_v52, 2  ;;  %v6440_v21 = vpop.f32.mrb[25].mxu0  ;;  %v6442_v3 = vpop.f32.mrb[25].mxu1 }
 0x37d   :  { %v1440_v54 = vrot.slane %v1372_v52, 3  ;;  %v1444_v28 = vrot.slane %v1372_v52, 4  ;;  %v1448_v23 = vrot.slane %v1372_v52, 5  ;;  %v1492_v5 = vadd.f32 %v1372_v52, %v5947_v33  ;;  %v1376_v29 = vpop.f32.mrb[26].mxu0  ;;  %v1417_v51 = vpop.f32.mrb[26].mxu1 }
 0x37e   :  { %v1484_v41 = vadd.f32 %v1424_v53, %v7627_v50  ;;  %v1488_v49 = vadd.f32 %v1428_v4, %v5945_v32  ;;  %v1496_v8 = vadd.f32 %v1432_v43, %v5949_v34  ;;  %v1500_v42 = vadd.f32 %v1436_v61, %v5951_v35  ;;  %v1377_v30 = vpop.f32.mrb[27].mxu0  ;;  %v1418_v20 = vpop.f32.mrb[27].mxu1 }
 0x37f   :  { %v1504_v45 = vadd.f32 %v1440_v54, %v5953_v36  ;;  %v1508_v63 = vadd.f32 %v1444_v28, %v5955_v37  ;;  %v4218_v15 = vmul.f32 -1.442695, %v1492_v5  ;;  %v1512_v55 = vadd.f32 %v1448_v23, %v5957_v38 }
 0x380   :  { %v4216_v52 = vmul.f32 -1.442695, %v1484_v41  ;;  %v4217_v29 = vmul.f32 -1.442695, %v1488_v49  ;;  %v4219_v51 = vmul.f32 -1.442695, %v1496_v8  ;;  %v1494_v49 = vadd.f32 %v6438_v19, %v5991_v48 }
 0x381   :  { %4724 = vpow2.f32 %v4218_v15  ;;  %v4220_v53 = vmul.f32 -1.442695, %v1500_v42  ;;  %v4221_v4 = vmul.f32 -1.442695, %v1504_v45  ;;  %v1426_v43 = vrot.slane %v6438_v19, 6 }
 0x382   :  { %4726 = vpow2.f32 %v4216_v52  ;;  %v1430_v61 = vrot.slane %v6438_v19, 7  ;;  %v4222_v30 = vmul.f32 -1.442695, %v1508_v63  ;;  %v4223_v54 = vmul.f32 -1.442695, %v1512_v55 }
 0x383   :  { %4728 = vpow2.f32 %v4217_v29  ;;  %v1434_v28 = vrot.slane %v6438_v19, 1  ;;  %v1438_v23 = vrot.slane %v6438_v19, 2  ;;  %v1486_v5 = vadd.f32 %v1426_v43, %v5975_v40 }
 0x384   :  { %4730 = vpow2.f32 %v4219_v51  ;;  %v1490_v41 = vadd.f32 %v1430_v61, %v5986_v59  ;;  %v1442_v45 = vrot.slane %v6438_v19, 3  ;;  %v1446_v63 = vrot.slane %v6438_v19, 4 }
 0x385   :  { %4732 = vpow2.f32 %v4220_v53  ;;  %v1498_v8 = vadd.f32 %v1434_v28, %v6007_v46  ;;  %v1502_v42 = vadd.f32 %v1438_v23, %v5996_v1  ;;  %v1425_v51 = vrot.slane %v6440_v21, 6  ;;  %v7653_v23 = vld [vmem:[#allocation39_spill] sm:$0xff]  ;;  %v7656_v1 = vld [vmem:[#allocation34_spill] sm:$0xff] }
 0x386   :  { %4734 = vpow2.f32 %v4221_v4  ;;  %v1450_v43 = vrot.slane %v6438_v19, 5  ;;  %v1429_v61 = vrot.slane %v6440_v21, 7  ;;  %v1506_v28 = vadd.f32 %v1442_v45, %v6043_v62  ;;  %v7657_v46 = vld [vmem:[#allocation42_spill] sm:$0xff] }
 0x387   :  { %4736 = vpow2.f32 %v4222_v30  ;;  %v1441_v19 = vrot.slane %v6440_v21, 3  ;;  %v1445_v45 = vrot.slane %v6440_v21, 4  ;;  %v1449_v62 = vrot.slane %v6440_v21, 5 }
 0x388   :  { %4738 = vpow2.f32 %v4223_v54  ;;  %v1514_v48 = vadd.f32 %v1450_v43, %v7657_v46 }
 0x389   :  { %4740 = vtanh.f32 %v1486_v5  ;;  %v1510_v5 = vadd.f32 %v1446_v63, %v7653_v23  ;;  %v7655_v63 = vld [vmem:[#allocation32_spill] sm:$0xff] }
 0x38a   :  { %4742 = vtanh.f32 %v1490_v41  ;;  %v1489_v23 = vadd.f32 %v1429_v61, %v7655_v63  ;;  %v1427_v61 = vrot.slane %v6442_v3, 6 }
 0x38b   :  { %v4725_v20 = vpop.eup %4724  ;;  %4744 = vtanh.f32 %v1494_v49 }
 0x38c   :  { %v4727_v15 = vpop.eup %4726  ;;  %v1542_v55 = vadd.f32 1.0, %v4725_v20  ;;  %4746 = vtanh.f32 %v1498_v8  ;;  %v1433_v8 = vrot.slane %v6440_v21, 1  ;;  %v4225_v63 = vmul.f32 -1.442695, %v1489_v23 }
 0x38d   :  { %v4729_v52 = vpop.eup %4728  ;;  %v1540_v29 = vadd.f32 1.0, %v4727_v15  ;;  %4748 = vtanh.f32 %v1502_v42  ;;  %v1437_v42 = vrot.slane %v6440_v21, 2  ;;  %v1439_v23 = vrot.slane %v6442_v3, 2 }
 0x38e   :  { %v4731_v53 = vpop.eup %4730  ;;  %v1541_v4 = vadd.f32 1.0, %v4729_v52  ;;  %4750 = vrcp.f32 %v1542_v55  ;;  %v7654_v55 = vld [vmem:[#allocation26_spill] sm:$0xff] }
 0x38f   :  { %v4733_v30 = vpop.eup %4732  ;;  %v1543_v54 = vadd.f32 1.0, %v4731_v53  ;;  %4752 = vrcp.f32 %v1540_v29  ;;  %v1485_v52 = vadd.f32 %v1425_v51, %v7654_v55  ;;  %v7658_v51 = vld [vmem:[#allocation36_spill] sm:$0xff] }
 0x390   :  { %v4735_v41 = vpop.eup %4734  ;;  %v1544_v49 = vadd.f32 1.0, %v4733_v30  ;;  %4754 = vrcp.f32 %v1541_v4  ;;  %v1497_v55 = vadd.f32 %v1433_v8, %v7658_v51  ;;  %v1513_v8 = vadd.f32 %v1449_v62, %v7629_v10 }
 0x391   :  { %v4737_v20 = vpop.eup %4736  ;;  %v1545_v15 = vadd.f32 1.0, %v4735_v41  ;;  %4756 = vrcp.f32 %v1543_v54  ;;  %v1493_v41 = vadd.f32 %v6440_v21, %v7656_v1  ;;  %v4224_v40 = vmul.f32 -1.442695, %v1485_v52 }
 0x392   :  { %v4739_v53 = vpop.eup %4738  ;;  %v1546_v29 = vadd.f32 1.0, %v4737_v20  ;;  %4758 = vrcp.f32 %v1544_v49  ;;  %v7659_v20 = vld [vmem:[#allocation37_spill] sm:$0xff]  ;;  %v1431_v21 = vrot.slane %v6442_v3, 7 }
 0x393   :  { %v4741_v30 = vpop.eup %4740  ;;  %v1547_v4 = vadd.f32 1.0, %v4739_v53  ;;  %4760 = vrcp.f32 %v1545_v15  ;;  %v1501_v49 = vadd.f32 %v1437_v42, %v7659_v20  ;;  %v1505_v15 = vadd.f32 %v1441_v19, %v6057_v11 }
 0x394   :  { %v4743_v54 = vpop.eup %4742  ;;  %4762 = vrcp.f32 %v1546_v29  ;;  %v7660_v29 = vld [vmem:[#allocation41_spill] sm:$0xff]  ;;  %v4226_v51 = vmul.f32 -1.442695, %v1493_v41  ;;  %v1435_v20 = vrot.slane %v6442_v3, 1  ;;  %v1487_v19 = vadd.f32 %v1427_v61, %v7630_v56 }
 0x395   :  { %v4745_v59 = vpop.eup %4744  ;;  %4764 = vrcp.f32 %v1547_v4  ;;  %v1509_v43 = vadd.f32 %v1445_v45, %v7660_v29  ;;  %v4227_v4 = vmul.f32 -1.442695, %v1497_v55  ;;  %v4228_v52 = vmul.f32 -1.442695, %v1501_v49  ;;  %v7661_v45 = vld [vmem:[#allocation33_spill] sm:$0xff] }
 0x396   :  { %v4747_v53 = vpop.eup %4746  ;;  %4766 = vtanh.f32 %v1506_v28  ;;  %v4229_v62 = vmul.f32 -1.442695, %v1505_v15  ;;  %v1491_v41 = vadd.f32 %v1431_v21, %v7661_v45  ;;  %v4231_v61 = vmul.f32 -1.442695, %v1513_v8 }
 0x397   :  { %v4749_v1 = vpop.eup %4748  ;;  %4768 = vtanh.f32 %v1510_v5  ;;  %v4230_v49 = vmul.f32 -1.442695, %v1509_v43  ;;  %v1503_v15 = vadd.f32 %v1439_v23, %v6048_v22 }
 0x398   :  { %v4751_v42 = vpop.eup %4750  ;;  %4770 = vtanh.f32 %v1514_v48 }
 0x399   :  { %v4753_v46 = vpop.eup %4752  ;;  %v6487_v28 = vmul.f32 %v4751_v42, %v4745_v59  ;;  %4772 = vpow2.f32 %v4224_v40  ;;  %v1495_v59 = vadd.f32 %v6442_v3, %v6025_v2  ;;  %v4236_v8 = vmul.f32 -1.442695, %v1503_v15 }
 0x39a   :  { %v4755_v5 = vpop.eup %4754  ;;  %v6491_v11 = vmul.f32 %v4753_v46, %v4741_v30  ;;  %4774 = vpow2.f32 %v4225_v63  ;;  %v1499_v46 = vadd.f32 %v1435_v20, %v6034_v58 }
 0x39b   :  { %v4757_v48 = vpop.eup %4756  ;;  %v6494_v55 = vmul.f32 %v4755_v5, %v4743_v54  ;;  %4776 = vpow2.f32 %v4226_v51  ;;  %v4232_v54 = vmul.f32 -1.442695, %v1487_v19  ;;  %v4233_v51 = vmul.f32 -1.442695, %v1491_v41 }
 0x39c   :  { %v4759_v40 = vpop.eup %4758  ;;  %v6498_v42 = vmul.f32 %v4757_v48, %v4747_v53  ;;  %4778 = vpow2.f32 %v4227_v4  ;;  %v4234_v5 = vmul.f32 -1.442695, %v1495_v59  ;;  %v4235_v53 = vmul.f32 -1.442695, %v1499_v46 }
 0x39d   :  { %v4761_v30 = vpop.eup %4760  ;;  %v6501_v63 = vmul.f32 %v4759_v40, %v4749_v1  ;;  %4780 = vpow2.f32 %v4228_v52  ;;  %v1443_v52 = vrot.slane %v6442_v3, 3  ;;  %v1451_v59 = vrot.slane %v6442_v3, 5 }
 0x39e   :  { %v4763_v21 = vpop.eup %4762  ;;  %4782 = vpow2.f32 %v4229_v62  ;;  %v1447_v62 = vrot.slane %v6442_v3, 4 }
 0x39f   :  { %v4765_v43 = vpop.eup %4764  ;;  %4784 = vpow2.f32 %v4230_v49 }
 0x3a0   :  { %v4767_v2 = vpop.eup %4766  ;;  %4786 = vpow2.f32 %v4231_v61 }
 0x3a1   :  { %v4769_v4 = vpop.eup %4768  ;;  %4788 = vpow2.f32 %v4232_v54  ;;  %v6504_v20 = vmul.f32 %v4767_v2, %v4761_v30  ;;  %v1507_v30 = vadd.f32 %v1443_v52, %v6115_v39 }
 0x3a2   :  { %v4771_v1 = vpop.eup %4770  ;;  %4790 = vpow2.f32 %v4233_v51  ;;  %v6507_v23 = vmul.f32 %v4769_v4, %v4763_v21  ;;  %v1511_v21 = vadd.f32 %v1447_v62, %v6122_v25 }
 0x3a3   :  { %v4773_v19 = vpop.eup %4772  ;;  %4792 = vpow2.f32 %v4234_v5  ;;  %v6510_v41 = vmul.f32 %v4771_v1, %v4765_v43  ;;  %v1515_v5 = vadd.f32 %v1451_v59, %v6129_v14  ;;  %v4237_v1 = vmul.f32 -1.442695, %v1507_v30 }
 0x3a4   :  { %v4775_v48 = vpop.eup %4774  ;;  %v1588_v49 = vadd.f32 1.0, %v4773_v19  ;;  %4794 = vpow2.f32 %v4235_v53  ;;  %v4238_v52 = vmul.f32 -1.442695, %v1511_v21  ;;  %v1677_v30 = vrot.slane %v6351_v31, 7 }
 0x3a5   :  { %v4777_v40 = vpop.eup %4776  ;;  %v1589_v2 = vadd.f32 1.0, %v4775_v48  ;;  %4796 = vpow2.f32 %v4236_v8 }
 0x3a6   :  { %v4779_v61 = vpop.eup %4778  ;;  %v1590_v46 = vadd.f32 1.0, %v4777_v40  ;;  %4798 = vrcp.f32 %v1588_v49  ;;  %v4239_v40 = vmul.f32 -1.442695, %v1515_v5 }
 0x3a7   :  { %v4781_v15 = vpop.eup %4780  ;;  %v1591_v54 = vadd.f32 1.0, %v4779_v61  ;;  %4800 = vrcp.f32 %v1589_v2 }
 0x3a8   :  { %v4783_v51 = vpop.eup %4782  ;;  %v1592_v43 = vadd.f32 1.0, %v4781_v15  ;;  %4802 = vrcp.f32 %v1590_v46  ;;  %v1676_v15 = vrot.slane %v6347_v16, 7  ;;  %v1680_v16 = vrot.slane %v6363_v12, 7 }
 0x3a9   :  { %v4785_v3 = vpop.eup %4784  ;;  %v1593_v53 = vadd.f32 1.0, %v4783_v51  ;;  %4804 = vrcp.f32 %v1591_v54 }
 0x3aa   :  { %v4787_v4 = vpop.eup %4786  ;;  %v1594_v8 = vadd.f32 1.0, %v4785_v3  ;;  %4806 = vrcp.f32 %v1592_v43  ;;  %v1678_v3 = vrot.slane %v6355_v9, 7 }
 0x3ab   :  { %v4789_v19 = vpop.eup %4788  ;;  %v1595_v48 = vadd.f32 1.0, %v4787_v4  ;;  %4808 = vrcp.f32 %v1593_v53 }
 0x3ac   :  { %v4791_v49 = vpop.eup %4790  ;;  %4810 = vrcp.f32 %v1594_v8  ;;  %v1644_v2 = vadd.f32 1.0, %v4789_v19  ;;  %v1679_v8 = vrot.slane %v6359_v24, 7  ;;  %v1682_v24 = vrot.slane %v6371_v47, 7 }
 0x3ad   :  { %v4793_v62 = vpop.eup %4792  ;;  %4812 = vrcp.f32 %v1595_v48  ;;  %v1645_v59 = vadd.f32 1.0, %v4791_v49  ;;  %v1681_v49 = vrot.slane %v6367_v44, 7 }
 0x3ae   :  { %v4795_v61 = vpop.eup %4794  ;;  %4814 = vpow2.f32 %v4237_v1  ;;  %v1646_v54 = vadd.f32 1.0, %v4793_v62 }
 0x3af   :  { %v4797_v46 = vpop.eup %4796  ;;  %4816 = vpow2.f32 %v4238_v52  ;;  %v1647_v43 = vadd.f32 1.0, %v4795_v61 }
 0x3b0   :  { %v4799_v51 = vpop.eup %4798  ;;  %4818 = vpow2.f32 %v4239_v40  ;;  %v1648_v53 = vadd.f32 1.0, %v4797_v46 }
 0x3b1   :  { %v4801_v21 = vpop.eup %4800  ;;  %v1692_v5 = vmul.f32 %v4799_v51, %v1676_v15  ;;  %4820 = vrcp.f32 %v1644_v2 }
 0x3b2   :  { %v4803_v4 = vpop.eup %4802  ;;  %v1693_v1 = vmul.f32 %v4801_v21, %v1677_v30  ;;  %4822 = vrcp.f32 %v1645_v59 }
 0x3b3   :  { %v4805_v19 = vpop.eup %4804  ;;  %v1694_v48 = vmul.f32 %v4803_v4, %v1678_v3  ;;  %v6522_v52 = vadd.f32 %v6491_v11, %v1692_v5  ;;  %4824 = vrcp.f32 %v1646_v54  ;;  %v1683_v11 = vrot.slane %v6375_v26, 7 }
 0x3b4   :  { %v4807_v31 = vpop.eup %4806  ;;  %v1695_v9 = vmul.f32 %v4805_v19, %v1679_v8  ;;  %v6526_v40 = vadd.f32 %v6494_v55, %v1693_v1  ;;  %4826 = vrcp.f32 %v1647_v43 }
 0x3b5   :  { %v4809_v62 = vpop.eup %4808  ;;  %v6530_v2 = vadd.f32 %v6487_v28, %v1694_v48  ;;  %4828 = vrcp.f32 %v1648_v53  ;;  %v1696_v12 = vmul.f32 %v4807_v31, %v1680_v16 }
 0x3b6   :  { %v4811_v61 = vpop.eup %4810  ;;  %v1697_v59 = vmul.f32 %v4809_v62, %v1681_v49  ;;  %v6534_v46 = vadd.f32 %v6498_v42, %v1695_v9  ;;  %4830 = vtanh.f32 %v6522_v52 }
 0x3b7   :  { %v4813_v44 = vpop.eup %4812  ;;  %v1698_v55 = vmul.f32 %v4811_v61, %v1682_v24  ;;  %v6538_v15 = vadd.f32 %v6501_v63, %v1696_v12  ;;  %4832 = vtanh.f32 %v6526_v40 }
 0x3b8   :  { %v4815_v47 = vpop.eup %4814  ;;  %v1699_v28 = vmul.f32 %v4813_v44, %v1683_v11  ;;  %v6542_v54 = vadd.f32 %v6504_v20, %v1697_v59  ;;  %4834 = vtanh.f32 %v6530_v2 }
 0x3b9   :  { %v4817_v26 = vpop.eup %4816  ;;  %v1649_v51 = vadd.f32 1.0, %v4815_v47  ;;  %v6546_v42 = vadd.f32 %v6507_v23, %v1698_v55  ;;  %4836 = vtanh.f32 %v6534_v46 }
 0x3ba   :  { %v4819_v30 = vpop.eup %4818  ;;  %v1650_v43 = vadd.f32 1.0, %v4817_v26  ;;  %v6550_v63 = vadd.f32 %v6510_v41, %v1699_v28  ;;  %4838 = vtanh.f32 %v6538_v15 }
 0x3bb   :  { %v4821_v21 = vpop.eup %4820  ;;  %4840 = vrcp.f32 %v1649_v51  ;;  %v1651_v20 = vadd.f32 1.0, %v4819_v30 }
 0x3bc   :  { %v4823_v3 = vpop.eup %4822  ;;  %4842 = vrcp.f32 %v1650_v43 }
 0x3bd   :  { %v4825_v5 = vpop.eup %4824  ;;  %4844 = vrcp.f32 %v1651_v20 }
 0x3be   :  { %v4827_v53 = vpop.eup %4826  ;;  %4846 = vtanh.f32 %v6542_v54 }
 0x3bf   :  { %v4829_v23 = vpop.eup %4828  ;;  %4848 = vtanh.f32 %v6546_v42 }
 0x3c0   :  { %v4831_v4 = vpop.eup %4830  ;;  %4850 = vtanh.f32 %v6550_v63 }
 0x3c1   :  { %v4833_v41 = vpop.eup %4832  ;;  %v1724_v8 = vmul.f32 %v4831_v4, %v4821_v21 }
 0x3c2   :  { %v4835_v1 = vpop.eup %4834  ;;  %v1725_v19 = vmul.f32 %v4833_v41, %v4823_v3 }
 0x3c3   :  { %v4837_v16 = vpop.eup %4836  ;;  %v1726_v48 = vmul.f32 %v4835_v1, %v4825_v5  ;;  %v1732_v31 = vpack.c.bf16 %v1724_v8, %v1724_v8 }
 0x3c4   :  { %v4839_v49 = vpop.eup %4838  ;;  %v1727_v9 = vmul.f32 %v4837_v16, %v4827_v53  ;;  %v1733_v62 = vpack.c.bf16 %v1725_v19, %v1725_v19 }
 0x3c5   :  { %v4841_v24 = vpop.eup %4840  ;;  %v1728_v12 = vmul.f32 %v4839_v49, %v4829_v23  ;;  %v1734_v61 = vpack.c.bf16 %v1726_v48, %v1726_v48  ;;  %v1748_v11 = vunpack.c.l.b16 %v1732_v31 }
 0x3c6   :  { %v4843_v59 = vpop.eup %4842  ;;  %v1735_v44 = vpack.c.bf16 %v1727_v9, %v1727_v9  ;;  %v1749_v55 = vunpack.c.l.b16 %v1733_v62 }
 0x3c7   :  { %v4845_v47 = vpop.eup %4844  ;;  %v1736_v28 = vpack.c.bf16 %v1728_v12, %v1728_v12  ;;  %v1756_v26 = vrot.slane %v1748_v11, 2  ;;  %v1750_v3 = vunpack.c.l.b16 %v1734_v61 }
 0x3c8   :  { %v4847_v51 = vpop.eup %4846  ;;  %v1751_v30 = vunpack.c.l.b16 %v1735_v44  ;;  %v1757_v43 = vrot.slane %v1749_v55, 1 }
 0x3c9   :  { %v4849_v21 = vpop.eup %4848  ;;  %v1729_v20 = vmul.f32 %v4847_v51, %v4841_v24  ;;  %v1752_v5 = vunpack.c.l.b16 %v1736_v28  ;;  %v6566_v51 = vld [vmem:[#allocation7 + $0x8] ss:$16 sps:$4 sm:$0xff]  }
 0x3ca   :  { %v4851_v4 = vpop.eup %4850  ;;  %v1730_v53 = vmul.f32 %v4849_v21, %v4843_v59  ;;  %v1758_v41 = vsel %vm882_vm1, %v1757_v43, %v1756_v26  ;;  %v1760_v23 = vrot.slane %v1751_v30, 7  ;;  %v6563_v26 = vld [vmem:[#allocation7] ss:$16 sps:$4 sm:$0xff]   ;;  %v6569_v30 = vld [vmem:[#allocation7 + $0x24] ss:$16 sps:$4 sm:$0xff]  }
 0x3cb   :  { %v1731_v8 = vmul.f32 %v4851_v4, %v4845_v47  ;;  %v1737_v1 = vpack.c.bf16 %v1729_v20, %v1729_v20  ;;  %v1759_v19 = vsel %vm885_vm2, %v1750_v3, %v1758_v41  ;;  %v1762_v16 = vrot.slane %v1752_v5, 6  ;;  %v6572_v43 = vld [vmem:[#allocation7 + $0x2c] ss:$16 sps:$4 sm:$0xff]   ;;  %v6577_v21 = vld [vmem:[#allocation7 + $0x20] ss:$16 sps:$4 sm:$0xff]  }
 0x3cc   :  { %v1738_v48 = vpack.c.bf16 %v1730_v53, %v1730_v53  ;;  %v1761_v31 = vsel %vm888_vm3, %v1760_v23, %v1759_v19  ;;  %v6580_v20 = vld [vmem:[#allocation7 + $0x28] ss:$16 sps:$4 sm:$0xff]   ;;  %v6583_v3 = vld [vmem:[#allocation7 + $0x44] ss:$16 sps:$4 sm:$0xff]   ;;  %v6586_v5 = vld [vmem:[#allocation7 + $0x4c] ss:$16 sps:$4 sm:$0xff]  }
 0x3cd   :  { %v1739_v49 = vpack.c.bf16 %v1731_v8, %v1731_v8  ;;  %v1753_v9 = vunpack.c.l.b16 %v1737_v1  ;;  %v1763_v62 = vsel %vm891_vm4, %v1762_v16, %v1761_v31  ;;  %v6589_v4 = vld [vmem:[#allocation7 + $0x40] ss:$16 sps:$4 sm:$0xff]   ;;  %v6592_v53 = vld [vmem:[#allocation7 + $0x48] ss:$16 sps:$4 sm:$0xff]   ;;  %v6595_v41 = vld [vmem:[#allocation7 + $0x64] ss:$16 sps:$4 sm:$0xff]  }
 0x3ce   :  { %v1754_v24 = vunpack.c.l.b16 %v1738_v48  ;;  %v6598_v23 = vld [vmem:[#allocation7 + $0x6c] ss:$16 sps:$4 sm:$0xff]   ;;  %v6601_v8 = vld [vmem:[#allocation7 + $0x60] ss:$16 sps:$4 sm:$0xff]   ;;  %v6604_v1 = vld [vmem:[#allocation7 + $0x68] ss:$16 sps:$4 sm:$0xff]  }
 0x3cf   :  { %v1755_v12 = vunpack.c.l.b16 %v1739_v49  ;;  %v1764_v61 = vrot.slane %v1753_v9, 5  ;;  %v6607_v19 = vld [vmem:[#allocation7 + $0x84] ss:$16 sps:$4 sm:$0xff]   ;;  %v6610_v16 = vld [vmem:[#allocation7 + $0x8c] ss:$16 sps:$4 sm:$0xff]  }
 0x3d0   :  { %v1766_v11 = vrot.slane %v1754_v24, 4  ;;  %7662 = vst [vmem:[#allocation15_spill] sm:$0xff] %v6607_v19  ;;  %7663 = vst [vmem:[#allocation16_spill] sm:$0xff] %v6610_v16  ;;  %v6613_v48 = vld [vmem:[#allocation7 + $0x80] ss:$16 sps:$4 sm:$0xff]  }
 0x3d1   :  { %v1765_v59 = vsel %vm894_vm5, %v1764_v61, %v1763_v62  ;;  %v1768_v44 = vrot.slane %v1755_v12, 3  ;;  %7664 = vst [vmem:[#allocation30_spill] sm:$0xff] %v6613_v48  ;;  %v6616_v31 = vld [vmem:[#allocation7 + $0x88] ss:$16 sps:$4 sm:$0xff]   ;;  %v6619_v49 = vld [vmem:[#allocation7 + $0xa4] ss:$16 sps:$4 sm:$0xff]  }
 0x3d2   :  { %v1767_v55 = vsel %vm897_vm6, %v1766_v11, %v1765_v59  ;;  %7665 = vst [vmem:[#allocation44_spill] sm:$0xff] %v6616_v31  ;;  %7666 = vst [vmem:[#allocation45_spill] sm:$0xff] %v6619_v49  ;;  %v6622_v9 = vld [vmem:[#allocation7 + $0xac] ss:$16 sps:$4 sm:$0xff]   ;;  %v6625_v62 = vld [vmem:[#allocation7 + $0xa0] ss:$16 sps:$4 sm:$0xff]  }
 0x3d3   :  { %v1769_v47 = vsel %vm900_vm7, %v1768_v44, %v1767_v55  ;;  %7667 = vst [vmem:[#allocation46_spill] sm:$0xff] %v6622_v9  ;;  %7668 = vst [vmem:[#allocation47_spill] sm:$0xff] %v6625_v62  ;;  %v6628_v24 = vld [vmem:[#allocation7 + $0xa8] ss:$16 sps:$4 sm:$0xff]   ;;  %v6639_v12 = vld [vmem:[#allocation7 + $0x4] ss:$16 sps:$4 sm:$0xff]  }
 0x3d4   :  { %v1770_v28 = vpack.c.b16 %v1769_v47, %v1769_v47  ;;  %7669 = vst [vmem:[#allocation48_spill] sm:$0xff] %v6628_v24  ;;  %7670 = vst [vmem:[#allocation49_spill] sm:$0xff] %v6639_v12  ;;  %v6642_v61 = vld [vmem:[#allocation7 + $0xc] ss:$16 sps:$4 sm:$0xff]  }
 0x3d5   :  { %7671 = vst [vmem:[#allocation50_spill] sm:$0xff] %v6642_v61 }
 0x3d6   :  { %1805 = vmatmul.mubr.bf16.vlgmr.msra.gmra.mrb[28].mxu0 %v1770_v28  ;;  %1846 = vmatmul.mubr.bf16.vlgmr.msra.gmra.mrb[28].mxu1 %v1770_v28 }
 0x3d7   :  { %2207 = vmatpush1.bf16.msra.mxu0 %v6563_v26  ;;  %2248 = vmatpush1.bf16.msra.mxu1 %v6566_v51 }
 0x3d8   :  { %2208 = vmatprep.subr.bf16.mxu0 %v6569_v30  ;;  %2249 = vmatprep.subr.bf16.mxu1 %v6572_v43 }
 0x3d9   :  { %2238 = vmatprep.mubr.bf16.mxu0 %v7602_v18  ;;  %2279 = vmatprep.mubr.bf16.mxu1 %v7602_v18 }
 0x3db   :  { %2209 = vmatpush1.bf16.msra.mxu0 %v6577_v21  ;;  %2250 = vmatpush1.bf16.msra.mxu1 %v6580_v20 }
 0x3dc   :  { %2210 = vmatprep.subr.bf16.mxu0 %v6583_v3  ;;  %2251 = vmatprep.subr.bf16.mxu1 %v6586_v5 }
 0x3df   :  { %2211 = vmatpush1.bf16.msra.mxu0 %v6589_v4  ;;  %2252 = vmatpush1.bf16.msra.mxu1 %v6592_v53 }
 0x3e0   :  { %2212 = vmatprep.subr.bf16.mxu0 %v6595_v41  ;;  %2253 = vmatprep.subr.bf16.mxu1 %v6598_v23 }
 0x3e3   :  { %2213 = vmatpush1.bf16.msra.mxu0 %v6601_v8  ;;  %2254 = vmatpush1.bf16.msra.mxu1 %v6604_v1 }
 0x3e4   :  { %2214 = vmatprep.subr.bf16.mxu0 %v6607_v19  ;;  %2255 = vmatprep.subr.bf16.mxu1 %v6610_v16 }
 0x3e7   :  { %2215 = vmatpush1.bf16.msra.mxu0 %v6613_v48  ;;  %2256 = vmatpush1.bf16.msra.mxu1 %v6616_v31 }
 0x3e8   :  { %2216 = vmatprep.subr.bf16.mxu0 %v6619_v49  ;;  %2257 = vmatprep.subr.bf16.mxu1 %v6622_v9 }
 0x3eb   :  { %2217 = vmatpush1.bf16.msra.mxu0 %v6625_v62  ;;  %2258 = vmatpush1.bf16.msra.mxu1 %v6628_v24 }
 0x3ec   :  { %2218 = vmatprep.subr.bf16.mxu0 %v6412_v0  ;;  %2259 = vmatprep.subr.bf16.mxu1 %v6415_v7 }
 0x3ef   :  { %2219 = vmatpush1.bf16.msra.mxu0 %v6418_v60  ;;  %2260 = vmatpush1.bf16.msra.mxu1 %v6421_v57 }
 0x3f0   :  { %2220 = vmatprep.subr.bf16.mxu0 %v6424_v13  ;;  %2261 = vmatprep.subr.bf16.mxu1 %v6427_v17 }
 0x3f3   :  { %2221 = vmatpush1.bf16.msra.mxu0 %v6430_v27  ;;  %2262 = vmatpush1.bf16.msra.mxu1 %v6433_v6 }
 0x3f4   :  { %2640 = vmatprep.subr.bf16.mxu0 %v6639_v12  ;;  %2681 = vmatprep.subr.bf16.mxu1 %v6642_v61 }
 0x4a9   :  { %v1806_v0 = vpop.f32.mrb[28].mxu0  ;;  %v6645_v7 = vpop.f32.mrb[28].mxu1 }
 0x4aa   :  { %v1858_v60 = vrot.slane %v1806_v0, 5  ;;  %v1862_v57 = vrot.slane %v1806_v0, 6  ;;  %v1866_v13 = vrot.slane %v1806_v0, 7  ;;  %v1870_v11 = vrot.slane %v1806_v0, 1  ;;  %v6647_v17 = vpop.f32.mrb[29].mxu0  ;;  %v6649_v27 = vpop.f32.mrb[29].mxu1 }
 0x4ab   :  { %v1874_v6 = vrot.slane %v1806_v0, 2  ;;  %v1878_v59 = vrot.slane %v1806_v0, 3  ;;  %v1882_v44 = vrot.slane %v1806_v0, 4  ;;  %v1930_v55 = vadd.f32 %v1806_v0, %v5949_v34  ;;  %v1810_v47 = vpop.f32.mrb[30].mxu0  ;;  %v1851_v28 = vpop.f32.mrb[30].mxu1 }
 0x4ac   :  { %v1918_v61 = vadd.f32 %v1858_v60, %v7627_v50  ;;  %v1922_v12 = vadd.f32 %v1862_v57, %v5945_v32  ;;  %v1926_v24 = vadd.f32 %v1866_v13, %v5947_v33  ;;  %v1934_v62 = vadd.f32 %v1870_v11, %v5951_v35  ;;  %v1811_v9 = vpop.f32.mrb[31].mxu0  ;;  %v1852_v49 = vpop.f32.mrb[31].mxu1 }
 0x4ad   :  { %v1938_v31 = vadd.f32 %v1874_v6, %v5953_v36  ;;  %v1942_v48 = vadd.f32 %v1878_v59, %v5955_v37  ;;  %v4243_v16 = vmul.f32 -1.442695, %v1930_v55  ;;  %v1946_v19 = vadd.f32 %v1882_v44, %v5957_v38  ;;  %v7675_v44 = vld [vmem:[#allocation31_spill] sm:$0xff]  ;;  %v7680_v38 = vld [vmem:[#allocation26_spill] sm:$0xff] }
 0x4ae   :  { %v4240_v0 = vmul.f32 -1.442695, %v1918_v61  ;;  %v4241_v47 = vmul.f32 -1.442695, %v1922_v12  ;;  %v4242_v28 = vmul.f32 -1.442695, %v1926_v24  ;;  %v1932_v55 = vadd.f32 %v6645_v7, %v7675_v44 }
 0x4af   :  { %4852 = vpow2.f32 %v4243_v16  ;;  %v4244_v60 = vmul.f32 -1.442695, %v1934_v62  ;;  %v4245_v57 = vmul.f32 -1.442695, %v1938_v31  ;;  %v1860_v13 = vrot.slane %v6645_v7, 5  ;;  %v7672_v61 = vld [vmem:[#allocation25_spill] sm:$0xff] }
 0x4b0   :  { %4854 = vpow2.f32 %v4240_v0  ;;  %v1864_v11 = vrot.slane %v6645_v7, 6  ;;  %v4246_v49 = vmul.f32 -1.442695, %v1942_v48  ;;  %v1868_v9 = vrot.slane %v6645_v7, 7  ;;  %v7673_v16 = vld [vmem:[#allocation27_spill] sm:$0xff]  ;;  %v7674_v31 = vld [vmem:[#allocation28_spill] sm:$0xff] }
 0x4b1   :  { %4856 = vpow2.f32 %v4241_v47  ;;  %v4247_v6 = vmul.f32 -1.442695, %v1946_v19  ;;  %v1872_v59 = vrot.slane %v6645_v7, 1  ;;  %v1920_v12 = vadd.f32 %v1860_v13, %v7672_v61  ;;  %v7676_v48 = vld [vmem:[#allocation29_spill] sm:$0xff] }
 0x4b2   :  { %4858 = vpow2.f32 %v4242_v28  ;;  %v1924_v62 = vadd.f32 %v1864_v11, %v7673_v16  ;;  %v1928_v24 = vadd.f32 %v1868_v9, %v7674_v31  ;;  %v1876_v47 = vrot.slane %v6645_v7, 2 }
 0x4b3   :  { %4860 = vpow2.f32 %v4244_v60  ;;  %v1936_v0 = vadd.f32 %v1872_v59, %v7676_v48  ;;  %v1859_v9 = vrot.slane %v6647_v17, 5  ;;  %v1867_v44 = vrot.slane %v6647_v17, 7 }
 0x4b4   :  { %4862 = vpow2.f32 %v4245_v57  ;;  %v1880_v57 = vrot.slane %v6645_v7, 3 }
 0x4b5   :  { %4864 = vpow2.f32 %v4246_v49  ;;  %v1884_v49 = vrot.slane %v6645_v7, 4  ;;  %v1919_v37 = vadd.f32 %v1859_v9, %v7680_v38 }
 0x4b6   :  { %4866 = vpow2.f32 %v4247_v6 }
 0x4b7   :  { %4868 = vtanh.f32 %v1920_v12  ;;  %v1863_v12 = vrot.slane %v6647_v17, 6  ;;  %v4248_v38 = vmul.f32 -1.442695, %v1919_v37 }
 0x4b8   :  { %4870 = vtanh.f32 %v1924_v62 }
 0x4b9   :  { %v4853_v19 = vpop.eup %4852  ;;  %4872 = vtanh.f32 %v1928_v24  ;;  %v7677_v24 = vld [vmem:[#allocation38_spill] sm:$0xff] }
 0x4ba   :  { %v4855_v28 = vpop.eup %4854  ;;  %v1977_v60 = vadd.f32 1.0, %v4853_v19  ;;  %4874 = vtanh.f32 %v1932_v55  ;;  %v1940_v19 = vadd.f32 %v1876_v47, %v7677_v24  ;;  %v1875_v47 = vrot.slane %v6647_v17, 2  ;;  %v7681_v24 = vld [vmem:[#allocation32_spill] sm:$0xff] }
 0x4bb   :  { %v4857_v13 = vpop.eup %4856  ;;  %v1974_v11 = vadd.f32 1.0, %v4855_v28  ;;  %4876 = vtanh.f32 %v1936_v0  ;;  %v7678_v28 = vld [vmem:[#allocation39_spill] sm:$0xff]  ;;  %v1871_v0 = vrot.slane %v6647_v17, 1  ;;  %v1923_v36 = vadd.f32 %v1863_v12, %v7681_v24 }
 0x4bc   :  { %v4859_v6 = vpop.eup %4858  ;;  %v1975_v59 = vadd.f32 1.0, %v4857_v13  ;;  %4878 = vrcp.f32 %v1977_v60  ;;  %v1944_v7 = vadd.f32 %v1880_v57, %v7678_v28  ;;  %v7679_v60 = vld [vmem:[#allocation42_spill] sm:$0xff]  ;;  %v1879_v57 = vrot.slane %v6647_v17, 3 }
 0x4bd   :  { %v4861_v62 = vpop.eup %4860  ;;  %v1976_v48 = vadd.f32 1.0, %v4859_v6  ;;  %4880 = vrcp.f32 %v1974_v11  ;;  %v1948_v13 = vadd.f32 %v1884_v49, %v7679_v60  ;;  %v7682_v28 = vld [vmem:[#allocation34_spill] sm:$0xff]  ;;  %v7683_v49 = vld [vmem:[#allocation36_spill] sm:$0xff]  ;;  %v1861_v12 = vrot.slane %v6649_v27, 5 }
 0x4be   :  { %v4863_v55 = vpop.eup %4862  ;;  %v1978_v31 = vadd.f32 1.0, %v4861_v62  ;;  %4882 = vrcp.f32 %v1975_v59  ;;  %v1927_v34 = vadd.f32 %v1867_v44, %v7682_v28  ;;  %v1931_v9 = vadd.f32 %v6647_v17, %v7683_v49 }
 0x4bf   :  { %v4865_v16 = vpop.eup %4864  ;;  %v1979_v61 = vadd.f32 1.0, %v4863_v55  ;;  %4884 = vrcp.f32 %v1976_v48  ;;  %v1883_v48 = vrot.slane %v6647_v17, 4  ;;  %v4249_v33 = vmul.f32 -1.442695, %v1923_v36 }
 0x4c0   :  { %v4867_v6 = vpop.eup %4866  ;;  %v1980_v11 = vadd.f32 1.0, %v4865_v16  ;;  %4886 = vrcp.f32 %v1978_v31  ;;  %v7684_v16 = vld [vmem:[#allocation37_spill] sm:$0xff]  ;;  %v1865_v44 = vrot.slane %v6649_v27, 6  ;;  %v1943_v28 = vadd.f32 %v1879_v57, %v7660_v29 }
 0x4c1   :  { %v4869_v62 = vpop.eup %4868  ;;  %v1981_v59 = vadd.f32 1.0, %v4867_v6  ;;  %4888 = vrcp.f32 %v1979_v61  ;;  %v1935_v31 = vadd.f32 %v1871_v0, %v7684_v16  ;;  %v7685_v61 = vld [vmem:[#allocation40_spill] sm:$0xff]  ;;  %v4250_v32 = vmul.f32 -1.442695, %v1927_v34 }
 0x4c2   :  { %v4871_v55 = vpop.eup %4870  ;;  %4890 = vrcp.f32 %v1980_v11  ;;  %v1939_v24 = vadd.f32 %v1875_v47, %v7685_v61  ;;  %v1869_v17 = vrot.slane %v6649_v27, 7  ;;  %v1947_v37 = vadd.f32 %v1883_v48, %v7629_v10 }
 0x4c3   :  { %v4873_v60 = vpop.eup %4872  ;;  %4892 = vrcp.f32 %v1981_v59  ;;  %v4251_v59 = vmul.f32 -1.442695, %v1931_v9  ;;  %v4252_v16 = vmul.f32 -1.442695, %v1935_v31  ;;  %v1873_v36 = vrot.slane %v6649_v27, 1  ;;  %v7686_v9 = vld [vmem:[#allocation35_spill] sm:$0xff] }
 0x4c4   :  { %v4875_v6 = vpop.eup %4874  ;;  %4894 = vtanh.f32 %v1940_v19  ;;  %v1921_v47 = vadd.f32 %v1861_v12, %v7630_v56  ;;  %v4253_v34 = vmul.f32 -1.442695, %v1939_v24  ;;  %v1925_v57 = vadd.f32 %v1865_v44, %v7661_v45 }
 0x4c5   :  { %v4877_v11 = vpop.eup %4876  ;;  %4896 = vtanh.f32 %v1944_v7  ;;  %v4254_v48 = vmul.f32 -1.442695, %v1943_v28  ;;  %v1929_v31 = vadd.f32 %v1869_v17, %v7686_v9  ;;  %v1937_v24 = vadd.f32 %v1873_v36, %v6048_v22 }
 0x4c6   :  { %v4879_v0 = vpop.eup %4878  ;;  %4898 = vtanh.f32 %v1948_v13 }
 0x4c7   :  { %v4881_v49 = vpop.eup %4880  ;;  %v6694_v19 = vmul.f32 %v4879_v0, %v4875_v6  ;;  %4900 = vpow2.f32 %v4248_v38  ;;  %v4255_v0 = vmul.f32 -1.442695, %v1947_v37  ;;  %v4258_v44 = vmul.f32 -1.442695, %v1929_v31 }
 0x4c8   :  { %v4883_v7 = vpop.eup %4882  ;;  %v6698_v61 = vmul.f32 %v4881_v49, %v4869_v62  ;;  %4902 = vpow2.f32 %v4249_v33  ;;  %v1933_v62 = vadd.f32 %v6649_v27, %v6034_v58  ;;  %v1885_v31 = vrot.slane %v6649_v27, 4 }
 0x4c9   :  { %v4885_v13 = vpop.eup %4884  ;;  %v6701_v29 = vmul.f32 %v4883_v7, %v4871_v55  ;;  %4904 = vpow2.f32 %v4250_v32  ;;  %v4256_v55 = vmul.f32 -1.442695, %v1921_v47  ;;  %v4257_v32 = vmul.f32 -1.442695, %v1925_v57 }
 0x4ca   :  { %v4887_v6 = vpop.eup %4886  ;;  %v6704_v38 = vmul.f32 %v4885_v13, %v4873_v60  ;;  %4906 = vpow2.f32 %v4251_v59  ;;  %v4259_v17 = vmul.f32 -1.442695, %v1933_v62  ;;  %v4260_v59 = vmul.f32 -1.442695, %v1937_v24 }
 0x4cb   :  { %v4889_v49 = vpop.eup %4888  ;;  %v6708_v33 = vmul.f32 %v4887_v6, %v4877_v11  ;;  %4908 = vpow2.f32 %v4252_v16  ;;  %v1877_v16 = vrot.slane %v6649_v27, 2 }
 0x4cc   :  { %v4891_v12 = vpop.eup %4890  ;;  %4910 = vpow2.f32 %v4253_v34  ;;  %v1881_v34 = vrot.slane %v6649_v27, 3 }
 0x4cd   :  { %v4893_v28 = vpop.eup %4892  ;;  %4912 = vpow2.f32 %v4254_v48  ;;  %v1941_v24 = vadd.f32 %v1877_v16, %v6115_v39 }
 0x4ce   :  { %v4895_v60 = vpop.eup %4894  ;;  %4914 = vpow2.f32 %v4255_v0 }
 0x4cf   :  { %v4897_v37 = vpop.eup %4896  ;;  %4916 = vpow2.f32 %v4256_v55  ;;  %v6711_v7 = vmul.f32 %v4895_v60, %v4889_v49  ;;  %v1949_v60 = vadd.f32 %v1885_v31, %v6129_v14 }
 0x4d0   :  { %v4899_v11 = vpop.eup %4898  ;;  %4918 = vpow2.f32 %v4257_v32  ;;  %v6714_v36 = vmul.f32 %v4897_v37, %v4891_v12  ;;  %v1945_v32 = vadd.f32 %v1881_v34, %v6122_v25 }
 0x4d1   :  { %v4901_v47 = vpop.eup %4900  ;;  %4920 = vpow2.f32 %v4258_v44  ;;  %v6717_v57 = vmul.f32 %v4899_v11, %v4893_v28  ;;  %v4261_v11 = vmul.f32 -1.442695, %v1941_v24  ;;  %v2111_v24 = vrot.slane %v6526_v40, 7 }
 0x4d2   :  { %v4903_v13 = vpop.eup %4902  ;;  %v2022_v48 = vadd.f32 1.0, %v4901_v47  ;;  %4922 = vpow2.f32 %v4259_v17  ;;  %v4262_v16 = vmul.f32 -1.442695, %v1945_v32 }
 0x4d3   :  { %v4905_v6 = vpop.eup %4904  ;;  %v2023_v0 = vadd.f32 1.0, %v4903_v13  ;;  %4924 = vpow2.f32 %v4260_v59 }
 0x4d4   :  { %v4907_v62 = vpop.eup %4906  ;;  %v2024_v49 = vadd.f32 1.0, %v4905_v6  ;;  %4926 = vrcp.f32 %v2022_v48  ;;  %v4263_v6 = vmul.f32 -1.442695, %v1949_v60 }
 0x4d5   :  { %v4909_v55 = vpop.eup %4908  ;;  %v2025_v12 = vadd.f32 1.0, %v4907_v62  ;;  %4928 = vrcp.f32 %v2023_v0 }
 0x4d6   :  { %v4911_v28 = vpop.eup %4910  ;;  %v2026_v44 = vadd.f32 1.0, %v4909_v55  ;;  %4930 = vrcp.f32 %v2024_v49  ;;  %v2110_v55 = vrot.slane %v6522_v52, 7  ;;  %v2114_v52 = vrot.slane %v6538_v15, 7 }
 0x4d7   :  { %v4913_v27 = vpop.eup %4912  ;;  %v2027_v17 = vadd.f32 1.0, %v4911_v28  ;;  %4932 = vrcp.f32 %v2025_v12 }
 0x4d8   :  { %v4915_v37 = vpop.eup %4914  ;;  %v2028_v59 = vadd.f32 1.0, %v4913_v27  ;;  %4934 = vrcp.f32 %v2026_v44  ;;  %v2112_v27 = vrot.slane %v6530_v2, 7 }
 0x4d9   :  { %v4917_v47 = vpop.eup %4916  ;;  %v2029_v13 = vadd.f32 1.0, %v4915_v37  ;;  %4936 = vrcp.f32 %v2027_v17 }
 0x4da   :  { %v4919_v48 = vpop.eup %4918  ;;  %4938 = vrcp.f32 %v2028_v59  ;;  %v2078_v0 = vadd.f32 1.0, %v4917_v47  ;;  %v2113_v59 = vrot.slane %v6534_v46, 7  ;;  %v2116_v46 = vrot.slane %v6546_v42, 7 }
 0x4db   :  { %v4921_v34 = vpop.eup %4920  ;;  %4940 = vrcp.f32 %v2029_v13  ;;  %v2079_v31 = vadd.f32 1.0, %v4919_v48  ;;  %v2115_v48 = vrot.slane %v6542_v54, 7 }
 0x4dc   :  { %v4923_v62 = vpop.eup %4922  ;;  %4942 = vpow2.f32 %v4261_v11  ;;  %v2080_v12 = vadd.f32 1.0, %v4921_v34 }
 0x4dd   :  { %v4925_v49 = vpop.eup %4924  ;;  %4944 = vpow2.f32 %v4262_v16  ;;  %v2081_v44 = vadd.f32 1.0, %v4923_v62 }
 0x4de   :  { %v4927_v28 = vpop.eup %4926  ;;  %4946 = vpow2.f32 %v4263_v6  ;;  %v2082_v17 = vadd.f32 1.0, %v4925_v49 }
 0x4df   :  { %v4929_v32 = vpop.eup %4928  ;;  %v2126_v60 = vmul.f32 %v4927_v28, %v2110_v55  ;;  %4948 = vrcp.f32 %v2078_v0 }
 0x4e0   :  { %v4931_v37 = vpop.eup %4930  ;;  %v2127_v11 = vmul.f32 %v4929_v32, %v2111_v24  ;;  %4950 = vrcp.f32 %v2079_v31 }
 0x4e1   :  { %v4933_v47 = vpop.eup %4932  ;;  %v2128_v13 = vmul.f32 %v4931_v37, %v2112_v27  ;;  %v6729_v16 = vadd.f32 %v6698_v61, %v2126_v60  ;;  %4952 = vrcp.f32 %v2080_v12  ;;  %v2117_v61 = vrot.slane %v6550_v63, 7 }
 0x4e2   :  { %v4935_v40 = vpop.eup %4934  ;;  %v2129_v2 = vmul.f32 %v4933_v47, %v2113_v59  ;;  %v6733_v6 = vadd.f32 %v6701_v29, %v2127_v11  ;;  %4954 = vrcp.f32 %v2081_v44 }
 0x4e3   :  { %v4937_v34 = vpop.eup %4936  ;;  %4956 = vrcp.f32 %v2082_v17  ;;  %v2130_v0 = vmul.f32 %v4935_v40, %v2114_v52  ;;  %v6737_v15 = vadd.f32 %v6704_v38, %v2128_v13 }
 0x4e4   :  { %v4939_v62 = vpop.eup %4938  ;;  %v2131_v31 = vmul.f32 %v4937_v34, %v2115_v48  ;;  %v6741_v49 = vadd.f32 %v6694_v19, %v2129_v2  ;;  %4958 = vtanh.f32 %v6729_v16 }
 0x4e5   :  { %v4941_v29 = vpop.eup %4940  ;;  %v2132_v54 = vmul.f32 %v4939_v62, %v2116_v46  ;;  %v6745_v55 = vadd.f32 %v6708_v33, %v2130_v0  ;;  %4960 = vtanh.f32 %v6733_v6 }
 0x4e6   :  { %v4943_v42 = vpop.eup %4942  ;;  %v2133_v12 = vmul.f32 %v4941_v29, %v2117_v61  ;;  %v6749_v38 = vadd.f32 %v6711_v7, %v2131_v31  ;;  %4962 = vtanh.f32 %v6737_v15 }
 0x4e7   :  { %v4945_v63 = vpop.eup %4944  ;;  %v2083_v28 = vadd.f32 1.0, %v4943_v42  ;;  %v6753_v19 = vadd.f32 %v6714_v36, %v2132_v54  ;;  %4964 = vtanh.f32 %v6741_v49 }
 0x4e8   :  { %v4947_v24 = vpop.eup %4946  ;;  %v2084_v44 = vadd.f32 1.0, %v4945_v63  ;;  %v6757_v33 = vadd.f32 %v6717_v57, %v2133_v12  ;;  %4966 = vtanh.f32 %v6745_v55 }
 0x4e9   :  { %v4949_v32 = vpop.eup %4948  ;;  %4968 = vrcp.f32 %v2083_v28  ;;  %v2085_v7 = vadd.f32 1.0, %v4947_v24 }
 0x4ea   :  { %v4951_v27 = vpop.eup %4950  ;;  %4970 = vrcp.f32 %v2084_v44 }
 0x4eb   :  { %v4953_v60 = vpop.eup %4952  ;;  %4972 = vrcp.f32 %v2085_v7 }
 0x4ec   :  { %v4955_v17 = vpop.eup %4954  ;;  %4974 = vtanh.f32 %v6749_v38 }
 0x4ed   :  { %v4957_v36 = vpop.eup %4956  ;;  %4976 = vtanh.f32 %v6753_v19 }
 0x4ee   :  { %v4959_v37 = vpop.eup %4958  ;;  %4978 = vtanh.f32 %v6757_v33 }
 0x4ef   :  { %v4961_v57 = vpop.eup %4960  ;;  %v2158_v59 = vmul.f32 %v4959_v37, %v4949_v32 }
 0x4f0   :  { %v4963_v11 = vpop.eup %4962  ;;  %v2159_v47 = vmul.f32 %v4961_v57, %v4951_v27 }
 0x4f1   :  { %v4965_v52 = vpop.eup %4964  ;;  %v2160_v13 = vmul.f32 %v4963_v11, %v4953_v60  ;;  %v2166_v40 = vpack.c.bf16 %v2158_v59, %v2158_v59 }
 0x4f2   :  { %v4967_v48 = vpop.eup %4966  ;;  %v2161_v2 = vmul.f32 %v4965_v52, %v4955_v17  ;;  %v2167_v34 = vpack.c.bf16 %v2159_v47, %v2159_v47 }
 0x4f3   :  { %v4969_v46 = vpop.eup %4968  ;;  %v2162_v0 = vmul.f32 %v4967_v48, %v4957_v36  ;;  %v2168_v62 = vpack.c.bf16 %v2160_v13, %v2160_v13  ;;  %v2182_v61 = vunpack.c.l.b16 %v2166_v40 }
 0x4f4   :  { %v4971_v31 = vpop.eup %4970  ;;  %v2169_v29 = vpack.c.bf16 %v2161_v2, %v2161_v2  ;;  %v2183_v54 = vunpack.c.l.b16 %v2167_v34 }
 0x4f5   :  { %v4973_v42 = vpop.eup %4972  ;;  %v2170_v12 = vpack.c.bf16 %v2162_v0, %v2162_v0  ;;  %v2184_v63 = vunpack.c.l.b16 %v2168_v62  ;;  %v2190_v28 = vrot.slane %v2182_v61, 3 }
 0x4f6   :  { %v4975_v24 = vpop.eup %4974  ;;  %v2191_v44 = vrot.slane %v2183_v54, 2  ;;  %v2185_v57 = vunpack.c.l.b16 %v2169_v29 }
 0x4f7   :  { %v4977_v32 = vpop.eup %4976  ;;  %v2163_v7 = vmul.f32 %v4975_v24, %v4969_v46  ;;  %v2186_v27 = vunpack.c.l.b16 %v2170_v12  ;;  %v2193_v60 = vrot.slane %v2184_v63, 1  ;;  %v6812_v63 = vld [vmem:[#allocation7 + $0xe0] ss:$16 sps:$4 sm:$0xff]   ;;  %v7695_v24 = vld [vmem:[#allocation49_spill] sm:$0xff] }
 0x4f8   :  { %v4979_v37 = vpop.eup %4978  ;;  %v2164_v17 = vmul.f32 %v4977_v32, %v4971_v31  ;;  %v2192_v36 = vsel %vm882_vm1, %v2191_v44, %v2190_v28  ;;  %v6815_v28 = vld [vmem:[#allocation7 + $0xe8] ss:$16 sps:$4 sm:$0xff]   ;;  %v7696_v44 = vld [vmem:[#allocation50_spill] sm:$0xff] }
 0x4f9   :  { %v2165_v59 = vmul.f32 %v4979_v37, %v4973_v42  ;;  %v2171_v11 = vpack.c.bf16 %v2163_v7, %v2163_v7  ;;  %v2194_v47 = vsel %vm885_vm2, %v2193_v60, %v2192_v36  ;;  %v2196_v52 = vrot.slane %v2186_v27, 7 }
 0x4fa   :  { %v2172_v13 = vpack.c.bf16 %v2164_v17, %v2164_v17  ;;  %v2195_v40 = vsel %vm888_vm3, %v2185_v57, %v2194_v47 }
 0x4fb   :  { %v2173_v48 = vpack.c.bf16 %v2165_v59, %v2165_v59  ;;  %v2187_v2 = vunpack.c.l.b16 %v2171_v11  ;;  %v2197_v34 = vsel %vm891_vm4, %v2196_v52, %v2195_v40 }
 0x4fc   :  { %v2188_v46 = vunpack.c.l.b16 %v2172_v13 }
 0x4fd   :  { %v2189_v0 = vunpack.c.l.b16 %v2173_v48  ;;  %v2198_v62 = vrot.slane %v2187_v2, 6  ;;  %v7697_v2 = vld [vmem:[#allocation18_spill] sm:$0xff] }
 0x4fe   :  { %v2200_v61 = vrot.slane %v2188_v46, 5  ;;  %v7698_v46 = vld [vmem:[#allocation19_spill] sm:$0xff] }
 0x4ff   :  { %v2199_v31 = vsel %vm894_vm5, %v2198_v62, %v2197_v34  ;;  %v2202_v29 = vrot.slane %v2189_v0, 4  ;;  %v7699_v62 = vld [vmem:[#allocation20_spill] sm:$0xff] }
 0x500   :  { %v2201_v54 = vsel %vm897_vm6, %v2200_v61, %v2199_v31 }
 0x501   :  { %v2203_v42 = vsel %vm900_vm7, %v2202_v29, %v2201_v54  ;;  %v7700_v54 = vld [vmem:[#allocation22_spill] sm:$0xff] }
 0x502   :  { %v2204_v12 = vpack.c.b16 %v2203_v42, %v2203_v42 }
 0x504   :  { %2239 = vmatmul.mubr.bf16.vlgmr.msra.gmra.mrb[32].mxu0 %v2204_v12  ;;  %2280 = vmatmul.mubr.bf16.vlgmr.msra.gmra.mrb[32].mxu1 %v2204_v12  ;;  %v7701_v12 = vld [vmem:[#allocation23_spill] sm:$0xff] }
 0x505   :  { %2641 = vmatpush1.bf16.msra.mxu0 %v6563_v26  ;;  %2682 = vmatpush1.bf16.msra.mxu1 %v6566_v51  ;;  %v7687_v26 = vld [vmem:[#allocation15_spill] sm:$0xff]  ;;  %v7688_v51 = vld [vmem:[#allocation16_spill] sm:$0xff] }
 0x506   :  { %2642 = vmatprep.subr.bf16.mxu0 %v6569_v30  ;;  %2683 = vmatprep.subr.bf16.mxu1 %v6572_v43  ;;  %v7689_v30 = vld [vmem:[#allocation30_spill] sm:$0xff]  ;;  %v7690_v43 = vld [vmem:[#allocation44_spill] sm:$0xff] }
 0x507   :  { %2672 = vmatprep.mubr.bf16.mxu0 %v7602_v18  ;;  %2713 = vmatprep.mubr.bf16.mxu1 %v7602_v18 }
 0x509   :  { %2643 = vmatpush1.bf16.msra.mxu0 %v6577_v21  ;;  %2684 = vmatpush1.bf16.msra.mxu1 %v6580_v20  ;;  %v7691_v21 = vld [vmem:[#allocation45_spill] sm:$0xff]  ;;  %v7692_v20 = vld [vmem:[#allocation46_spill] sm:$0xff] }
 0x50a   :  { %2644 = vmatprep.subr.bf16.mxu0 %v6583_v3  ;;  %2685 = vmatprep.subr.bf16.mxu1 %v6586_v5  ;;  %v7693_v3 = vld [vmem:[#allocation47_spill] sm:$0xff]  ;;  %v7694_v5 = vld [vmem:[#allocation48_spill] sm:$0xff] }
 0x50d   :  { %2645 = vmatpush1.bf16.msra.mxu0 %v6589_v4  ;;  %2686 = vmatpush1.bf16.msra.mxu1 %v6592_v53  ;;  %v6794_v4 = vld [vmem:[#allocation7 + $0xc4] ss:$16 sps:$4 sm:$0xff]   ;;  %v6797_v53 = vld [vmem:[#allocation7 + $0xcc] ss:$16 sps:$4 sm:$0xff]  }
 0x50e   :  { %2646 = vmatprep.subr.bf16.mxu0 %v6595_v41  ;;  %2687 = vmatprep.subr.bf16.mxu1 %v6598_v23  ;;  %v6800_v41 = vld [vmem:[#allocation7 + $0xc0] ss:$16 sps:$4 sm:$0xff]   ;;  %v6803_v23 = vld [vmem:[#allocation7 + $0xc8] ss:$16 sps:$4 sm:$0xff]  }
 0x511   :  { %2647 = vmatpush1.bf16.msra.mxu0 %v6601_v8  ;;  %2688 = vmatpush1.bf16.msra.mxu1 %v6604_v1  ;;  %v6806_v8 = vld [vmem:[#allocation7 + $0xe4] ss:$16 sps:$4 sm:$0xff]   ;;  %v6809_v1 = vld [vmem:[#allocation7 + $0xec] ss:$16 sps:$4 sm:$0xff]  }
 0x512   :  { %2648 = vmatprep.subr.bf16.mxu0 %v7687_v26  ;;  %2689 = vmatprep.subr.bf16.mxu1 %v7688_v51 }
 0x515   :  { %2649 = vmatpush1.bf16.msra.mxu0 %v7689_v30  ;;  %2690 = vmatpush1.bf16.msra.mxu1 %v7690_v43  ;;  %v7702_v30 = vld [vmem:[#allocation24_spill] sm:$0xff] }
 0x516   :  { %2650 = vmatprep.subr.bf16.mxu0 %v7691_v21  ;;  %2691 = vmatprep.subr.bf16.mxu1 %v7692_v20 }
 0x519   :  { %2651 = vmatpush1.bf16.msra.mxu0 %v7693_v3  ;;  %2692 = vmatpush1.bf16.msra.mxu1 %v7694_v5 }
 0x51a   :  { %2652 = vmatprep.subr.bf16.mxu0 %v6794_v4  ;;  %2693 = vmatprep.subr.bf16.mxu1 %v6797_v53 }
 0x51d   :  { %2653 = vmatpush1.bf16.msra.mxu0 %v6800_v41  ;;  %2694 = vmatpush1.bf16.msra.mxu1 %v6803_v23 }
 0x51e   :  { %2654 = vmatprep.subr.bf16.mxu0 %v6806_v8  ;;  %2695 = vmatprep.subr.bf16.mxu1 %v6809_v1 }
 0x521   :  { %2655 = vmatpush1.bf16.msra.mxu0 %v6812_v63  ;;  %2696 = vmatpush1.bf16.msra.mxu1 %v6815_v28 }
 0x522   :  { %3074 = vmatprep.subr.bf16.mxu0 %v7695_v24  ;;  %3115 = vmatprep.subr.bf16.mxu1 %v7696_v44 }
 0x5d7   :  { %v2240_v32 = vpop.f32.mrb[32].mxu0  ;;  %v6820_v7 = vpop.f32.mrb[32].mxu1 }
 0x5d8   :  { %v2292_v27 = vrot.slane %v2240_v32, 4  ;;  %v2296_v60 = vrot.slane %v2240_v32, 5  ;;  %v2300_v37 = vrot.slane %v2240_v32, 6  ;;  %v2304_v17 = vrot.slane %v2240_v32, 7  ;;  %v6822_v57 = vpop.f32.mrb[33].mxu0  ;;  %v6824_v36 = vpop.f32.mrb[33].mxu1 }
 0x5d9   :  { %v2308_v59 = vrot.slane %v2240_v32, 1  ;;  %v2312_v11 = vrot.slane %v2240_v32, 2  ;;  %v2316_v47 = vrot.slane %v2240_v32, 3  ;;  %v2368_v52 = vadd.f32 %v2240_v32, %v5951_v35  ;;  %v2244_v13 = vpop.f32.mrb[34].mxu0  ;;  %v2285_v40 = vpop.f32.mrb[34].mxu1 }
 0x5da   :  { %v2352_v48 = vadd.f32 %v2292_v27, %v7627_v50  ;;  %v2356_v34 = vadd.f32 %v2296_v60, %v7697_v2  ;;  %v2360_v0 = vadd.f32 %v2300_v37, %v7698_v46  ;;  %v2364_v61 = vadd.f32 %v2304_v17, %v7699_v62  ;;  %v2245_v31 = vpop.f32.mrb[35].mxu0  ;;  %v2286_v29 = vpop.f32.mrb[35].mxu1  ;;  %v7705_v13 = vld [vmem:[#allocation28_spill] sm:$0xff] }
 0x5db   :  { %v2372_v42 = vadd.f32 %v2308_v59, %v7700_v54  ;;  %v2376_v26 = vadd.f32 %v2312_v11, %v7701_v12  ;;  %v4268_v51 = vmul.f32 -1.442695, %v2368_v52  ;;  %v2380_v43 = vadd.f32 %v2316_v47, %v7702_v30  ;;  %v7703_v59 = vld [vmem:[#allocation25_spill] sm:$0xff]  ;;  %v7704_v47 = vld [vmem:[#allocation27_spill] sm:$0xff] }
 0x5dc   :  { %v4264_v21 = vmul.f32 -1.442695, %v2352_v48  ;;  %v4265_v20 = vmul.f32 -1.442695, %v2356_v34  ;;  %v4266_v3 = vmul.f32 -1.442695, %v2360_v0 }
 0x5dd   :  { %v4267_v5 = vmul.f32 -1.442695, %v2364_v61  ;;  %4980 = vpow2.f32 %v4268_v51  ;;  %v4269_v24 = vmul.f32 -1.442695, %v2372_v42  ;;  %v2294_v44 = vrot.slane %v6820_v7, 4  ;;  %v7706_v48 = vld [vmem:[#allocation31_spill] sm:$0xff] }
 0x5de   :  { %4982 = vpow2.f32 %v4264_v21  ;;  %v2298_v32 = vrot.slane %v6820_v7, 5  ;;  %v4270_v27 = vmul.f32 -1.442695, %v2376_v26  ;;  %v2302_v60 = vrot.slane %v6820_v7, 6  ;;  %v7707_v0 = vld [vmem:[#allocation29_spill] sm:$0xff] }
 0x5df   :  { %4984 = vpow2.f32 %v4265_v20  ;;  %v4271_v37 = vmul.f32 -1.442695, %v2380_v43  ;;  %v2306_v17 = vrot.slane %v6820_v7, 7  ;;  %v2354_v11 = vadd.f32 %v2294_v44, %v7703_v59 }
 0x5e0   :  { %4986 = vpow2.f32 %v4266_v3  ;;  %v2358_v52 = vadd.f32 %v2298_v32, %v7704_v47  ;;  %v2362_v40 = vadd.f32 %v2302_v60, %v7705_v13  ;;  %v2370_v61 = vadd.f32 %v6820_v7, %v7707_v0  ;;  %v7711_v0 = vld [vmem:[#allocation32_spill] sm:$0xff] }
 0x5e1   :  { %4988 = vpow2.f32 %v4267_v5  ;;  %v2366_v34 = vadd.f32 %v2306_v17, %v7706_v48  ;;  %v2310_v26 = vrot.slane %v6820_v7, 1  ;;  %v2314_v21 = vrot.slane %v6820_v7, 2  ;;  %v7716_v47 = vld [vmem:[#allocation40_spill] sm:$0xff] }
 0x5e2   :  { %4990 = vpow2.f32 %v4269_v24  ;;  %v2293_v20 = vrot.slane %v6822_v57, 4  ;;  %v2297_v24 = vrot.slane %v6822_v57, 5  ;;  %v2301_v60 = vrot.slane %v6822_v57, 6 }
 0x5e3   :  { %4992 = vpow2.f32 %v4270_v27  ;;  %v2318_v27 = vrot.slane %v6820_v7, 3  ;;  %v2309_v7 = vrot.slane %v6822_v57, 1 }
 0x5e4   :  { %4994 = vpow2.f32 %v4271_v37  ;;  %v2357_v48 = vadd.f32 %v2297_v24, %v7711_v0 }
 0x5e5   :  { %4996 = vtanh.f32 %v2354_v11  ;;  %v7708_v11 = vld [vmem:[#allocation38_spill] sm:$0xff] }
 0x5e6   :  { %4998 = vtanh.f32 %v2358_v52  ;;  %v2374_v52 = vadd.f32 %v2310_v26, %v7708_v11  ;;  %v2313_v26 = vrot.slane %v6822_v57, 2  ;;  %v7712_v11 = vld [vmem:[#allocation34_spill] sm:$0xff] }
 0x5e7   :  { %v4981_v31 = vpop.eup %4980  ;;  %5000 = vtanh.f32 %v2362_v40  ;;  %v2305_v40 = vrot.slane %v6822_v57, 7  ;;  %v2361_v13 = vadd.f32 %v2301_v60, %v7712_v11  ;;  %v2373_v60 = vadd.f32 %v2309_v7, %v7716_v47 }
 0x5e8   :  { %v4983_v29 = vpop.eup %4982  ;;  %v2412_v42 = vadd.f32 1.0, %v4981_v31  ;;  %5002 = vtanh.f32 %v2366_v34  ;;  %v7709_v31 = vld [vmem:[#allocation39_spill] sm:$0xff]  ;;  %v4273_v11 = vmul.f32 -1.442695, %v2357_v48 }
 0x5e9   :  { %v4985_v51 = vpop.eup %4984  ;;  %v2408_v43 = vadd.f32 1.0, %v4983_v29  ;;  %5004 = vtanh.f32 %v2370_v61  ;;  %v2378_v29 = vadd.f32 %v2314_v21, %v7709_v31  ;;  %v7714_v31 = vld [vmem:[#allocation36_spill] sm:$0xff] }
 0x5ea   :  { %v4987_v3 = vpop.eup %4986  ;;  %v2409_v5 = vadd.f32 1.0, %v4985_v51  ;;  %5006 = vrcp.f32 %v2412_v42  ;;  %v7710_v42 = vld [vmem:[#allocation26_spill] sm:$0xff] }
 0x5eb   :  { %v4989_v44 = vpop.eup %4988  ;;  %v2410_v32 = vadd.f32 1.0, %v4987_v3  ;;  %5008 = vrcp.f32 %v2408_v43  ;;  %v2353_v51 = vadd.f32 %v2293_v20, %v7710_v42  ;;  %v2317_v20 = vrot.slane %v6822_v57, 3  ;;  %v7715_v42 = vld [vmem:[#allocation37_spill] sm:$0xff] }
 0x5ec   :  { %v4991_v37 = vpop.eup %4990  ;;  %v2411_v17 = vadd.f32 1.0, %v4989_v44  ;;  %5010 = vrcp.f32 %v2409_v5  ;;  %v2369_v24 = vadd.f32 %v6822_v57, %v7715_v42  ;;  %v2307_v42 = vrot.slane %v6824_v36, 7 }
 0x5ed   :  { %v4993_v34 = vpop.eup %4992  ;;  %v2413_v61 = vadd.f32 1.0, %v4991_v37  ;;  %5012 = vrcp.f32 %v2410_v32  ;;  %v7713_v32 = vld [vmem:[#allocation42_spill] sm:$0xff]  ;;  %v4272_v0 = vmul.f32 -1.442695, %v2353_v51  ;;  %v2381_v57 = vadd.f32 %v2317_v20, %v7629_v10 }
 0x5ee   :  { %v4995_v3 = vpop.eup %4994  ;;  %v2414_v43 = vadd.f32 1.0, %v4993_v34  ;;  %5014 = vrcp.f32 %v2411_v17  ;;  %v2382_v21 = vadd.f32 %v2318_v27, %v7713_v32  ;;  %v2365_v34 = vadd.f32 %v2305_v40, %v7714_v31  ;;  %v7717_v32 = vld [vmem:[#allocation41_spill] sm:$0xff] }
 0x5ef   :  { %v4997_v44 = vpop.eup %4996  ;;  %v2415_v5 = vadd.f32 1.0, %v4995_v3  ;;  %5016 = vrcp.f32 %v2413_v61  ;;  %v2295_v61 = vrot.slane %v6824_v36, 4  ;;  %v2377_v59 = vadd.f32 %v2313_v26, %v7717_v32 }
 0x5f0   :  { %v4999_v37 = vpop.eup %4998  ;;  %5018 = vrcp.f32 %v2414_v43  ;;  %v2299_v43 = vrot.slane %v6824_v36, 5  ;;  %v4274_v40 = vmul.f32 -1.442695, %v2361_v13  ;;  %v4275_v51 = vmul.f32 -1.442695, %v2365_v34 }
 0x5f1   :  { %v5001_v17 = vpop.eup %5000  ;;  %5020 = vrcp.f32 %v2415_v5  ;;  %v2303_v5 = vrot.slane %v6824_v36, 6  ;;  %v4276_v48 = vmul.f32 -1.442695, %v2369_v24  ;;  %v2355_v7 = vadd.f32 %v2295_v61, %v7630_v56 }
 0x5f2   :  { %v5003_v3 = vpop.eup %5002  ;;  %5022 = vtanh.f32 %v2374_v52  ;;  %v4277_v13 = vmul.f32 -1.442695, %v2373_v60  ;;  %v2359_v26 = vadd.f32 %v2299_v43, %v7661_v45  ;;  %v4278_v20 = vmul.f32 -1.442695, %v2377_v59 }
 0x5f3   :  { %v5005_v27 = vpop.eup %5004  ;;  %5024 = vtanh.f32 %v2378_v29  ;;  %v2363_v34 = vadd.f32 %v2303_v5, %v7686_v9  ;;  %v2367_v24 = vadd.f32 %v2307_v42, %v6034_v58 }
 0x5f4   :  { %v5007_v31 = vpop.eup %5006  ;;  %5026 = vtanh.f32 %v2382_v21  ;;  %v4281_v59 = vmul.f32 -1.442695, %v2359_v26 }
 0x5f5   :  { %v5009_v52 = vpop.eup %5008  ;;  %v6870_v30 = vmul.f32 %v5007_v31, %v5005_v27  ;;  %5028 = vpow2.f32 %v4272_v0  ;;  %v4279_v0 = vmul.f32 -1.442695, %v2381_v57  ;;  %v4283_v5 = vmul.f32 -1.442695, %v2367_v24 }
 0x5f6   :  { %v5011_v29 = vpop.eup %5010  ;;  %v6873_v47 = vmul.f32 %v5009_v52, %v4997_v44  ;;  %5030 = vpow2.f32 %v4273_v11  ;;  %v2371_v11 = vadd.f32 %v6824_v36, %v6048_v22  ;;  %v2311_v52 = vrot.slane %v6824_v36, 1 }
 0x5f7   :  { %v5013_v21 = vpop.eup %5012  ;;  %v6876_v32 = vmul.f32 %v5011_v29, %v4999_v37  ;;  %5032 = vpow2.f32 %v4274_v40  ;;  %v4280_v37 = vmul.f32 -1.442695, %v2355_v7  ;;  %v4282_v40 = vmul.f32 -1.442695, %v2363_v34 }
 0x5f8   :  { %v5015_v31 = vpop.eup %5014  ;;  %v6879_v27 = vmul.f32 %v5013_v21, %v5001_v17  ;;  %5034 = vpow2.f32 %v4275_v51  ;;  %v4284_v42 = vmul.f32 -1.442695, %v2371_v11  ;;  %v2315_v29 = vrot.slane %v6824_v36, 2 }
 0x5f9   :  { %v5017_v44 = vpop.eup %5016  ;;  %v6882_v61 = vmul.f32 %v5015_v31, %v5003_v3  ;;  %5036 = vpow2.f32 %v4276_v48 }
 0x5fa   :  { %v5019_v60 = vpop.eup %5018  ;;  %5038 = vpow2.f32 %v4277_v13 }
 0x5fb   :  { %v5021_v43 = vpop.eup %5020  ;;  %5040 = vpow2.f32 %v4278_v20  ;;  %v2319_v20 = vrot.slane %v6824_v36, 3 }
 0x5fc   :  { %v5023_v17 = vpop.eup %5022  ;;  %5042 = vpow2.f32 %v4279_v0 }
 0x5fd   :  { %v5025_v57 = vpop.eup %5024  ;;  %5044 = vpow2.f32 %v4280_v37  ;;  %v6886_v51 = vmul.f32 %v5023_v17, %v5017_v44  ;;  %v2375_v44 = vadd.f32 %v2311_v52, %v6115_v39 }
 0x5fe   :  { %v5027_v3 = vpop.eup %5026  ;;  %5046 = vpow2.f32 %v4281_v59  ;;  %v6889_v48 = vmul.f32 %v5025_v57, %v5019_v60  ;;  %v2379_v60 = vadd.f32 %v2315_v29, %v6122_v25 }
 0x5ff   :  { %v5029_v7 = vpop.eup %5028  ;;  %5048 = vpow2.f32 %v4282_v40  ;;  %v6892_v13 = vmul.f32 %v5027_v3, %v5021_v43  ;;  %v2383_v40 = vadd.f32 %v2319_v20, %v6129_v14 }
 0x600   :  { %v5031_v26 = vpop.eup %5030  ;;  %v2456_v21 = vadd.f32 1.0, %v5029_v7  ;;  %5050 = vpow2.f32 %v4283_v5  ;;  %v4286_v52 = vmul.f32 -1.442695, %v2379_v60 }
 0x601   :  { %v5033_v34 = vpop.eup %5032  ;;  %v2457_v31 = vadd.f32 1.0, %v5031_v26  ;;  %5052 = vpow2.f32 %v4284_v42  ;;  %v4285_v42 = vmul.f32 -1.442695, %v2375_v44  ;;  %v2545_v44 = vrot.slane %v6733_v6, 7 }
 0x602   :  { %v5035_v0 = vpop.eup %5034  ;;  %v2458_v24 = vadd.f32 1.0, %v5033_v34  ;;  %5054 = vrcp.f32 %v2456_v21  ;;  %v4287_v21 = vmul.f32 -1.442695, %v2383_v40 }
 0x603   :  { %v5037_v11 = vpop.eup %5036  ;;  %v2459_v37 = vadd.f32 1.0, %v5035_v0  ;;  %5056 = vrcp.f32 %v2457_v31 }
 0x604   :  { %v5039_v59 = vpop.eup %5038  ;;  %v2460_v43 = vadd.f32 1.0, %v5037_v11  ;;  %5058 = vrcp.f32 %v2458_v24  ;;  %v2544_v24 = vrot.slane %v6729_v16, 7  ;;  %v2548_v16 = vrot.slane %v6745_v55, 7 }
 0x605   :  { %v5041_v36 = vpop.eup %5040  ;;  %v2461_v17 = vadd.f32 1.0, %v5039_v59  ;;  %5060 = vrcp.f32 %v2459_v37 }
 0x606   :  { %v5043_v5 = vpop.eup %5042  ;;  %v2462_v57 = vadd.f32 1.0, %v5041_v36  ;;  %5062 = vrcp.f32 %v2460_v43  ;;  %v2546_v43 = vrot.slane %v6737_v15, 7 }
 0x607   :  { %v5045_v3 = vpop.eup %5044  ;;  %v2463_v7 = vadd.f32 1.0, %v5043_v5  ;;  %5064 = vrcp.f32 %v2461_v17  ;;  %v2547_v5 = vrot.slane %v6741_v49, 7  ;;  %v2550_v49 = vrot.slane %v6753_v19, 7 }
 0x608   :  { %v5047_v26 = vpop.eup %5046  ;;  %5066 = vrcp.f32 %v2462_v57  ;;  %v2512_v34 = vadd.f32 1.0, %v5045_v3 }
 0x609   :  { %v5049_v29 = vpop.eup %5048  ;;  %5068 = vrcp.f32 %v2463_v7  ;;  %v2513_v20 = vadd.f32 1.0, %v5047_v26 }
 0x60a   :  { %v5051_v31 = vpop.eup %5050  ;;  %5070 = vpow2.f32 %v4285_v42  ;;  %v2514_v11 = vadd.f32 1.0, %v5049_v29 }
 0x60b   :  { %v5053_v0 = vpop.eup %5052  ;;  %5072 = vpow2.f32 %v4286_v52  ;;  %v2515_v59 = vadd.f32 1.0, %v5051_v31  ;;  %v2549_v52 = vrot.slane %v6749_v38, 7 }
 0x60c   :  { %v5055_v37 = vpop.eup %5054  ;;  %5074 = vpow2.f32 %v4287_v21  ;;  %v2516_v36 = vadd.f32 1.0, %v5053_v0 }
 0x60d   :  { %v5057_v60 = vpop.eup %5056  ;;  %v2560_v40 = vmul.f32 %v5055_v37, %v2544_v24  ;;  %5076 = vrcp.f32 %v2512_v34 }
 0x60e   :  { %v5059_v17 = vpop.eup %5058  ;;  %v2561_v57 = vmul.f32 %v5057_v60, %v2545_v44  ;;  %5078 = vrcp.f32 %v2513_v20 }
 0x60f   :  { %v5061_v42 = vpop.eup %5060  ;;  %v2562_v3 = vmul.f32 %v5059_v17, %v2546_v43  ;;  %v6904_v7 = vadd.f32 %v6873_v47, %v2560_v40  ;;  %5080 = vrcp.f32 %v2514_v11  ;;  %v2551_v47 = vrot.slane %v6757_v33, 7 }
 0x610   :  { %v5063_v6 = vpop.eup %5062  ;;  %v2563_v15 = vmul.f32 %v5061_v42, %v2547_v5  ;;  %v6908_v26 = vadd.f32 %v6876_v32, %v2561_v57  ;;  %5082 = vrcp.f32 %v2515_v59 }
 0x611   :  { %v5065_v21 = vpop.eup %5064  ;;  %5084 = vrcp.f32 %v2516_v36  ;;  %v2564_v29 = vmul.f32 %v5063_v6, %v2548_v16  ;;  %v6912_v55 = vadd.f32 %v6879_v27, %v2562_v3 }
 0x612   :  { %v5067_v34 = vpop.eup %5066  ;;  %v2565_v31 = vmul.f32 %v5065_v21, %v2549_v52  ;;  %v6916_v20 = vadd.f32 %v6882_v61, %v2563_v15  ;;  %5086 = vtanh.f32 %v6904_v7 }
 0x613   :  { %v5069_v38 = vpop.eup %5068  ;;  %v2566_v32 = vmul.f32 %v5067_v34, %v2550_v49  ;;  %v6920_v0 = vadd.f32 %v6870_v30, %v2564_v29  ;;  %5088 = vtanh.f32 %v6908_v26 }
 0x614   :  { %v5071_v19 = vpop.eup %5070  ;;  %v2567_v24 = vmul.f32 %v5069_v38, %v2551_v47  ;;  %v6924_v27 = vadd.f32 %v6886_v51, %v2565_v31  ;;  %5090 = vtanh.f32 %v6912_v55 }
 0x615   :  { %v5073_v33 = vpop.eup %5072  ;;  %v2517_v11 = vadd.f32 1.0, %v5071_v19  ;;  %v6928_v61 = vadd.f32 %v6889_v48, %v2566_v32  ;;  %5092 = vtanh.f32 %v6916_v20 }
 0x616   :  { %v5075_v37 = vpop.eup %5074  ;;  %v2518_v44 = vadd.f32 1.0, %v5073_v33  ;;  %v6932_v30 = vadd.f32 %v6892_v13, %v2567_v24  ;;  %5094 = vtanh.f32 %v6920_v0 }
 0x617   :  { %v5077_v59 = vpop.eup %5076  ;;  %5096 = vrcp.f32 %v2517_v11  ;;  %v2519_v51 = vadd.f32 1.0, %v5075_v37 }
 0x618   :  { %v5079_v60 = vpop.eup %5078  ;;  %5098 = vrcp.f32 %v2518_v44 }
 0x619   :  { %v5081_v43 = vpop.eup %5080  ;;  %5100 = vrcp.f32 %v2519_v51 }
 0x61a   :  { %v5083_v40 = vpop.eup %5082  ;;  %5102 = vtanh.f32 %v6924_v27 }
 0x61b   :  { %v5085_v48 = vpop.eup %5084  ;;  %5104 = vtanh.f32 %v6928_v61 }
 0x61c   :  { %v5087_v36 = vpop.eup %5086  ;;  %5106 = vtanh.f32 %v6932_v30 }
 0x61d   :  { %v5089_v13 = vpop.eup %5088  ;;  %v2592_v17 = vmul.f32 %v5087_v36, %v5077_v59 }
 0x61e   :  { %v5091_v5 = vpop.eup %5090  ;;  %v2593_v57 = vmul.f32 %v5089_v13, %v5079_v60 }
 0x61f   :  { %v5093_v42 = vpop.eup %5092  ;;  %v2594_v16 = vmul.f32 %v5091_v5, %v5081_v43  ;;  %v2600_v3 = vpack.c.bf16 %v2592_v17, %v2592_v17 }
 0x620   :  { %v5095_v6 = vpop.eup %5094  ;;  %v2595_v52 = vmul.f32 %v5093_v42, %v5083_v40  ;;  %v2601_v15 = vpack.c.bf16 %v2593_v57, %v2593_v57 }
 0x621   :  { %v5097_v21 = vpop.eup %5096  ;;  %v2596_v49 = vmul.f32 %v5095_v6, %v5085_v48  ;;  %v2602_v29 = vpack.c.bf16 %v2594_v16, %v2594_v16  ;;  %v2616_v34 = vunpack.c.l.b16 %v2600_v3 }
 0x622   :  { %v5099_v47 = vpop.eup %5098  ;;  %v2603_v31 = vpack.c.bf16 %v2595_v52, %v2595_v52  ;;  %v2617_v38 = vunpack.c.l.b16 %v2601_v15 }
 0x623   :  { %v5101_v32 = vpop.eup %5100  ;;  %v2604_v19 = vpack.c.bf16 %v2596_v49, %v2596_v49  ;;  %v2618_v24 = vunpack.c.l.b16 %v2602_v29  ;;  %v2624_v33 = vrot.slane %v2616_v34, 4 }
 0x624   :  { %v5103_v11 = vpop.eup %5102  ;;  %v2619_v37 = vunpack.c.l.b16 %v2603_v31  ;;  %v2625_v44 = vrot.slane %v2617_v38, 3 }
 0x625   :  { %v5105_v59 = vpop.eup %5104  ;;  %v2597_v51 = vmul.f32 %v5103_v11, %v5097_v21  ;;  %v2627_v60 = vrot.slane %v2618_v24, 2  ;;  %v2620_v5 = vunpack.c.l.b16 %v2604_v19  ;;  %v6945_v19 = vld [vmem:[#allocation7] ss:$16 sps:$4 sm:$0xff]   ;;  %v6948_v24 = vld [vmem:[#allocation7 + $0x8] ss:$16 sps:$4 sm:$0xff]  }
 0x626   :  { %v5107_v43 = vpop.eup %5106  ;;  %v2598_v40 = vmul.f32 %v5105_v59, %v5099_v47  ;;  %v2626_v36 = vsel %vm882_vm1, %v2625_v44, %v2624_v33  ;;  %v2629_v48 = vrot.slane %v2619_v37, 1  ;;  %v6951_v33 = vld [vmem:[#allocation7 + $0x24] ss:$16 sps:$4 sm:$0xff]   ;;  %v6954_v11 = vld [vmem:[#allocation7 + $0x2c] ss:$16 sps:$4 sm:$0xff]  }
 0x627   :  { %v2599_v13 = vmul.f32 %v5107_v43, %v5101_v32  ;;  %v2605_v17 = vpack.c.bf16 %v2597_v51, %v2597_v51  ;;  %v2628_v57 = vsel %vm885_vm2, %v2627_v60, %v2626_v36  ;;  %v6959_v37 = vld [vmem:[#allocation7 + $0x20] ss:$16 sps:$4 sm:$0xff]   ;;  %v6962_v44 = vld [vmem:[#allocation7 + $0x28] ss:$16 sps:$4 sm:$0xff]   ;;  %v6965_v59 = vld [vmem:[#allocation7 + $0x44] ss:$16 sps:$4 sm:$0xff]  }
 0x628   :  { %v2606_v42 = vpack.c.bf16 %v2598_v40, %v2598_v40  ;;  %v2630_v16 = vsel %vm888_vm3, %v2629_v48, %v2628_v57  ;;  %v6968_v51 = vld [vmem:[#allocation7 + $0x4c] ss:$16 sps:$4 sm:$0xff]   ;;  %v6971_v60 = vld [vmem:[#allocation7 + $0x40] ss:$16 sps:$4 sm:$0xff]   ;;  %v6974_v43 = vld [vmem:[#allocation7 + $0x48] ss:$16 sps:$4 sm:$0xff]  }
 0x629   :  { %v2607_v3 = vpack.c.bf16 %v2599_v13, %v2599_v13  ;;  %v2621_v6 = vunpack.c.l.b16 %v2605_v17  ;;  %v2631_v52 = vsel %vm891_vm4, %v2620_v5, %v2630_v16  ;;  %v6977_v40 = vld [vmem:[#allocation7 + $0x64] ss:$16 sps:$4 sm:$0xff]   ;;  %v6980_v36 = vld [vmem:[#allocation7 + $0x6c] ss:$16 sps:$4 sm:$0xff]   ;;  %v6983_v48 = vld [vmem:[#allocation7 + $0x60] ss:$16 sps:$4 sm:$0xff]  }
 0x62a   :  { %v2622_v15 = vunpack.c.l.b16 %v2606_v42  ;;  %v6986_v13 = vld [vmem:[#allocation7 + $0x68] ss:$16 sps:$4 sm:$0xff]   ;;  %v6989_v17 = vld [vmem:[#allocation7 + $0x84] ss:$16 sps:$4 sm:$0xff]   ;;  %v6992_v5 = vld [vmem:[#allocation7 + $0x8c] ss:$16 sps:$4 sm:$0xff]  }
 0x62b   :  { %v2623_v21 = vunpack.c.l.b16 %v2607_v3  ;;  %v2632_v49 = vrot.slane %v2621_v6, 7  ;;  %7718 = vst [vmem:[#allocation51_spill] sm:$0xff] %v6989_v17  ;;  %7719 = vst [vmem:[#allocation52_spill] sm:$0xff] %v6992_v5  ;;  %v6995_v57 = vld [vmem:[#allocation7 + $0x80] ss:$16 sps:$4 sm:$0xff]  }
 0x62c   :  { %v2634_v29 = vrot.slane %v2622_v15, 6  ;;  %7720 = vst [vmem:[#allocation53_spill] sm:$0xff] %v6995_v57  ;;  %v6998_v42 = vld [vmem:[#allocation7 + $0x88] ss:$16 sps:$4 sm:$0xff]   ;;  %v7001_v16 = vld [vmem:[#allocation7 + $0xa4] ss:$16 sps:$4 sm:$0xff]  }
 0x62d   :  { %v2633_v34 = vsel %vm894_vm5, %v2632_v49, %v2631_v52  ;;  %v2636_v47 = vrot.slane %v2623_v21, 5  ;;  %7721 = vst [vmem:[#allocation54_spill] sm:$0xff] %v6998_v42  ;;  %7722 = vst [vmem:[#allocation55_spill] sm:$0xff] %v7001_v16  ;;  %v7004_v3 = vld [vmem:[#allocation7 + $0xac] ss:$16 sps:$4 sm:$0xff]  }
 0x62e   :  { %v2635_v31 = vsel %vm897_vm6, %v2634_v29, %v2633_v34  ;;  %7723 = vst [vmem:[#allocation56_spill] sm:$0xff] %v7004_v3  ;;  %v7007_v6 = vld [vmem:[#allocation7 + $0xa0] ss:$16 sps:$4 sm:$0xff]   ;;  %v7010_v52 = vld [vmem:[#allocation7 + $0xa8] ss:$16 sps:$4 sm:$0xff]  }
 0x62f   :  { %v2637_v38 = vsel %vm900_vm7, %v2636_v47, %v2635_v31  ;;  %7724 = vst [vmem:[#allocation57_spill] sm:$0xff] %v7007_v6  ;;  %7725 = vst [vmem:[#allocation58_spill] sm:$0xff] %v7010_v52  ;;  %v5578_v15 = vld [vmem:[#allocation7 + $0x4] ss:$16 sps:$4 sm:$0xff]   ;;  %v5579_v21 = vld [vmem:[#allocation7 + $0xc] ss:$16 sps:$4 sm:$0xff]  }
 0x630   :  { %v2638_v32 = vpack.c.b16 %v2637_v38, %v2637_v38 }
 0x632   :  { %2673 = vmatmul.mubr.bf16.vlgmr.msra.gmra.mrb[36].mxu0 %v2638_v32  ;;  %2714 = vmatmul.mubr.bf16.vlgmr.msra.gmra.mrb[36].mxu1 %v2638_v32 }
 0x633   :  { %3075 = vmatpush1.bf16.msra.mxu0 %v6945_v19  ;;  %3116 = vmatpush1.bf16.msra.mxu1 %v6948_v24 }
 0x634   :  { %3076 = vmatprep.subr.bf16.mxu0 %v6951_v33  ;;  %3117 = vmatprep.subr.bf16.mxu1 %v6954_v11 }
 0x635   :  { %3106 = vmatprep.mubr.bf16.mxu0 %v7602_v18  ;;  %3147 = vmatprep.mubr.bf16.mxu1 %v7602_v18 }
 0x637   :  { %3077 = vmatpush1.bf16.msra.mxu0 %v6959_v37  ;;  %3118 = vmatpush1.bf16.msra.mxu1 %v6962_v44 }
 0x638   :  { %3078 = vmatprep.subr.bf16.mxu0 %v6965_v59  ;;  %3119 = vmatprep.subr.bf16.mxu1 %v6968_v51 }
 0x63b   :  { %3079 = vmatpush1.bf16.msra.mxu0 %v6971_v60  ;;  %3120 = vmatpush1.bf16.msra.mxu1 %v6974_v43 }
 0x63c   :  { %3080 = vmatprep.subr.bf16.mxu0 %v6977_v40  ;;  %3121 = vmatprep.subr.bf16.mxu1 %v6980_v36 }
 0x63f   :  { %3081 = vmatpush1.bf16.msra.mxu0 %v6983_v48  ;;  %3122 = vmatpush1.bf16.msra.mxu1 %v6986_v13 }
 0x640   :  { %3082 = vmatprep.subr.bf16.mxu0 %v6989_v17  ;;  %3123 = vmatprep.subr.bf16.mxu1 %v6992_v5  ;;  %v7726_v5 = vld [vmem:[#allocation24_spill] sm:$0xff] }
 0x643   :  { %3083 = vmatpush1.bf16.msra.mxu0 %v6995_v57  ;;  %3124 = vmatpush1.bf16.msra.mxu1 %v6998_v42 }
 0x644   :  { %3084 = vmatprep.subr.bf16.mxu0 %v7001_v16  ;;  %3125 = vmatprep.subr.bf16.mxu1 %v7004_v3 }
 0x647   :  { %3085 = vmatpush1.bf16.msra.mxu0 %v7007_v6  ;;  %3126 = vmatpush1.bf16.msra.mxu1 %v7010_v52 }
 0x648   :  { %3086 = vmatprep.subr.bf16.mxu0 %v6794_v4  ;;  %3127 = vmatprep.subr.bf16.mxu1 %v6797_v53 }
 0x64b   :  { %3087 = vmatpush1.bf16.msra.mxu0 %v6800_v41  ;;  %3128 = vmatpush1.bf16.msra.mxu1 %v6803_v23 }
 0x64c   :  { %3088 = vmatprep.subr.bf16.mxu0 %v6806_v8  ;;  %3129 = vmatprep.subr.bf16.mxu1 %v6809_v1 }
 0x64f   :  { %3089 = vmatpush1.bf16.msra.mxu0 %v6812_v63  ;;  %3130 = vmatpush1.bf16.msra.mxu1 %v6815_v28 }
 0x650   :  { %3508 = vmatprep.subr.bf16.mxu0 %v5578_v15  ;;  %3549 = vmatprep.subr.bf16.mxu1 %v5579_v21 }
 0x705   :  { %v2674_v49 = vpop.f32.mrb[36].mxu0  ;;  %v7021_v4 = vpop.f32.mrb[36].mxu1 }
 0x706   :  { %v2726_v53 = vrot.slane %v2674_v49, 3  ;;  %v2730_v29 = vrot.slane %v2674_v49, 4  ;;  %v2734_v41 = vrot.slane %v2674_v49, 5  ;;  %v2738_v34 = vrot.slane %v2674_v49, 6  ;;  %v7023_v23 = vpop.f32.mrb[37].mxu0  ;;  %v7025_v8 = vpop.f32.mrb[37].mxu1 }
 0x707   :  { %v2742_v1 = vrot.slane %v2674_v49, 7  ;;  %v2746_v47 = vrot.slane %v2674_v49, 1  ;;  %v2750_v63 = vrot.slane %v2674_v49, 2  ;;  %v2806_v28 = vadd.f32 %v2674_v49, %v7700_v54  ;;  %v2678_v31 = vpop.f32.mrb[38].mxu0  ;;  %v2719_v38 = vpop.f32.mrb[38].mxu1 }
 0x708   :  { %v2786_v32 = vadd.f32 %v2726_v53, %v7627_v50  ;;  %v2790_v15 = vadd.f32 %v2730_v29, %v7697_v2  ;;  %v2794_v21 = vadd.f32 %v2734_v41, %v7698_v46  ;;  %v2798_v52 = vadd.f32 %v2738_v34, %v7699_v62  ;;  %v2679_v6 = vpop.f32.mrb[39].mxu0  ;;  %v2720_v3 = vpop.f32.mrb[39].mxu1 }
 0x709   :  { %v2802_v16 = vadd.f32 %v2742_v1, %v5951_v35  ;;  %v2810_v42 = vadd.f32 %v2746_v47, %v7701_v12  ;;  %v4293_v57 = vmul.f32 -1.442695, %v2806_v28  ;;  %v2814_v17 = vadd.f32 %v2750_v63, %v7726_v5  ;;  %v7727_v63 = vld [vmem:[#allocation25_spill] sm:$0xff]  ;;  %v7729_v28 = vld [vmem:[#allocation28_spill] sm:$0xff]  ;;  %v7736_v35 = vld [vmem:[#allocation34_spill] sm:$0xff] }
 0x70a   :  { %v4288_v49 = vmul.f32 -1.442695, %v2786_v32  ;;  %v4289_v31 = vmul.f32 -1.442695, %v2790_v15  ;;  %v4290_v38 = vmul.f32 -1.442695, %v2794_v21 }
 0x70b   :  { %v4291_v54 = vmul.f32 -1.442695, %v2798_v52  ;;  %5108 = vpow2.f32 %v4293_v57  ;;  %v4292_v53 = vmul.f32 -1.442695, %v2802_v16  ;;  %v2728_v29 = vrot.slane %v7021_v4, 3  ;;  %v7728_v57 = vld [vmem:[#allocation27_spill] sm:$0xff] }
 0x70c   :  { %5110 = vpow2.f32 %v4288_v49  ;;  %v2732_v41 = vrot.slane %v7021_v4, 4  ;;  %v4294_v3 = vmul.f32 -1.442695, %v2810_v42  ;;  %v2736_v6 = vrot.slane %v7021_v4, 5  ;;  %v7730_v15 = vld [vmem:[#allocation31_spill] sm:$0xff]  ;;  %v7731_v21 = vld [vmem:[#allocation29_spill] sm:$0xff] }
 0x70d   :  { %5112 = vpow2.f32 %v4289_v31  ;;  %v4295_v34 = vmul.f32 -1.442695, %v2814_v17  ;;  %v2740_v1 = vrot.slane %v7021_v4, 6  ;;  %v2744_v47 = vrot.slane %v7021_v4, 7 }
 0x70e   :  { %5114 = vpow2.f32 %v4290_v38  ;;  %v2788_v52 = vadd.f32 %v2728_v29, %v7727_v63  ;;  %v2792_v16 = vadd.f32 %v2732_v41, %v7728_v57  ;;  %v2796_v32 = vadd.f32 %v2736_v6, %v7729_v28  ;;  %v7735_v63 = vld [vmem:[#allocation32_spill] sm:$0xff] }
 0x70f   :  { %5116 = vpow2.f32 %v4291_v54  ;;  %v2800_v42 = vadd.f32 %v2740_v1, %v7730_v15  ;;  %v2804_v49 = vadd.f32 %v2744_v47, %v7731_v21  ;;  %v2748_v6 = vrot.slane %v7021_v4, 1  ;;  %v7733_v15 = vld [vmem:[#allocation26_spill] sm:$0xff] }
 0x710   :  { %5118 = vpow2.f32 %v4292_v53  ;;  %v2727_v53 = vrot.slane %v7023_v23, 3  ;;  %v2743_v21 = vrot.slane %v7023_v23, 7 }
 0x711   :  { %5120 = vpow2.f32 %v4294_v3 }
 0x712   :  { %5122 = vpow2.f32 %v4295_v34  ;;  %v2731_v34 = vrot.slane %v7023_v23, 4 }
 0x713   :  { %5124 = vtanh.f32 %v2788_v52  ;;  %v7732_v52 = vld [vmem:[#allocation38_spill] sm:$0xff] }
 0x714   :  { %5126 = vtanh.f32 %v2792_v16  ;;  %v2808_v16 = vadd.f32 %v7021_v4, %v7732_v52  ;;  %v7734_v52 = vld [vmem:[#allocation39_spill] sm:$0xff]  ;;  %v2791_v5 = vadd.f32 %v2731_v34, %v7735_v63  ;;  %v7740_v63 = vld [vmem:[#allocation40_spill] sm:$0xff] }
 0x715   :  { %v5109_v17 = vpop.eup %5108  ;;  %5128 = vtanh.f32 %v2796_v32  ;;  %v2735_v32 = vrot.slane %v7023_v23, 5  ;;  %v2812_v57 = vadd.f32 %v2748_v6, %v7734_v52  ;;  %v7739_v6 = vld [vmem:[#allocation37_spill] sm:$0xff] }
 0x716   :  { %v5111_v54 = vpop.eup %5110  ;;  %v2847_v31 = vadd.f32 1.0, %v5109_v17  ;;  %5130 = vtanh.f32 %v2800_v42  ;;  %v2803_v52 = vadd.f32 %v2743_v21, %v7739_v6 }
 0x717   :  { %v5113_v38 = vpop.eup %5112  ;;  %v2842_v29 = vadd.f32 1.0, %v5111_v54  ;;  %5132 = vtanh.f32 %v2804_v49  ;;  %v2752_v49 = vrot.slane %v7021_v4, 2  ;;  %v2739_v54 = vrot.slane %v7023_v23, 6 }
 0x718   :  { %v5115_v41 = vpop.eup %5114  ;;  %v2843_v3 = vadd.f32 1.0, %v5113_v38  ;;  %5134 = vrcp.f32 %v2847_v31  ;;  %v2747_v4 = vrot.slane %v7023_v23, 1  ;;  %v2795_v62 = vadd.f32 %v2735_v32, %v7736_v35 }
 0x719   :  { %v5117_v1 = vpop.eup %5116  ;;  %v2844_v47 = vadd.f32 1.0, %v5115_v41  ;;  %5136 = vrcp.f32 %v2842_v29  ;;  %v2787_v41 = vadd.f32 %v2727_v53, %v7733_v15  ;;  %v2751_v53 = vrot.slane %v7023_v23, 2  ;;  %v7738_v15 = vld [vmem:[#allocation36_spill] sm:$0xff] }
 0x71a   :  { %v5119_v42 = vpop.eup %5118  ;;  %v2845_v17 = vadd.f32 1.0, %v5117_v1  ;;  %5138 = vrcp.f32 %v2843_v3  ;;  %v2807_v32 = vadd.f32 %v7023_v23, %v7740_v63  ;;  %v4297_v35 = vmul.f32 -1.442695, %v2791_v5 }
 0x71b   :  { %v5121_v31 = vpop.eup %5120  ;;  %v2846_v38 = vadd.f32 1.0, %v5119_v42  ;;  %5140 = vrcp.f32 %v2844_v47  ;;  %v7737_v47 = vld [vmem:[#allocation42_spill] sm:$0xff]  ;;  %v4296_v34 = vmul.f32 -1.442695, %v2787_v41  ;;  %v2815_v21 = vadd.f32 %v2751_v53, %v7629_v10 }
 0x71c   :  { %v5123_v29 = vpop.eup %5122  ;;  %v2848_v28 = vadd.f32 1.0, %v5121_v31  ;;  %5142 = vrcp.f32 %v2845_v17  ;;  %v2816_v46 = vadd.f32 %v2752_v49, %v7737_v47  ;;  %v2799_v31 = vadd.f32 %v2739_v54, %v7738_v15  ;;  %v7741_v47 = vld [vmem:[#allocation41_spill] sm:$0xff] }
 0x71d   :  { %v5125_v1 = vpop.eup %5124  ;;  %v2849_v3 = vadd.f32 1.0, %v5123_v29  ;;  %5144 = vrcp.f32 %v2846_v38  ;;  %v2729_v29 = vrot.slane %v7025_v8, 3  ;;  %v2811_v2 = vadd.f32 %v2747_v4, %v7741_v47 }
 0x71e   :  { %v5127_v42 = vpop.eup %5126  ;;  %5146 = vrcp.f32 %v2848_v28  ;;  %v2733_v28 = vrot.slane %v7025_v8, 4  ;;  %v4298_v54 = vmul.f32 -1.442695, %v2795_v62  ;;  %v4299_v41 = vmul.f32 -1.442695, %v2799_v31 }
 0x71f   :  { %v5129_v17 = vpop.eup %5128  ;;  %5148 = vrcp.f32 %v2849_v3  ;;  %v2737_v3 = vrot.slane %v7025_v8, 5  ;;  %v4300_v23 = vmul.f32 -1.442695, %v2803_v52  ;;  %v2745_v5 = vrot.slane %v7025_v8, 7 }
 0x720   :  { %v5131_v38 = vpop.eup %5130  ;;  %5150 = vtanh.f32 %v2808_v16  ;;  %v2741_v16 = vrot.slane %v7025_v8, 6  ;;  %v2789_v63 = vadd.f32 %v2729_v29, %v7630_v56  ;;  %v4301_v62 = vmul.f32 -1.442695, %v2807_v32 }
 0x721   :  { %v5133_v49 = vpop.eup %5132  ;;  %5152 = vtanh.f32 %v2812_v57  ;;  %v2793_v4 = vadd.f32 %v2733_v28, %v7661_v45  ;;  %v4302_v53 = vmul.f32 -1.442695, %v2811_v2  ;;  %v2797_v31 = vadd.f32 %v2737_v3, %v7686_v9 }
 0x722   :  { %v5135_v15 = vpop.eup %5134  ;;  %5154 = vtanh.f32 %v2816_v46  ;;  %v4303_v10 = vmul.f32 -1.442695, %v2815_v21  ;;  %v2801_v29 = vadd.f32 %v2741_v16, %v6034_v58  ;;  %v4304_v32 = vmul.f32 -1.442695, %v2789_v63 }
 0x723   :  { %v5137_v6 = vpop.eup %5136  ;;  %5156 = vpow2.f32 %v4296_v34  ;;  %v4305_v2 = vmul.f32 -1.442695, %v2793_v4 }
 0x724   :  { %v5139_v57 = vpop.eup %5138  ;;  %v7073_v50 = vmul.f32 %v5137_v6, %v5125_v1  ;;  %5158 = vpow2.f32 %v4297_v35  ;;  %v2805_v35 = vadd.f32 %v2745_v5, %v6048_v22  ;;  %v4307_v21 = vmul.f32 -1.442695, %v2801_v29 }
 0x725   :  { %v5141_v46 = vpop.eup %5140  ;;  %v7076_v47 = vmul.f32 %v5139_v57, %v5127_v42  ;;  %5160 = vpow2.f32 %v4298_v54 }
 0x726   :  { %v5143_v34 = vpop.eup %5142  ;;  %v7079_v52 = vmul.f32 %v5141_v46, %v5129_v17  ;;  %5162 = vpow2.f32 %v4299_v41  ;;  %v4306_v17 = vmul.f32 -1.442695, %v2797_v31 }
 0x727   :  { %v5145_v1 = vpop.eup %5144  ;;  %v7082_v6 = vmul.f32 %v5143_v34, %v5131_v38  ;;  %5164 = vpow2.f32 %v4300_v23  ;;  %v4308_v38 = vmul.f32 -1.442695, %v2805_v35  ;;  %v2809_v34 = vadd.f32 %v7025_v8, %v6115_v39 }
 0x728   :  { %v5147_v42 = vpop.eup %5146  ;;  %v7085_v28 = vmul.f32 %v5145_v1, %v5133_v49  ;;  %5166 = vpow2.f32 %v4301_v62  ;;  %v2749_v49 = vrot.slane %v7025_v8, 1 }
 0x729   :  { %v5149_v54 = vpop.eup %5148  ;;  %5168 = vpow2.f32 %v4302_v53 }
 0x72a   :  { %v5151_v3 = vpop.eup %5150  ;;  %5170 = vpow2.f32 %v4303_v10  ;;  %v2753_v10 = vrot.slane %v7025_v8, 2  ;;  %v2813_v35 = vadd.f32 %v2749_v49, %v6122_v25 }
 0x72b   :  { %v5153_v41 = vpop.eup %5152  ;;  %v7087_v16 = vmul.f32 %v5151_v3, %v5135_v15  ;;  %5172 = vpow2.f32 %v4304_v32 }
 0x72c   :  { %v5155_v23 = vpop.eup %5154  ;;  %5174 = vpow2.f32 %v4305_v2  ;;  %v7089_v5 = vmul.f32 %v5153_v41, %v5147_v42  ;;  %v2817_v2 = vadd.f32 %v2753_v10, %v6129_v14  ;;  %v4309_v41 = vmul.f32 -1.442695, %v2809_v34 }
 0x72d   :  { %v5157_v63 = vpop.eup %5156  ;;  %5176 = vpow2.f32 %v4306_v17  ;;  %v7092_v57 = vmul.f32 %v5155_v23, %v5149_v54  ;;  %v4310_v8 = vmul.f32 -1.442695, %v2813_v35  ;;  %v2979_v34 = vrot.slane %v6908_v26, 7 }
 0x72e   :  { %v5159_v62 = vpop.eup %5158  ;;  %v2890_v4 = vadd.f32 1.0, %v5157_v63  ;;  %5178 = vpow2.f32 %v4307_v21 }
 0x72f   :  { %v5161_v46 = vpop.eup %5160  ;;  %v2891_v15 = vadd.f32 1.0, %v5159_v62  ;;  %5180 = vpow2.f32 %v4308_v38  ;;  %v4311_v62 = vmul.f32 -1.442695, %v2817_v2 }
 0x730   :  { %v5163_v53 = vpop.eup %5162  ;;  %v2892_v31 = vadd.f32 1.0, %v5161_v46  ;;  %5182 = vrcp.f32 %v2890_v4 }
 0x731   :  { %v5165_v29 = vpop.eup %5164  ;;  %v2893_v1 = vadd.f32 1.0, %v5163_v53  ;;  %5184 = vrcp.f32 %v2891_v15  ;;  %v2978_v53 = vrot.slane %v6904_v7, 7  ;;  %v2982_v7 = vrot.slane %v6920_v0, 7 }
 0x732   :  { %v5167_v32 = vpop.eup %5166  ;;  %v2894_v42 = vadd.f32 1.0, %v5165_v29  ;;  %5186 = vrcp.f32 %v2892_v31 }
 0x733   :  { %v5169_v54 = vpop.eup %5168  ;;  %v2895_v17 = vadd.f32 1.0, %v5167_v32  ;;  %5188 = vrcp.f32 %v2893_v1  ;;  %v2980_v32 = vrot.slane %v6912_v55, 7 }
 0x734   :  { %v5171_v3 = vpop.eup %5170  ;;  %v2896_v21 = vadd.f32 1.0, %v5169_v54  ;;  %5190 = vrcp.f32 %v2894_v42 }
 0x735   :  { %v5173_v38 = vpop.eup %5172  ;;  %v2897_v23 = vadd.f32 1.0, %v5171_v3  ;;  %5192 = vrcp.f32 %v2895_v17  ;;  %v2981_v17 = vrot.slane %v6916_v20, 7  ;;  %v2984_v20 = vrot.slane %v6928_v61, 7 }
 0x736   :  { %v5175_v63 = vpop.eup %5174  ;;  %5194 = vrcp.f32 %v2896_v21  ;;  %v2946_v4 = vadd.f32 1.0, %v5173_v38 }
 0x737   :  { %v5177_v49 = vpop.eup %5176  ;;  %5196 = vrcp.f32 %v2897_v23  ;;  %v2947_v10 = vadd.f32 1.0, %v5175_v63  ;;  %v2983_v23 = vrot.slane %v6924_v27, 7 }
 0x738   :  { %v5179_v46 = vpop.eup %5178  ;;  %5198 = vpow2.f32 %v4309_v41  ;;  %v2948_v31 = vadd.f32 1.0, %v5177_v49 }
 0x739   :  { %v5181_v15 = vpop.eup %5180  ;;  %5200 = vpow2.f32 %v4310_v8  ;;  %v2949_v1 = vadd.f32 1.0, %v5179_v46 }
 0x73a   :  { %v5183_v29 = vpop.eup %5182  ;;  %5202 = vpow2.f32 %v4311_v62  ;;  %v2950_v2 = vadd.f32 1.0, %v5181_v15 }
 0x73b   :  { %v5185_v35 = vpop.eup %5184  ;;  %v2994_v42 = vmul.f32 %v5183_v29, %v2978_v53  ;;  %5204 = vrcp.f32 %v2946_v4 }
 0x73c   :  { %v5187_v54 = vpop.eup %5186  ;;  %v2995_v3 = vmul.f32 %v5185_v35, %v2979_v34  ;;  %5206 = vrcp.f32 %v2947_v10 }
 0x73d   :  { %v5189_v21 = vpop.eup %5188  ;;  %v2996_v41 = vmul.f32 %v5187_v54, %v2980_v32  ;;  %v7105_v38 = vadd.f32 %v7073_v50, %v2994_v42  ;;  %5208 = vrcp.f32 %v2948_v31  ;;  %v2985_v50 = vrot.slane %v6932_v30, 7 }
 0x73e   :  { %v5191_v26 = vpop.eup %5190  ;;  %v2997_v55 = vmul.f32 %v5189_v21, %v2981_v17  ;;  %v7109_v8 = vadd.f32 %v7076_v47, %v2995_v3  ;;  %5210 = vrcp.f32 %v2949_v1 }
 0x73f   :  { %v5193_v63 = vpop.eup %5192  ;;  %5212 = vrcp.f32 %v2950_v2  ;;  %v2998_v62 = vmul.f32 %v5191_v26, %v2982_v7  ;;  %v7113_v0 = vadd.f32 %v7079_v52, %v2996_v41 }
 0x740   :  { %v5195_v49 = vpop.eup %5194  ;;  %v2999_v4 = vmul.f32 %v5193_v63, %v2983_v23  ;;  %v7117_v46 = vadd.f32 %v7082_v6, %v2997_v55  ;;  %5214 = vtanh.f32 %v7105_v38 }
 0x741   :  { %v5197_v27 = vpop.eup %5196  ;;  %v3000_v47 = vmul.f32 %v5195_v49, %v2984_v20  ;;  %v7121_v10 = vadd.f32 %v7085_v28, %v2998_v62  ;;  %5216 = vtanh.f32 %v7109_v8 }
 0x742   :  { %v5199_v61 = vpop.eup %5198  ;;  %v3001_v15 = vmul.f32 %v5197_v27, %v2985_v50  ;;  %v7125_v52 = vadd.f32 %v7087_v16, %v2999_v4  ;;  %5218 = vtanh.f32 %v7113_v0 }
 0x743   :  { %v5201_v30 = vpop.eup %5200  ;;  %v2951_v53 = vadd.f32 1.0, %v5199_v61  ;;  %v7129_v6 = vadd.f32 %v7089_v5, %v3000_v47  ;;  %5220 = vtanh.f32 %v7117_v46 }
 0x744   :  { %v5203_v31 = vpop.eup %5202  ;;  %v2952_v29 = vadd.f32 1.0, %v5201_v30  ;;  %v7133_v28 = vadd.f32 %v7092_v57, %v3001_v15  ;;  %5222 = vtanh.f32 %v7121_v10 }
 0x745   :  { %v5205_v34 = vpop.eup %5204  ;;  %5224 = vrcp.f32 %v2951_v53  ;;  %v2953_v16 = vadd.f32 1.0, %v5203_v31 }
 0x746   :  { %v5207_v1 = vpop.eup %5206  ;;  %5226 = vrcp.f32 %v2952_v29 }
 0x747   :  { %v5209_v35 = vpop.eup %5208  ;;  %5228 = vrcp.f32 %v2953_v16 }
 0x748   :  { %v5211_v32 = vpop.eup %5210  ;;  %5230 = vtanh.f32 %v7125_v52 }
 0x749   :  { %v5213_v5 = vpop.eup %5212  ;;  %5232 = vtanh.f32 %v7129_v6 }
 0x74a   :  { %v5215_v42 = vpop.eup %5214  ;;  %5234 = vtanh.f32 %v7133_v28 }
 0x74b   :  { %v5217_v57 = vpop.eup %5216  ;;  %v3026_v2 = vmul.f32 %v5215_v42, %v5205_v34 }
 0x74c   :  { %v5219_v54 = vpop.eup %5218  ;;  %v3027_v17 = vmul.f32 %v5217_v57, %v5207_v1 }
 0x74d   :  { %v5221_v3 = vpop.eup %5220  ;;  %v3028_v21 = vmul.f32 %v5219_v54, %v5209_v35  ;;  %v3034_v7 = vpack.c.bf16 %v3026_v2, %v3026_v2 }
 0x74e   :  { %v5223_v41 = vpop.eup %5222  ;;  %v3029_v26 = vmul.f32 %v5221_v3, %v5211_v32  ;;  %v3035_v23 = vpack.c.bf16 %v3027_v17, %v3027_v17 }
 0x74f   :  { %v5225_v55 = vpop.eup %5224  ;;  %v3030_v63 = vmul.f32 %v5223_v41, %v5213_v5  ;;  %v3036_v20 = vpack.c.bf16 %v3028_v21, %v3028_v21  ;;  %v3050_v62 = vunpack.c.l.b16 %v3034_v7 }
 0x750   :  { %v5227_v49 = vpop.eup %5226  ;;  %v3037_v50 = vpack.c.bf16 %v3029_v26, %v3029_v26  ;;  %v3051_v4 = vunpack.c.l.b16 %v3035_v23 }
 0x751   :  { %v5229_v27 = vpop.eup %5228  ;;  %v3038_v47 = vpack.c.bf16 %v3030_v63, %v3030_v63  ;;  %v3052_v61 = vunpack.c.l.b16 %v3036_v20  ;;  %v3058_v15 = vrot.slane %v3050_v62, 5 }
 0x752   :  { %v5231_v30 = vpop.eup %5230  ;;  %v3053_v53 = vunpack.c.l.b16 %v3037_v50  ;;  %v3059_v31 = vrot.slane %v3051_v4, 4 }
 0x753   :  { %v5233_v29 = vpop.eup %5232  ;;  %v3031_v34 = vmul.f32 %v5231_v30, %v5225_v55  ;;  %v3054_v16 = vunpack.c.l.b16 %v3038_v47  ;;  %v3061_v1 = vrot.slane %v3052_v61, 3  ;;  %v7170_v47 = vld [vmem:[#allocation2] sm:$0xff] }
 0x754   :  { %v5235_v35 = vpop.eup %5234  ;;  %v3032_v32 = vmul.f32 %v5233_v29, %v5227_v49  ;;  %v3060_v5 = vsel %vm882_vm1, %v3059_v31, %v3058_v15  ;;  %v3063_v42 = vrot.slane %v3053_v53, 2 }
 0x755   :  { %v3033_v57 = vmul.f32 %v5235_v35, %v5229_v27  ;;  %v3039_v2 = vpack.c.bf16 %v3031_v34, %v3031_v34  ;;  %v3062_v54 = vsel %vm885_vm2, %v3061_v1, %v3060_v5  ;;  %v3065_v17 = vrot.slane %v3054_v16, 1  ;;  %v5587_v27 = vld [vmem:[#allocation7 + $0xe8] ss:$16 sps:$4 sm:$0xff]  }
 0x756   :  { %v3040_v3 = vpack.c.bf16 %v3032_v32, %v3032_v32  ;;  %v3064_v21 = vsel %vm888_vm3, %v3063_v42, %v3062_v54 }
 0x757   :  { %v3041_v7 = vpack.c.bf16 %v3033_v57, %v3033_v57  ;;  %v3055_v41 = vunpack.c.l.b16 %v3039_v2  ;;  %v3066_v26 = vsel %vm891_vm4, %v3065_v17, %v3064_v21  ;;  %v7750_v2 = vld [vmem:[#allocation17_spill] sm:$0xff]  ;;  %v7751_v17 = vld [vmem:[#allocation18_spill] sm:$0xff]  ;;  %v7752_v21 = vld [vmem:[#allocation19_spill] sm:$0xff] }
 0x758   :  { %v3056_v23 = vunpack.c.l.b16 %v3040_v3 }
 0x759   :  { %v3057_v55 = vunpack.c.l.b16 %v3041_v7  ;;  %v3067_v63 = vsel %vm894_vm5, %v3055_v41, %v3066_v26  ;;  %v7753_v41 = vld [vmem:[#allocation20_spill] sm:$0xff] }
 0x75a   :  { %v3068_v20 = vrot.slane %v3056_v23, 7 }
 0x75b   :  { %v3070_v62 = vrot.slane %v3057_v55, 6 }
 0x75c   :  { %v3069_v49 = vsel %vm897_vm6, %v3068_v20, %v3067_v63  ;;  %v7754_v63 = vld [vmem:[#allocation21_spill] sm:$0xff] }
 0x75d   :  { %v3071_v50 = vsel %vm900_vm7, %v3070_v62, %v3069_v49  ;;  %v7755_v62 = vld [vmem:[#allocation22_spill] sm:$0xff] }
 0x75e   :  { %v3072_v4 = vpack.c.b16 %v3071_v50, %v3071_v50 }
 0x760   :  { %3107 = vmatmul.mubr.bf16.vlgmr.msra.gmra.mrb[40].mxu0 %v3072_v4  ;;  %3148 = vmatmul.mubr.bf16.vlgmr.msra.gmra.mrb[40].mxu1 %v3072_v4  ;;  %v7756_v4 = vld [vmem:[#allocation24_spill] sm:$0xff] }
 0x761   :  { %3509 = vmatpush1.bf16.msra.mxu0 %v6945_v19  ;;  %3550 = vmatpush1.bf16.msra.mxu1 %v6948_v24  ;;  %v7743_v19 = vld [vmem:[#allocation52_spill] sm:$0xff]  ;;  %v7744_v24 = vld [vmem:[#allocation53_spill] sm:$0xff] }
 0x762   :  { %3510 = vmatprep.subr.bf16.mxu0 %v6951_v33  ;;  %3551 = vmatprep.subr.bf16.mxu1 %v6954_v11  ;;  %v7745_v33 = vld [vmem:[#allocation54_spill] sm:$0xff]  ;;  %v7746_v11 = vld [vmem:[#allocation55_spill] sm:$0xff] }
 0x763   :  { %3540 = vmatprep.mubr.bf16.mxu0 %v7602_v18  ;;  %3581 = vmatprep.mubr.bf16.mxu1 %v7602_v18  ;;  %v7742_v18 = vld [vmem:[#allocation51_spill] sm:$0xff] }
 0x765   :  { %3511 = vmatpush1.bf16.msra.mxu0 %v6959_v37  ;;  %3552 = vmatpush1.bf16.msra.mxu1 %v6962_v44  ;;  %v7747_v37 = vld [vmem:[#allocation56_spill] sm:$0xff]  ;;  %v7748_v44 = vld [vmem:[#allocation57_spill] sm:$0xff] }
 0x766   :  { %3512 = vmatprep.subr.bf16.mxu0 %v6965_v59  ;;  %3553 = vmatprep.subr.bf16.mxu1 %v6968_v51  ;;  %v7749_v59 = vld [vmem:[#allocation58_spill] sm:$0xff] }
 0x767   :  { %v5580_v51 = vld [vmem:[#allocation7 + $0xc4] ss:$16 sps:$4 sm:$0xff]  }
 0x769   :  { %3513 = vmatpush1.bf16.msra.mxu0 %v6971_v60  ;;  %3554 = vmatpush1.bf16.msra.mxu1 %v6974_v43  ;;  %v5581_v60 = vld [vmem:[#allocation7 + $0xcc] ss:$16 sps:$4 sm:$0xff]   ;;  %v5582_v43 = vld [vmem:[#allocation7 + $0xc0] ss:$16 sps:$4 sm:$0xff]  }
 0x76a   :  { %3514 = vmatprep.subr.bf16.mxu0 %v6977_v40  ;;  %3555 = vmatprep.subr.bf16.mxu1 %v6980_v36  ;;  %v5583_v40 = vld [vmem:[#allocation7 + $0xc8] ss:$16 sps:$4 sm:$0xff]   ;;  %v5584_v36 = vld [vmem:[#allocation7 + $0xe4] ss:$16 sps:$4 sm:$0xff]  }
 0x76d   :  { %3515 = vmatpush1.bf16.msra.mxu0 %v6983_v48  ;;  %3556 = vmatpush1.bf16.msra.mxu1 %v6986_v13  ;;  %v5585_v48 = vld [vmem:[#allocation7 + $0xec] ss:$16 sps:$4 sm:$0xff]   ;;  %v5586_v13 = vld [vmem:[#allocation7 + $0xe0] ss:$16 sps:$4 sm:$0xff]  }
 0x76e   :  { %3516 = vmatprep.subr.bf16.mxu0 %v7742_v18  ;;  %3557 = vmatprep.subr.bf16.mxu1 %v7743_v19 }
 0x771   :  { %3517 = vmatpush1.bf16.msra.mxu0 %v7744_v24  ;;  %3558 = vmatpush1.bf16.msra.mxu1 %v7745_v33 }
 0x772   :  { %3518 = vmatprep.subr.bf16.mxu0 %v7746_v11  ;;  %3559 = vmatprep.subr.bf16.mxu1 %v7747_v37 }
 0x775   :  { %3519 = vmatpush1.bf16.msra.mxu0 %v7748_v44  ;;  %3560 = vmatpush1.bf16.msra.mxu1 %v7749_v59 }
 0x776   :  { %3520 = vmatprep.subr.bf16.mxu0 %v5580_v51  ;;  %3561 = vmatprep.subr.bf16.mxu1 %v5581_v60 }
 0x779   :  { %3521 = vmatpush1.bf16.msra.mxu0 %v5582_v43  ;;  %3562 = vmatpush1.bf16.msra.mxu1 %v5583_v40 }
 0x77a   :  { %3522 = vmatprep.subr.bf16.mxu0 %v5584_v36  ;;  %3563 = vmatprep.subr.bf16.mxu1 %v5585_v48  ;;  %v7757_v48 = vld [vmem:[#allocation25_spill] sm:$0xff] }
 0x77d   :  { %3523 = vmatpush1.bf16.msra.mxu0 %v5586_v13  ;;  %3564 = vmatpush1.bf16.msra.mxu1 %v5587_v27  ;;  %v7758_v27 = vld [vmem:[#allocation27_spill] sm:$0xff] }
 0x77e   :  { %4378 = vmatprep.subr.bf16.mxu0 %v7170_v47 }
 0x833   :  { %v3108_v61 = vpop.f32.mrb[40].mxu0  ;;  %v7173_v15 = vpop.f32.mrb[40].mxu1 }
 0x834   :  { %v3160_v30 = vrot.slane %v3108_v61, 2  ;;  %v3164_v53 = vrot.slane %v3108_v61, 3  ;;  %v3168_v31 = vrot.slane %v3108_v61, 4  ;;  %v3172_v29 = vrot.slane %v3108_v61, 5  ;;  %v7175_v34 = vpop.f32.mrb[41].mxu0  ;;  %v7177_v16 = vpop.f32.mrb[41].mxu1 }
 0x835   :  { %v3176_v1 = vrot.slane %v3108_v61, 6  ;;  %v3180_v35 = vrot.slane %v3108_v61, 7  ;;  %v3184_v32 = vrot.slane %v3108_v61, 1  ;;  %v3244_v5 = vadd.f32 %v3108_v61, %v7701_v12  ;;  %v3112_v42 = vpop.f32.mrb[42].mxu0  ;;  %v3153_v57 = vpop.f32.mrb[42].mxu1 }
 0x836   :  { %v3220_v54 = vadd.f32 %v3160_v30, %v7750_v2  ;;  %v3224_v3 = vadd.f32 %v3164_v53, %v7751_v17  ;;  %v3228_v7 = vadd.f32 %v3168_v31, %v7752_v21  ;;  %v3232_v26 = vadd.f32 %v3172_v29, %v7753_v41  ;;  %v3113_v23 = vpop.f32.mrb[43].mxu0  ;;  %v3154_v55 = vpop.f32.mrb[43].mxu1  ;;  %v7759_v30 = vld [vmem:[#allocation28_spill] sm:$0xff]  ;;  %v7760_v31 = vld [vmem:[#allocation31_spill] sm:$0xff] }
 0x837   :  { %v3236_v20 = vadd.f32 %v3176_v1, %v7754_v63  ;;  %v3240_v49 = vadd.f32 %v3180_v35, %v7755_v62  ;;  %v4318_v50 = vmul.f32 -1.442695, %v3244_v5  ;;  %v3248_v18 = vadd.f32 %v3184_v32, %v7756_v4  ;;  %v7761_v1 = vld [vmem:[#allocation29_spill] sm:$0xff] }
 0x838   :  { %v4312_v19 = vmul.f32 -1.442695, %v3220_v54  ;;  %v4313_v24 = vmul.f32 -1.442695, %v3224_v3  ;;  %v4314_v33 = vmul.f32 -1.442695, %v3228_v7 }
 0x839   :  { %v4315_v11 = vmul.f32 -1.442695, %v3232_v26  ;;  %5236 = vpow2.f32 %v4318_v50  ;;  %v4316_v37 = vmul.f32 -1.442695, %v3236_v20  ;;  %v3162_v44 = vrot.slane %v7173_v15, 2 }
 0x83a   :  { %5238 = vpow2.f32 %v4312_v19  ;;  %v3166_v59 = vrot.slane %v7173_v15, 3  ;;  %v4317_v51 = vmul.f32 -1.442695, %v3240_v49  ;;  %v3170_v60 = vrot.slane %v7173_v15, 4 }
 0x83b   :  { %5240 = vpow2.f32 %v4313_v24  ;;  %v4319_v43 = vmul.f32 -1.442695, %v3248_v18  ;;  %v3174_v40 = vrot.slane %v7173_v15, 5  ;;  %v3178_v36 = vrot.slane %v7173_v15, 6 }
 0x83c   :  { %5242 = vpow2.f32 %v4314_v33  ;;  %v3222_v13 = vadd.f32 %v3162_v44, %v7757_v48  ;;  %v3226_v61 = vadd.f32 %v3166_v59, %v7758_v27  ;;  %v3230_v53 = vadd.f32 %v3170_v60, %v7759_v30  ;;  %v7762_v33 = vld [vmem:[#allocation38_spill] sm:$0xff] }
 0x83d   :  { %5244 = vpow2.f32 %v4315_v11  ;;  %v3234_v29 = vadd.f32 %v3174_v40, %v7760_v31  ;;  %v3238_v35 = vadd.f32 %v3178_v36, %v7761_v1  ;;  %v3182_v57 = vrot.slane %v7173_v15, 7  ;;  %v7763_v60 = vld [vmem:[#allocation26_spill] sm:$0xff] }
 0x83e   :  { %5246 = vpow2.f32 %v4316_v37  ;;  %v3161_v7 = vrot.slane %v7175_v34, 2  ;;  %v3165_v55 = vrot.slane %v7175_v34, 3  ;;  %v3186_v50 = vrot.slane %v7173_v15, 1 }
 0x83f   :  { %5248 = vpow2.f32 %v4317_v51  ;;  %v3169_v18 = vrot.slane %v7175_v34, 4  ;;  %v3242_v11 = vadd.f32 %v3182_v57, %v7762_v33  ;;  %v3173_v37 = vrot.slane %v7175_v34, 5 }
 0x840   :  { %5250 = vpow2.f32 %v4319_v43  ;;  %v3177_v51 = vrot.slane %v7175_v34, 6  ;;  %v3221_v43 = vadd.f32 %v3161_v7, %v7763_v60  ;;  %v3185_v7 = vrot.slane %v7175_v34, 1 }
 0x841   :  { %5252 = vtanh.f32 %v3222_v13  ;;  %v3181_v13 = vrot.slane %v7175_v34, 7 }
 0x842   :  { %5254 = vtanh.f32 %v3226_v61  ;;  %v7764_v61 = vld [vmem:[#allocation32_spill] sm:$0xff] }
 0x843   :  { %v5237_v32 = vpop.eup %5236  ;;  %5256 = vtanh.f32 %v3230_v53  ;;  %v3225_v53 = vadd.f32 %v3165_v55, %v7764_v61 }
 0x844   :  { %v5239_v5 = vpop.eup %5238  ;;  %v3282_v42 = vadd.f32 1.0, %v5237_v32  ;;  %5258 = vtanh.f32 %v3234_v29  ;;  %v7765_v32 = vld [vmem:[#allocation39_spill] sm:$0xff] }
 0x845   :  { %v5241_v54 = vpop.eup %5240  ;;  %v3276_v3 = vadd.f32 1.0, %v5239_v5  ;;  %5260 = vtanh.f32 %v3238_v35  ;;  %v3246_v5 = vadd.f32 %v7173_v15, %v7765_v32  ;;  %v7770_v15 = vld [vmem:[#allocation40_spill] sm:$0xff] }
 0x846   :  { %v5243_v26 = vpop.eup %5242  ;;  %v3277_v23 = vadd.f32 1.0, %v5241_v54  ;;  %5262 = vrcp.f32 %v3282_v42  ;;  %v7766_v42 = vld [vmem:[#allocation34_spill] sm:$0xff] }
 0x847   :  { %v5245_v20 = vpop.eup %5244  ;;  %v3278_v49 = vadd.f32 1.0, %v5243_v26  ;;  %5264 = vrcp.f32 %v3276_v3  ;;  %v3229_v57 = vadd.f32 %v3169_v18, %v7766_v42  ;;  %v7767_v3 = vld [vmem:[#allocation42_spill] sm:$0xff]  ;;  %v4321_v18 = vmul.f32 -1.442695, %v3225_v53 }
 0x848   :  { %v5247_v19 = vpop.eup %5246  ;;  %v3279_v24 = vadd.f32 1.0, %v5245_v20  ;;  %5266 = vrcp.f32 %v3277_v23  ;;  %v3250_v26 = vadd.f32 %v3186_v50, %v7767_v3  ;;  %v7768_v23 = vld [vmem:[#allocation36_spill] sm:$0xff]  ;;  %v7771_v50 = vld [vmem:[#allocation41_spill] sm:$0xff]  ;;  %v3179_v53 = vrot.slane %v7177_v16, 6 }
 0x849   :  { %v5249_v44 = vpop.eup %5248  ;;  %v3280_v59 = vadd.f32 1.0, %v5247_v19  ;;  %5268 = vrcp.f32 %v3278_v49  ;;  %v3233_v20 = vadd.f32 %v3173_v37, %v7768_v23  ;;  %v7769_v19 = vld [vmem:[#allocation37_spill] sm:$0xff]  ;;  %v3245_v3 = vadd.f32 %v7175_v34, %v7771_v50 }
 0x84a   :  { %v5251_v40 = vpop.eup %5250  ;;  %v3281_v36 = vadd.f32 1.0, %v5249_v44  ;;  %5270 = vrcp.f32 %v3279_v24  ;;  %v3237_v55 = vadd.f32 %v3177_v51, %v7769_v19  ;;  %v4320_v24 = vmul.f32 -1.442695, %v3221_v43  ;;  %v7772_v51 = vld [vmem:[#allocation43_spill] sm:$0xff] }
 0x84b   :  { %v5253_v29 = vpop.eup %5252  ;;  %v3283_v35 = vadd.f32 1.0, %v5251_v40  ;;  %5272 = vrcp.f32 %v3280_v59  ;;  %v3163_v44 = vrot.slane %v7177_v16, 2  ;;  %v3241_v40 = vadd.f32 %v3181_v13, %v7770_v15 }
 0x84c   :  { %v5255_v54 = vpop.eup %5254  ;;  %5274 = vrcp.f32 %v3281_v36  ;;  %v3167_v36 = vrot.slane %v7177_v16, 3  ;;  %v4322_v37 = vmul.f32 -1.442695, %v3229_v57  ;;  %v3249_v43 = vadd.f32 %v3185_v7, %v7772_v51 }
 0x84d   :  { %v5257_v49 = vpop.eup %5256  ;;  %5276 = vrcp.f32 %v3283_v35  ;;  %v3171_v35 = vrot.slane %v7177_v16, 4  ;;  %v4323_v19 = vmul.f32 -1.442695, %v3233_v20  ;;  %v4324_v13 = vmul.f32 -1.442695, %v3237_v55 }
 0x84e   :  { %v5259_v59 = vpop.eup %5258  ;;  %5278 = vtanh.f32 %v3242_v11  ;;  %v3175_v11 = vrot.slane %v7177_v16, 5  ;;  %v4325_v34 = vmul.f32 -1.442695, %v3241_v40  ;;  %v3227_v57 = vadd.f32 %v3167_v36, %v7661_v45 }
 0x84f   :  { %v5261_v42 = vpop.eup %5260  ;;  %5280 = vtanh.f32 %v3246_v5  ;;  %v3223_v5 = vadd.f32 %v3163_v44, %v7630_v56  ;;  %v4326_v7 = vmul.f32 -1.442695, %v3245_v3  ;;  %v3231_v20 = vadd.f32 %v3171_v35, %v7686_v9 }
 0x850   :  { %v5263_v23 = vpop.eup %5262  ;;  %5282 = vtanh.f32 %v3250_v26  ;;  %v4327_v51 = vmul.f32 -1.442695, %v3249_v43  ;;  %v3235_v44 = vadd.f32 %v3175_v11, %v6034_v58  ;;  %v3239_v40 = vadd.f32 %v3179_v53, %v6048_v22 }
 0x851   :  { %v5265_v61 = vpop.eup %5264  ;;  %5284 = vpow2.f32 %v4320_v24  ;;  %v4329_v3 = vmul.f32 -1.442695, %v3227_v57 }
 0x852   :  { %v5267_v15 = vpop.eup %5266  ;;  %v7225_v60 = vmul.f32 %v5265_v61, %v5253_v29  ;;  %5286 = vpow2.f32 %v4321_v18  ;;  %v4328_v18 = vmul.f32 -1.442695, %v3223_v5  ;;  %v4332_v43 = vmul.f32 -1.442695, %v3239_v40 }
 0x853   :  { %v5269_v26 = vpop.eup %5268  ;;  %v7228_v50 = vmul.f32 %v5267_v15, %v5255_v54  ;;  %5288 = vpow2.f32 %v4322_v37  ;;  %v3247_v40 = vadd.f32 %v7177_v16, %v6122_v25 }
 0x854   :  { %v5271_v24 = vpop.eup %5270  ;;  %v7231_v55 = vmul.f32 %v5269_v26, %v5257_v49  ;;  %5290 = vpow2.f32 %v4323_v19  ;;  %v4330_v49 = vmul.f32 -1.442695, %v3231_v20  ;;  %v4331_v19 = vmul.f32 -1.442695, %v3235_v44 }
 0x855   :  { %v5273_v61 = vpop.eup %5272  ;;  %v7234_v29 = vmul.f32 %v5271_v24, %v5259_v59  ;;  %5292 = vpow2.f32 %v4324_v13  ;;  %v3183_v13 = vrot.slane %v7177_v16, 7 }
 0x856   :  { %v5275_v54 = vpop.eup %5274  ;;  %v7237_v15 = vmul.f32 %v5273_v61, %v5261_v42  ;;  %5294 = vpow2.f32 %v4325_v34 }
 0x857   :  { %v5277_v36 = vpop.eup %5276  ;;  %5296 = vpow2.f32 %v4326_v7  ;;  %v3243_v44 = vadd.f32 %v3183_v13, %v6115_v39  ;;  %v4334_v13 = vmul.f32 -1.442695, %v3247_v40 }
 0x858   :  { %v5279_v37 = vpop.eup %5278  ;;  %5298 = vpow2.f32 %v4327_v51  ;;  %v3187_v51 = vrot.slane %v7177_v16, 1 }
 0x859   :  { %v5281_v35 = vpop.eup %5280  ;;  %5300 = vpow2.f32 %v4328_v18  ;;  %v7239_v59 = vmul.f32 %v5279_v37, %v5275_v54 }
 0x85a   :  { %v5283_v11 = vpop.eup %5282  ;;  %5302 = vpow2.f32 %v4329_v3  ;;  %v7242_v53 = vmul.f32 %v5281_v35, %v5263_v23  ;;  %v3251_v3 = vadd.f32 %v3187_v51, %v6129_v14  ;;  %v4333_v35 = vmul.f32 -1.442695, %v3243_v44 }
 0x85b   :  { %v5285_v42 = vpop.eup %5284  ;;  %5304 = vpow2.f32 %v4330_v49  ;;  %v7244_v5 = vmul.f32 %v5283_v11, %v5277_v36  ;;  %v3413_v44 = vrot.slane %v7109_v8, 7 }
 0x85c   :  { %v5287_v34 = vpop.eup %5286  ;;  %v3324_v57 = vadd.f32 1.0, %v5285_v42  ;;  %5306 = vpow2.f32 %v4331_v19 }
 0x85d   :  { %v5289_v26 = vpop.eup %5288  ;;  %v3325_v7 = vadd.f32 1.0, %v5287_v34  ;;  %5308 = vpow2.f32 %v4332_v43  ;;  %v4335_v34 = vmul.f32 -1.442695, %v3251_v3 }
 0x85e   :  { %v5291_v20 = vpop.eup %5290  ;;  %v3326_v24 = vadd.f32 1.0, %v5289_v26  ;;  %5310 = vrcp.f32 %v3324_v57 }
 0x85f   :  { %v5293_v61 = vpop.eup %5292  ;;  %v3327_v23 = vadd.f32 1.0, %v5291_v20  ;;  %5312 = vrcp.f32 %v3325_v7  ;;  %v3412_v20 = vrot.slane %v7105_v38, 7  ;;  %v3416_v38 = vrot.slane %v7121_v10, 7 }
 0x860   :  { %v5295_v18 = vpop.eup %5294  ;;  %v3328_v54 = vadd.f32 1.0, %v5293_v61  ;;  %5314 = vrcp.f32 %v3326_v24 }
 0x861   :  { %v5297_v36 = vpop.eup %5296  ;;  %v3329_v49 = vadd.f32 1.0, %v5295_v18  ;;  %5316 = vrcp.f32 %v3327_v23  ;;  %v3414_v18 = vrot.slane %v7113_v0, 7 }
 0x862   :  { %v5299_v37 = vpop.eup %5298  ;;  %v3330_v19 = vadd.f32 1.0, %v5297_v36  ;;  %5318 = vrcp.f32 %v3328_v54 }
 0x863   :  { %v5301_v43 = vpop.eup %5300  ;;  %v3331_v11 = vadd.f32 1.0, %v5299_v37  ;;  %5320 = vrcp.f32 %v3329_v49  ;;  %v3415_v49 = vrot.slane %v7117_v46, 7  ;;  %v3418_v46 = vrot.slane %v7129_v6, 7 }
 0x864   :  { %v5303_v42 = vpop.eup %5302  ;;  %5322 = vrcp.f32 %v3330_v19  ;;  %v3380_v57 = vadd.f32 1.0, %v5301_v43 }
 0x865   :  { %v5305_v16 = vpop.eup %5304  ;;  %5324 = vrcp.f32 %v3331_v11  ;;  %v3381_v51 = vadd.f32 1.0, %v5303_v42  ;;  %v3417_v11 = vrot.slane %v7125_v52, 7 }
 0x866   :  { %v5307_v26 = vpop.eup %5306  ;;  %5326 = vpow2.f32 %v4333_v35  ;;  %v3382_v24 = vadd.f32 1.0, %v5305_v16 }
 0x867   :  { %v5309_v7 = vpop.eup %5308  ;;  %5328 = vpow2.f32 %v4334_v13  ;;  %v3383_v23 = vadd.f32 1.0, %v5307_v26 }
 0x868   :  { %v5311_v61 = vpop.eup %5310  ;;  %5330 = vpow2.f32 %v4335_v34  ;;  %v3384_v3 = vadd.f32 1.0, %v5309_v7 }
 0x869   :  { %v5313_v40 = vpop.eup %5312  ;;  %v3428_v54 = vmul.f32 %v5311_v61, %v3412_v20  ;;  %5332 = vrcp.f32 %v3380_v57 }
 0x86a   :  { %v5315_v36 = vpop.eup %5314  ;;  %v3429_v37 = vmul.f32 %v5313_v40, %v3413_v44  ;;  %5334 = vrcp.f32 %v3381_v51 }
 0x86b   :  { %v5317_v19 = vpop.eup %5316  ;;  %v3430_v35 = vmul.f32 %v5315_v36, %v3414_v18  ;;  %v7257_v43 = vadd.f32 %v7225_v60, %v3428_v54  ;;  %5336 = vrcp.f32 %v3382_v24  ;;  %v3419_v60 = vrot.slane %v7133_v28, 7 }
 0x86c   :  { %v5319_v8 = vpop.eup %5318  ;;  %v3431_v0 = vmul.f32 %v5317_v19, %v3415_v49  ;;  %v7261_v13 = vadd.f32 %v7228_v50, %v3429_v37  ;;  %5338 = vrcp.f32 %v3383_v23 }
 0x86d   :  { %v5321_v42 = vpop.eup %5320  ;;  %5340 = vrcp.f32 %v3384_v3  ;;  %v3432_v34 = vmul.f32 %v5319_v8, %v3416_v38  ;;  %v7265_v10 = vadd.f32 %v7231_v55, %v3430_v35 }
 0x86e   :  { %v5323_v16 = vpop.eup %5322  ;;  %v3433_v57 = vmul.f32 %v5321_v42, %v3417_v11  ;;  %v7269_v26 = vadd.f32 %v7234_v29, %v3431_v0  ;;  %5342 = vtanh.f32 %v7257_v43 }
 0x86f   :  { %v5325_v52 = vpop.eup %5324  ;;  %v3434_v50 = vmul.f32 %v5323_v16, %v3418_v46  ;;  %v7273_v51 = vadd.f32 %v7237_v15, %v3432_v34  ;;  %5344 = vtanh.f32 %v7261_v13 }
 0x870   :  { %v5327_v6 = vpop.eup %5326  ;;  %v3435_v7 = vmul.f32 %v5325_v52, %v3419_v60  ;;  %v7277_v55 = vadd.f32 %v7239_v59, %v3433_v57  ;;  %5346 = vtanh.f32 %v7265_v10 }
 0x871   :  { %v5329_v28 = vpop.eup %5328  ;;  %v3385_v20 = vadd.f32 1.0, %v5327_v6  ;;  %v7281_v29 = vadd.f32 %v7242_v53, %v3434_v50  ;;  %5348 = vtanh.f32 %v7269_v26 }
 0x872   :  { %v5331_v24 = vpop.eup %5330  ;;  %v3386_v61 = vadd.f32 1.0, %v5329_v28  ;;  %v7285_v15 = vadd.f32 %v7244_v5, %v3435_v7  ;;  %5350 = vtanh.f32 %v7273_v51 }
 0x873   :  { %v5333_v44 = vpop.eup %5332  ;;  %5352 = vrcp.f32 %v3385_v20  ;;  %v3387_v59 = vadd.f32 1.0, %v5331_v24 }
 0x874   :  { %v5335_v23 = vpop.eup %5334  ;;  %5354 = vrcp.f32 %v3386_v61 }
 0x875   :  { %v5337_v40 = vpop.eup %5336  ;;  %5356 = vrcp.f32 %v3387_v59 }
 0x876   :  { %v5339_v18 = vpop.eup %5338  ;;  %5358 = vtanh.f32 %v7277_v55 }
 0x877   :  { %v5341_v53 = vpop.eup %5340  ;;  %5360 = vtanh.f32 %v7281_v29 }
 0x878   :  { %v5343_v54 = vpop.eup %5342  ;;  %5362 = vtanh.f32 %v7285_v15 }
 0x879   :  { %v5345_v5 = vpop.eup %5344  ;;  %v3460_v3 = vmul.f32 %v5343_v54, %v5333_v44 }
 0x87a   :  { %v5347_v36 = vpop.eup %5346  ;;  %v3461_v49 = vmul.f32 %v5345_v5, %v5335_v23 }
 0x87b   :  { %v5349_v37 = vpop.eup %5348  ;;  %v3462_v19 = vmul.f32 %v5347_v36, %v5337_v40  ;;  %v3468_v38 = vpack.c.bf16 %v3460_v3, %v3460_v3 }
 0x87c   :  { %v5351_v35 = vpop.eup %5350  ;;  %v3463_v8 = vmul.f32 %v5349_v37, %v5339_v18  ;;  %v3469_v11 = vpack.c.bf16 %v3461_v49, %v3461_v49 }
 0x87d   :  { %v5353_v0 = vpop.eup %5352  ;;  %v3464_v42 = vmul.f32 %v5351_v35, %v5341_v53  ;;  %v3470_v46 = vpack.c.bf16 %v3462_v19, %v3462_v19  ;;  %v3484_v34 = vunpack.c.l.b16 %v3468_v38 }
 0x87e   :  { %v5355_v16 = vpop.eup %5354  ;;  %v3471_v60 = vpack.c.bf16 %v3463_v8, %v3463_v8  ;;  %v3485_v57 = vunpack.c.l.b16 %v3469_v11 }
 0x87f   :  { %v5357_v52 = vpop.eup %5356  ;;  %v3472_v50 = vpack.c.bf16 %v3464_v42, %v3464_v42  ;;  %v3486_v6 = vunpack.c.l.b16 %v3470_v46  ;;  %v3492_v7 = vrot.slane %v3484_v34, 6 }
 0x880   :  { %v5359_v28 = vpop.eup %5358  ;;  %v3487_v20 = vunpack.c.l.b16 %v3471_v60  ;;  %v3493_v24 = vrot.slane %v3485_v57, 5 }
 0x881   :  { %v5361_v61 = vpop.eup %5360  ;;  %v3465_v44 = vmul.f32 %v5359_v28, %v5353_v0  ;;  %v3488_v59 = vunpack.c.l.b16 %v3472_v50  ;;  %v3495_v23 = vrot.slane %v3486_v6, 4  ;;  %v4461_v50 = vld [vmem:[%s7456_s4 + $0x8] sm:$0xff]   ;;  %v4462_v6 = vld [vmem:[%s7456_s4 + $0x10] sm:$0xff]   ;;  %v4464_v28 = vld [vmem:[%s7456_s4 + $0x20] sm:$0xff]  }
 0x882   :  { %v5363_v40 = vpop.eup %5362  ;;  %v3466_v18 = vmul.f32 %v5361_v61, %v5355_v16  ;;  %v3494_v53 = vsel %vm882_vm1, %v3493_v24, %v3492_v7  ;;  %v3497_v54 = vrot.slane %v3487_v20, 3  ;;  %v4463_v7 = vld [vmem:[%s7456_s4 + $0x18] sm:$0xff]   ;;  %v4465_v20 = vld [vmem:[%s7456_s4 + $0x28] sm:$0xff]   ;;  %v4466_v24 = vld [vmem:[%s7456_s4 + $0x30] sm:$0xff]  }
 0x883   :  { %v3467_v5 = vmul.f32 %v5363_v40, %v5357_v52  ;;  %v3473_v3 = vpack.c.bf16 %v3465_v44, %v3465_v44  ;;  %v3496_v36 = vsel %vm885_vm2, %v3495_v23, %v3494_v53  ;;  %v3499_v49 = vrot.slane %v3488_v59, 2  ;;  %v4460_v52 = vld [vmem:[%s7456_s4] sm:$0xff]   ;;  %v4467_v61 = vld [vmem:[%s7456_s4 + $0x38] sm:$0xff]  }
 0x884   :  { %v3474_v37 = vpack.c.bf16 %v3466_v18, %v3466_v18  ;;  %v3498_v19 = vsel %vm888_vm3, %v3497_v54, %v3496_v36 }
 0x885   :  { %v3475_v38 = vpack.c.bf16 %v3467_v5, %v3467_v5  ;;  %v3489_v35 = vunpack.c.l.b16 %v3473_v3  ;;  %v3500_v8 = vsel %vm891_vm4, %v3499_v49, %v3498_v19 }
 0x886   :  { %v3490_v42 = vunpack.c.l.b16 %v3474_v37 }
 0x887   :  { %v3491_v11 = vunpack.c.l.b16 %v3475_v38  ;;  %v3501_v0 = vrot.slane %v3489_v35, 1 }
 0x889   :  { %v3502_v46 = vsel %vm894_vm5, %v3501_v0, %v3500_v8  ;;  %v3504_v34 = vrot.slane %v3491_v11, 7 }
 0x88a   :  { %v3503_v16 = vsel %vm897_vm6, %v3490_v42, %v3502_v46 }
 0x88b   :  { %v3505_v60 = vsel %vm900_vm7, %v3504_v34, %v3503_v16 }
 0x88c   :  { %v3506_v57 = vpack.c.b16 %v3505_v60, %v3505_v60 }
 0x88e   :  { %3541 = vmatmul.mubr.bf16.vlgmr.msra.gmra.mrb[44].mxu0 %v3506_v57  ;;  %3582 = vmatmul.mubr.bf16.vlgmr.msra.gmra.mrb[44].mxu1 %v3506_v57 }
 0x88f   :  { %4394 = vmatprep.mubr.msk.bf16.mxu0 %vm5668_vm8, %v7170_v47  ;;  %4379 = vmatpush3.bf16.msra.mxu0 %v4460_v52 }
 0x890   :  { %4380 = vmatprep.subr.bf16.mxu0 %v7170_v47 }
 0x893   :  { %4381 = vmatpush3.bf16.msra.mxu0 %v4461_v50 }
 0x894   :  { %4382 = vmatprep.subr.bf16.mxu0 %v7170_v47 }
 0x897   :  { %4383 = vmatpush3.bf16.msra.mxu0 %v4462_v6 }
 0x898   :  { %4384 = vmatprep.subr.bf16.mxu0 %v7170_v47 }
 0x89b   :  { %4385 = vmatpush3.bf16.msra.mxu0 %v4463_v7 }
 0x89c   :  { %4386 = vmatprep.subr.bf16.mxu0 %v7170_v47 }
 0x89f   :  { %4387 = vmatpush3.bf16.msra.mxu0 %v4464_v28 }
 0x8a0   :  { %4388 = vmatprep.subr.bf16.mxu0 %v7170_v47 }
 0x8a3   :  { %4389 = vmatpush3.bf16.msra.mxu0 %v4465_v20 }
 0x8a4   :  { %4390 = vmatprep.subr.bf16.mxu0 %v7170_v47 }
 0x8a7   :  { %4391 = vmatpush3.bf16.msra.mxu0 %v4466_v24 }
 0x8a8   :  { %4392 = vmatprep.subr.bf16.mxu0 %v7170_v47 }
 0x8ab   :  { %4393 = vmatpush3.bf16.msra.mxu0 %v4467_v61 }
 0x961   :  { %v3542_v44 = vpop.f32.mrb[44].mxu0  ;;  %v7330_v59 = vpop.f32.mrb[44].mxu1 }
 0x962   :  { %v3594_v23 = vrot.slane %v3542_v44, 1  ;;  %v3598_v40 = vrot.slane %v3542_v44, 2  ;;  %v3602_v18 = vrot.slane %v3542_v44, 3  ;;  %v3606_v53 = vrot.slane %v3542_v44, 4  ;;  %v7332_v54 = vpop.f32.mrb[45].mxu0  ;;  %v7334_v5 = vpop.f32.mrb[45].mxu1 }
 0x963   :  { %v3610_v3 = vrot.slane %v3542_v44, 5  ;;  %v3614_v36 = vrot.slane %v3542_v44, 6  ;;  %v3618_v49 = vrot.slane %v3542_v44, 7  ;;  %v3682_v37 = vadd.f32 %v3542_v44, %v7756_v4  ;;  %v3546_v19 = vpop.f32.mrb[46].mxu0  ;;  %v3587_v38 = vpop.f32.mrb[46].mxu1 }
 0x964   :  { %v3654_v47 = vadd.f32 %v3594_v23, %v7750_v2  ;;  %v3658_v35 = vadd.f32 %v3598_v40, %v7751_v17  ;;  %v3662_v8 = vadd.f32 %v3602_v18, %v7752_v21  ;;  %v3666_v11 = vadd.f32 %v3606_v53, %v7753_v41  ;;  %v3547_v0 = vpop.f32.mrb[47].mxu0  ;;  %v3588_v42 = vpop.f32.mrb[47].mxu1 }
 0x965   :  { %v3670_v46 = vadd.f32 %v3610_v3, %v7754_v63  ;;  %v3674_v34 = vadd.f32 %v3614_v36, %v7755_v62  ;;  %v4343_v16 = vmul.f32 -1.442695, %v3682_v37  ;;  %v3678_v60 = vadd.f32 %v3618_v49, %v7701_v12 }
 0x966   :  { %v4336_v4 = vmul.f32 -1.442695, %v3654_v47  ;;  %v4337_v57 = vmul.f32 -1.442695, %v3658_v35  ;;  %v4338_v52 = vmul.f32 -1.442695, %v3662_v8 }
 0x967   :  { %v4339_v50 = vmul.f32 -1.442695, %v3666_v11  ;;  %5364 = vpow2.f32 %v4343_v16  ;;  %v4340_v2 = vmul.f32 -1.442695, %v3670_v46  ;;  %v3596_v17 = vrot.slane %v7330_v59, 1  ;;  %v7773_v46 = vld [vmem:[#allocation26_spill] sm:$0xff] }
 0x968   :  { %5366 = vpow2.f32 %v4336_v4  ;;  %v3600_v21 = vrot.slane %v7330_v59, 2  ;;  %v4341_v41 = vmul.f32 -1.442695, %v3674_v34  ;;  %v3604_v63 = vrot.slane %v7330_v59, 3  ;;  %v7774_v4 = vld [vmem:[#allocation32_spill] sm:$0xff] }
 0x969   :  { %5368 = vpow2.f32 %v4337_v57  ;;  %v4342_v62 = vmul.f32 -1.442695, %v3678_v60  ;;  %v3608_v6 = vrot.slane %v7330_v59, 4  ;;  %v3612_v12 = vrot.slane %v7330_v59, 5 }
 0x96a   :  { %5370 = vpow2.f32 %v4338_v52  ;;  %v3656_v7 = vadd.f32 %v3596_v17, %v7757_v48  ;;  %v3660_v28 = vadd.f32 %v3600_v21, %v7758_v27  ;;  %v3664_v20 = vadd.f32 %v3604_v63, %v7759_v30 }
 0x96b   :  { %5372 = vpow2.f32 %v4339_v50  ;;  %v3668_v24 = vadd.f32 %v3608_v6, %v7760_v31  ;;  %v3672_v61 = vadd.f32 %v3612_v12, %v7761_v1  ;;  %v3616_v23 = vrot.slane %v7330_v59, 6 }
 0x96c   :  { %5374 = vpow2.f32 %v4340_v2  ;;  %v3620_v48 = vrot.slane %v7330_v59, 7  ;;  %v3595_v30 = vrot.slane %v7332_v54, 1  ;;  %v3599_v1 = vrot.slane %v7332_v54, 2  ;;  %v7775_v2 = vld [vmem:[#allocation34_spill] sm:$0xff] }
 0x96d   :  { %5376 = vpow2.f32 %v4341_v41  ;;  %v3676_v37 = vadd.f32 %v3616_v23, %v7762_v33  ;;  %v3603_v19 = vrot.slane %v7332_v54, 3  ;;  %v3607_v8 = vrot.slane %v7332_v54, 4  ;;  %v7776_v41 = vld [vmem:[#allocation42_spill] sm:$0xff] }
 0x96e   :  { %5378 = vpow2.f32 %v4342_v62  ;;  %v3680_v35 = vadd.f32 %v3620_v48, %v7765_v32  ;;  %v3611_v42 = vrot.slane %v7332_v54, 5  ;;  %v3655_v34 = vadd.f32 %v3595_v30, %v7773_v46  ;;  %v7777_v62 = vld [vmem:[#allocation36_spill] sm:$0xff] }
 0x96f   :  { %5380 = vtanh.f32 %v3656_v7  ;;  %v3615_v33 = vrot.slane %v7332_v54, 6  ;;  %v3659_v57 = vadd.f32 %v3599_v1, %v7774_v4  ;;  %v3619_v32 = vrot.slane %v7332_v54, 7  ;;  %v7778_v7 = vld [vmem:[#allocation37_spill] sm:$0xff] }
 0x970   :  { %5382 = vtanh.f32 %v3660_v28  ;;  %v3663_v17 = vadd.f32 %v3603_v19, %v7775_v2  ;;  %v3684_v63 = vadd.f32 %v7330_v59, %v7776_v41  ;;  %v3667_v6 = vadd.f32 %v3607_v8, %v7777_v62 }
 0x971   :  { %v5365_v44 = vpop.eup %5364  ;;  %5384 = vtanh.f32 %v3664_v20  ;;  %v3671_v28 = vadd.f32 %v3611_v42, %v7778_v7  ;;  %v4344_v20 = vmul.f32 -1.442695, %v3655_v34  ;;  %v3605_v30 = vrot.slane %v7334_v5, 3 }
 0x972   :  { %v5367_v40 = vpop.eup %5366  ;;  %v3717_v18 = vadd.f32 1.0, %v5365_v44  ;;  %5386 = vtanh.f32 %v3668_v24  ;;  %v3597_v24 = vrot.slane %v7334_v5, 1  ;;  %v7779_v44 = vld [vmem:[#allocation40_spill] sm:$0xff] }
 0x973   :  { %v5369_v27 = vpop.eup %5368  ;;  %v3710_v53 = vadd.f32 1.0, %v5367_v40  ;;  %5388 = vtanh.f32 %v3672_v61  ;;  %v3675_v23 = vadd.f32 %v3615_v33, %v7779_v44  ;;  %v4345_v40 = vmul.f32 -1.442695, %v3659_v57 }
 0x974   :  { %v5371_v3 = vpop.eup %5370  ;;  %v3711_v31 = vadd.f32 1.0, %v5369_v27  ;;  %5390 = vrcp.f32 %v3717_v18  ;;  %v3601_v18 = vrot.slane %v7334_v5, 2  ;;  %v7780_v27 = vld [vmem:[#allocation41_spill] sm:$0xff]  ;;  %v4348_v19 = vmul.f32 -1.442695, %v3671_v28 }
 0x975   :  { %v5373_v36 = vpop.eup %5372  ;;  %v3712_v49 = vadd.f32 1.0, %v5371_v3  ;;  %5392 = vrcp.f32 %v3710_v53  ;;  %v3679_v59 = vadd.f32 %v3619_v32, %v7780_v27  ;;  %v4346_v53 = vmul.f32 -1.442695, %v3663_v17 }
 0x976   :  { %v5375_v38 = vpop.eup %5374  ;;  %v3713_v47 = vadd.f32 1.0, %v5373_v36  ;;  %5394 = vrcp.f32 %v3711_v31  ;;  %v7781_v31 = vld [vmem:[#allocation43_spill] sm:$0xff]  ;;  %v4347_v36 = vmul.f32 -1.442695, %v3667_v6  ;;  %v3665_v34 = vadd.f32 %v3605_v30, %v7686_v9 }
 0x977   :  { %v5377_v11 = vpop.eup %5376  ;;  %v3714_v0 = vadd.f32 1.0, %v5375_v38  ;;  %5396 = vrcp.f32 %v3712_v49  ;;  %v3683_v1 = vadd.f32 %v7332_v54, %v7781_v31  ;;  %v3609_v49 = vrot.slane %v7334_v5, 4 }
 0x978   :  { %v5379_v16 = vpop.eup %5378  ;;  %v3715_v60 = vadd.f32 1.0, %v5377_v11  ;;  %5398 = vrcp.f32 %v3713_v47  ;;  %v3613_v38 = vrot.slane %v7334_v5, 5  ;;  %v3657_v47 = vadd.f32 %v3597_v24, %v7630_v56 }
 0x979   :  { %v5381_v52 = vpop.eup %5380  ;;  %v3716_v50 = vadd.f32 1.0, %v5379_v16  ;;  %5400 = vrcp.f32 %v3714_v0  ;;  %v4349_v11 = vmul.f32 -1.442695, %v3675_v23  ;;  %v3661_v0 = vadd.f32 %v3601_v18, %v7661_v45 }
 0x97a   :  { %v5383_v21 = vpop.eup %5382  ;;  %5402 = vrcp.f32 %v3715_v60  ;;  %v4350_v54 = vmul.f32 -1.442695, %v3679_v59  ;;  %v4351_v33 = vmul.f32 -1.442695, %v3683_v1  ;;  %v3669_v56 = vadd.f32 %v3609_v49, %v6034_v58 }
 0x97b   :  { %v5385_v12 = vpop.eup %5384  ;;  %5404 = vrcp.f32 %v3716_v50  ;;  %v3673_v45 = vadd.f32 %v3613_v38, %v6048_v22  ;;  %v4353_v2 = vmul.f32 -1.442695, %v3661_v0  ;;  %v4354_v17 = vmul.f32 -1.442695, %v3665_v34 }
 0x97c   :  { %v5387_v61 = vpop.eup %5386  ;;  %5406 = vtanh.f32 %v3676_v37  ;;  %v4355_v41 = vmul.f32 -1.442695, %v3669_v56  ;;  %v3617_v22 = vrot.slane %v7334_v5, 6  ;;  %v3621_v28 = vrot.slane %v7334_v5, 7 }
 0x97d   :  { %v5389_v48 = vpop.eup %5388  ;;  %5408 = vtanh.f32 %v3680_v35  ;;  %v4356_v62 = vmul.f32 -1.442695, %v3673_v45  ;;  %v3848_v45 = vrot.slane %v7265_v10, 7  ;;  %v3852_v10 = vrot.slane %v7281_v29, 7 }
 0x97e   :  { %v5391_v3 = vpop.eup %5390  ;;  %5410 = vtanh.f32 %v3684_v63 }
 0x97f   :  { %v5393_v37 = vpop.eup %5392  ;;  %5412 = vpow2.f32 %v4344_v20 }
 0x980   :  { %v5395_v35 = vpop.eup %5394  ;;  %v7382_v8 = vmul.f32 %v5393_v37, %v5381_v52  ;;  %5414 = vpow2.f32 %v4345_v40  ;;  %v4352_v52 = vmul.f32 -1.442695, %v3657_v47 }
 0x981   :  { %v5397_v42 = vpop.eup %5396  ;;  %v7385_v46 = vmul.f32 %v5395_v35, %v5383_v21  ;;  %5416 = vpow2.f32 %v4346_v53  ;;  %v3681_v53 = vadd.f32 %v3621_v28, %v6122_v25 }
 0x982   :  { %v5399_v16 = vpop.eup %5398  ;;  %v7388_v60 = vmul.f32 %v5397_v42, %v5385_v12  ;;  %5418 = vpow2.f32 %v4347_v36 }
 0x983   :  { %v5401_v4 = vpop.eup %5400  ;;  %v7391_v57 = vmul.f32 %v5399_v16, %v5387_v61  ;;  %5420 = vpow2.f32 %v4348_v19  ;;  %v4358_v47 = vmul.f32 -1.442695, %v3681_v53 }
 0x984   :  { %v5403_v50 = vpop.eup %5402  ;;  %v7394_v32 = vmul.f32 %v5401_v4, %v5389_v48  ;;  %5422 = vpow2.f32 %v4349_v11  ;;  %v3677_v48 = vadd.f32 %v3617_v22, %v6115_v39 }
 0x985   :  { %v5405_v9 = vpop.eup %5404  ;;  %5424 = vpow2.f32 %v4350_v54  ;;  %v3846_v54 = vrot.slane %v7257_v43, 7 }
 0x986   :  { %v5407_v21 = vpop.eup %5406  ;;  %5426 = vpow2.f32 %v4351_v33  ;;  %v4357_v19 = vmul.f32 -1.442695, %v3677_v48  ;;  %v3847_v33 = vrot.slane %v7261_v13, 7 }
 0x987   :  { %v5409_v63 = vpop.eup %5408  ;;  %v7396_v58 = vmul.f32 %v5407_v21, %v5403_v50  ;;  %5428 = vpow2.f32 %v4352_v52 }
 0x988   :  { %v5411_v6 = vpop.eup %5410  ;;  %5430 = vpow2.f32 %v4353_v2  ;;  %v7399_v12 = vmul.f32 %v5409_v63, %v5405_v9  ;;  %v3849_v9 = vrot.slane %v7269_v26, 7  ;;  %v3853_v26 = vrot.slane %v7285_v15, 7 }
 0x989   :  { %v5413_v7 = vpop.eup %5412  ;;  %5432 = vpow2.f32 %v4354_v17  ;;  %v7402_v20 = vmul.f32 %v5411_v6, %v5391_v3  ;;  %v3685_v3 = vadd.f32 %v7334_v5, %v6129_v14  ;;  %v3850_v17 = vrot.slane %v7273_v51, 7 }
 0x98a   :  { %v5415_v24 = vpop.eup %5414  ;;  %v3758_v61 = vadd.f32 1.0, %v5413_v7  ;;  %5434 = vpow2.f32 %v4355_v41  ;;  %v3851_v41 = vrot.slane %v7277_v55, 7 }
 0x98b   :  { %v5417_v44 = vpop.eup %5416  ;;  %v3759_v23 = vadd.f32 1.0, %v5415_v24  ;;  %5436 = vpow2.f32 %v4356_v62  ;;  %v4359_v25 = vmul.f32 -1.442695, %v3685_v3 }
 0x98c   :  { %v5419_v40 = vpop.eup %5418  ;;  %v3760_v18 = vadd.f32 1.0, %v5417_v44  ;;  %5438 = vrcp.f32 %v3758_v61 }
 0x98d   :  { %v5421_v27 = vpop.eup %5420  ;;  %v3761_v59 = vadd.f32 1.0, %v5419_v40  ;;  %5440 = vrcp.f32 %v3759_v23 }
 0x98e   :  { %v5423_v30 = vpop.eup %5422  ;;  %v3762_v31 = vadd.f32 1.0, %v5421_v27  ;;  %5442 = vrcp.f32 %v3760_v18 }
 0x98f   :  { %v5425_v1 = vpop.eup %5424  ;;  %v3763_v36 = vadd.f32 1.0, %v5423_v30  ;;  %5444 = vrcp.f32 %v3761_v59 }
 0x990   :  { %v5427_v49 = vpop.eup %5426  ;;  %v3764_v37 = vadd.f32 1.0, %v5425_v1  ;;  %5446 = vrcp.f32 %v3762_v31 }
 0x991   :  { %v5429_v38 = vpop.eup %5428  ;;  %v3765_v39 = vadd.f32 1.0, %v5427_v49  ;;  %5448 = vrcp.f32 %v3763_v36 }
 0x992   :  { %v5431_v35 = vpop.eup %5430  ;;  %5450 = vrcp.f32 %v3764_v37  ;;  %v3814_v0 = vadd.f32 1.0, %v5429_v38 }
 0x993   :  { %v5433_v11 = vpop.eup %5432  ;;  %5452 = vrcp.f32 %v3765_v39  ;;  %v3815_v14 = vadd.f32 1.0, %v5431_v35 }
 0x994   :  { %v5435_v42 = vpop.eup %5434  ;;  %5454 = vpow2.f32 %v4357_v19  ;;  %v3816_v34 = vadd.f32 1.0, %v5433_v11 }
 0x995   :  { %v5437_v5 = vpop.eup %5436  ;;  %5456 = vpow2.f32 %v4358_v47  ;;  %v3817_v56 = vadd.f32 1.0, %v5435_v42 }
 0x996   :  { %v5439_v16 = vpop.eup %5438  ;;  %5458 = vpow2.f32 %v4359_v25  ;;  %v3818_v50 = vadd.f32 1.0, %v5437_v5 }
 0x997   :  { %v5441_v4 = vpop.eup %5440  ;;  %v3862_v52 = vmul.f32 %v5439_v16, %v3846_v54  ;;  %5460 = vrcp.f32 %v3814_v0 }
 0x998   :  { %v5443_v2 = vpop.eup %5442  ;;  %v3863_v21 = vmul.f32 %v5441_v4, %v3847_v33  ;;  %5462 = vrcp.f32 %v3815_v14 }
 0x999   :  { %v5445_v43 = vpop.eup %5444  ;;  %v3864_v63 = vmul.f32 %v5443_v2, %v3848_v45  ;;  %v3878_v13 = vadd.f32 %v7382_v8, %v3862_v52  ;;  %5464 = vrcp.f32 %v3816_v34 }
 0x99a   :  { %v5447_v62 = vpop.eup %5446  ;;  %v3865_v6 = vmul.f32 %v5445_v43, %v3849_v9  ;;  %v3879_v22 = vadd.f32 %v7385_v46, %v3863_v21  ;;  %5466 = vrcp.f32 %v3817_v56 }
 0x99b   :  { %v5449_v7 = vpop.eup %5448  ;;  %v3880_v51 = vadd.f32 %v7388_v60, %v3864_v63  ;;  %5468 = vrcp.f32 %v3818_v50  ;;  %v3866_v28 = vmul.f32 %v5447_v62, %v3850_v17 }
 0x99c   :  { %v5451_v24 = vpop.eup %5450  ;;  %v3867_v55 = vmul.f32 %v5449_v7, %v3851_v41  ;;  %v3881_v61 = vadd.f32 %v7391_v57, %v3865_v6  ;;  %5470 = vtanh.f32 %v3878_v13 }
 0x99d   :  { %v5453_v8 = vpop.eup %5452  ;;  %v3868_v44 = vmul.f32 %v5451_v24, %v3852_v10  ;;  %v3882_v29 = vadd.f32 %v7394_v32, %v3866_v28  ;;  %5472 = vtanh.f32 %v3879_v22 }
 0x99e   :  { %v5455_v23 = vpop.eup %5454  ;;  %v3869_v46 = vmul.f32 %v5453_v8, %v3853_v26  ;;  %v3883_v40 = vadd.f32 %v7396_v58, %v3867_v55  ;;  %5474 = vtanh.f32 %v3880_v51 }
 0x99f   :  { %v5457_v15 = vpop.eup %5456  ;;  %v3819_v18 = vadd.f32 1.0, %v5455_v23  ;;  %v3884_v60 = vadd.f32 %v7399_v12, %v3868_v44  ;;  %5476 = vtanh.f32 %v3881_v61 }
 0x9a0   :  { %v5459_v48 = vpop.eup %5458  ;;  %v3820_v27 = vadd.f32 1.0, %v5457_v15  ;;  %v3885_v57 = vadd.f32 %v7402_v20, %v3869_v46  ;;  %5478 = vtanh.f32 %v3882_v29 }
 0x9a1   :  { %v5461_v59 = vpop.eup %5460  ;;  %v3821_v53 = vadd.f32 1.0, %v5459_v48  ;;  %5480 = vrcp.f32 %v3819_v18 }
 0x9a2   :  { %v5463_v32 = vpop.eup %5462  ;;  %5482 = vrcp.f32 %v3820_v27 }
 0x9a3   :  { %v5465_v30 = vpop.eup %5464  ;;  %5484 = vrcp.f32 %v3821_v53 }
 0x9a4   :  { %v5467_v31 = vpop.eup %5466  ;;  %5486 = vtanh.f32 %v3883_v40 }
 0x9a5   :  { %v5469_v58 = vpop.eup %5468  ;;  %5488 = vtanh.f32 %v3884_v60 }
 0x9a6   :  { %v5471_v3 = vpop.eup %5470  ;;  %5490 = vtanh.f32 %v3885_v57 }
 0x9a7   :  { %v5473_v12 = vpop.eup %5472  ;;  %v3894_v1 = vmul.f32 %v5471_v3, %v5461_v59 }
 0x9a8   :  { %v5475_v36 = vpop.eup %5474  ;;  %v3895_v49 = vmul.f32 %v5473_v12, %v5463_v32 }
 0x9a9   :  { %v5477_v37 = vpop.eup %5476  ;;  %v3896_v20 = vmul.f32 %v5475_v36, %v5465_v30  ;;  %3925 = vst [vmem:[#allocation2 - $0x7] sm:$0x80] %v3894_v1  ;;  %v3955_v19 = vpack.c.bf16 %v3894_v1, %v3894_v1 }
 0x9aa   :  { %v5479_v38 = vpop.eup %5478  ;;  %v3897_v39 = vmul.f32 %v5477_v37, %v5467_v31  ;;  %v3910_v47 = vrot.slane %v3895_v49, 7  ;;  %v3956_v35 = vpack.c.bf16 %v3895_v49, %v3895_v49 }
 0x9ab   :  { %v5481_v25 = vpop.eup %5480  ;;  %v3898_v11 = vmul.f32 %v5479_v38, %v5469_v58  ;;  %v3911_v0 = vrot.slane %v3896_v20, 6  ;;  %v3957_v42 = vpack.c.bf16 %v3896_v20, %v3896_v20  ;;  %v3994_v14 = vunpack.c.l.b16 %v3955_v19  ;;  %v4360_v58 = vld [vmem:[%s7457_s5] ss:$0 sm:$0xff] }
 0x9ac   :  { %v5483_v5 = vpop.eup %5482  ;;  %v3913_v54 = vrot.slane %v3897_v39, 5  ;;  %v3958_v34 = vpack.c.bf16 %v3897_v39, %v3897_v39  ;;  %v3995_v16 = vunpack.c.l.b16 %v3956_v35 }
 0x9ad   :  { %v5485_v33 = vpop.eup %5484  ;;  %v3912_v56 = vsel %vm882_vm1, %v3911_v0, %v3910_v47  ;;  %v3915_v4 = vrot.slane %v3898_v11, 4  ;;  %v3959_v45 = vpack.c.bf16 %v3898_v11, %v3898_v11  ;;  %v3996_v52 = vunpack.c.l.b16 %v3957_v42 }
 0x9ae   :  { %v5487_v50 = vpop.eup %5486  ;;  %v3914_v2 = vsel %vm885_vm2, %v3913_v54, %v3912_v56  ;;  %v3997_v9 = vunpack.c.l.b16 %v3958_v34  ;;  %v4002_v17 = vrot.slane %v3994_v14, 7  ;;  %v4003_v21 = vrot.slane %v3995_v16, 6 }
 0x9af   :  { %v5489_v43 = vpop.eup %5488  ;;  %v3899_v41 = vmul.f32 %v5487_v50, %v5481_v25  ;;  %v3916_v63 = vsel %vm888_vm3, %v3915_v4, %v3914_v2  ;;  %v3998_v13 = vunpack.c.l.b16 %v3959_v45  ;;  %v4005_v62 = vrot.slane %v3996_v52, 5 }
 0x9b0   :  { %v5491_v10 = vpop.eup %5490  ;;  %v3900_v6 = vmul.f32 %v5489_v43, %v5483_v5  ;;  %v4004_v22 = vsel %vm882_vm1, %v4003_v21, %v4002_v17  ;;  %v4007_v7 = vrot.slane %v3997_v9, 4 }
 0x9b1   :  { %v3901_v26 = vmul.f32 %v5491_v10, %v5485_v33  ;;  %v3917_v51 = vrot.slane %v3899_v41, 3  ;;  %v3960_v28 = vpack.c.bf16 %v3899_v41, %v3899_v41  ;;  %v4006_v24 = vsel %vm885_vm2, %v4005_v62, %v4004_v22 }
 0x9b2   :  { %v3919_v55 = vrot.slane %v3900_v6, 2  ;;  %v3961_v61 = vpack.c.bf16 %v3900_v6, %v3900_v6  ;;  %v4008_v8 = vsel %vm888_vm3, %v4007_v7, %v4006_v24  ;;  %v4009_v44 = vrot.slane %v3998_v13, 3 }
 0x9b3   :  { %v3918_v29 = vsel %vm891_vm4, %v3917_v51, %v3916_v63  ;;  %v3921_v23 = vrot.slane %v3901_v26, 1  ;;  %v3962_v46 = vpack.c.bf16 %v3901_v26, %v3901_v26  ;;  %v3999_v40 = vunpack.c.l.b16 %v3960_v28 }
 0x9b4   :  { %v3920_v15 = vsel %vm894_vm5, %v3919_v55, %v3918_v29  ;;  %v4000_v18 = vunpack.c.l.b16 %v3961_v61  ;;  %v4010_v60 = vsel %vm891_vm4, %v4009_v44, %v4008_v8 }
 0x9b5   :  { %v3922_v48 = vsel %vm897_vm6, %v3921_v23, %v3920_v15  ;;  %v4011_v27 = vrot.slane %v3999_v40, 2  ;;  %v4001_v59 = vunpack.c.l.b16 %v3962_v46 }
 0x9b6   :  { %3926 = vst [vmem:[#allocation2 + $0x1] sm:$0x7f] %v3922_v48  ;;  %v4013_v57 = vrot.slane %v4000_v18, 1 }
 0x9b7   :  { %v4012_v53 = vsel %vm894_vm5, %v4011_v27, %v4010_v60 }
 0x9b8   :  { %v4014_v32 = vsel %vm897_vm6, %v4013_v57, %v4012_v53 }
 0x9b9   :  { %v4015_v30 = vsel %vm900_vm7, %v4001_v59, %v4014_v32 }
 0x9ba   :  { %v4016_v31 = vpack.c.b16 %v4015_v30, %v4015_v30 }
 0x9bc   :  { %4395 = vmatmul.mubr.bf16.vlgmr.msra.gmra.mrb[48].mxu0 %v4016_v31 }
 0xa8f   :  { %v4100_v3 = vpop.f32.mrb[48].mxu0 }
 0xa90   :  { %v4101_v12 = vadd.f32 %v4360_v58, %v4100_v3  ;;  %v4396_v1 = vpop.f32.mrb[49].mxu0 }
 0xa91   :  { %v4103_v36 = vpop.f32.mrb[50].mxu0 }
 0xa92   :  { %v4397_v49 = vpop.f32.mrb[51].mxu0  ;;  %4107 = vst.msk [vmem:[#allocation9] sm:$0xff] %vm4106_vm9, %v4101_v12 }
 0xa93   :  { %5644 = shalt.err (!%p5641_p6)
}
 0xa94   :  { %s5645_s5 = scalar_lea.hbm %s7458_s6, 128 }
 0xa95   :  { %p5646_p7 = scmp.ne.s32.totalorder %s7458_s6, %s5645_s5  ;;  %p5649_p8 = scmp.lt.u32.totalorder %s5645_s5, %s7458_s6 }
 0xa97   :  { %p5651_p9 = pnand %p5649_p8, %p5646_p7 }
 0xa99   :  { %5654 = shalt.err (!%p5651_p9)
}
 0xa9a   :  { %4117 = dma.vmem_to_hbm [thread:$0]  %s4115_s29, 128, %s7458_s6, [#allocation6]  }
 0xa9b   :  { %5659 = dma.done.wait [#allocation6], 128  }
 0xa9c   :  { %5660 = vsyncadd [#allocation6], 4294967168 }
 0xa9d   :  { %4121 = vsyncpa [#allocation5], 1 }
 0xa9e   :  { %4122 = vsyncpa [#allocation8], 1 }
 0xa9f   :  { %4123 = vsyncpa [#allocation6], 1 }

</bundles_post_ra>
